<compile_context>
chip_gen: v5e
topology: v5e:2x2
jax: 0.10.0
libtpu: 0.0.40
codegen_flags: <defaults>
</compile_context>

<pallas_src>
import math
from functools import partial

import numpy as np
import jax
import jax.numpy as jnp
from jax.experimental import pallas as pl
from jax.experimental.pallas import tpu as pltpu

TWO_PI = 2.0 * math.pi
CP = 128  # lane-padded channel width; every channel count in the model must be <= CP


# ----------------------------------------------------------------------------
# Fused decoder kernel
# ----------------------------------------------------------------------------
def _make_decoder_kernel(L_in, n_res):
    L0 = L_in + 3  # length after the K=4 "full" transpose-conv

    def kernel(x_ref, wt_ref, w_ref, scale_ref, shift_ref, u_ref, out_ref, pad_buf):
        f32, bf16 = jnp.float32, jnp.bfloat16

        def conv(ss_idx, w_col, L_out, K, act, has_bn, residual=None):
            # im2col: one (L_out, K*CP) x (K*CP, CP) bf16 matmul, f32 accumulate.
            cols = jnp.concatenate(
                [pad_buf[k:k + L_out, :] for k in range(K)], axis=-1)
            acc = jnp.dot(cols.astype(bf16), w_col, preferred_element_type=f32)
            if residual is not None:
                acc = acc + residual
            shift = shift_ref[ss_idx:ss_idx + 1, :]
            if has_bn:
                acc = acc * scale_ref[ss_idx:ss_idx + 1, :] + shift
            else:
                acc = acc + shift  # identity scale: skip the multiply
            if act == "silu":
                acc = acc * jax.nn.sigmoid(acc)
            elif act == "tanh2pi":
                acc = jnp.tanh(acc) * TWO_PI
            return acc

        # Zero the padded-activation buffer once per grid step; rows that are
        # never overwritten provide the zero padding for every conv below.
        pad_buf[...] = jnp.zeros_like(pad_buf)

        # --- SiLU(ConvTranspose1d(latent, ch*16, 4, 1)) == full conv, pad=3 ---
        pad_buf[3:3 + L_in, :] = x_ref[0]
        h = conv(0, wt_ref[...], L0, 4, "silu", has_bn=False)

        # --- ResUp blocks: 2x linear upsample (matmul) + conv3 / conv1 / conv2 ---
        L = L0
        for blk in range(n_res):
            Lo = 2 * L
            up = jnp.dot(u_ref[blk][:Lo, :L], h, preferred_element_type=f32)
            pad_buf[1:1 + Lo, :] = up
            s = 1 + 3 * blk                       # scale/shift row; weight row = s-1
            skip = conv(s + 0, w_ref[3 * blk + 0], Lo, 3, "none", has_bn=False)
            t = conv(s + 1, w_ref[3 * blk + 1], Lo, 3, "silu", has_bn=True)
            pad_buf[1:1 + Lo, :] = t
            h = conv(s + 2, w_ref[3 * blk + 2], Lo, 3, "silu", has_bn=True,
                     residual=skip)
            L = Lo

        # --- tanh(Conv1d(ch, out_channels, 3, 1, 1)) * 2*pi ---
        pad_buf[1:1 + L, :] = h
        y = conv(1 + 3 * n_res, w_ref[3 * n_res], L, 3, "tanh2pi", has_bn=False)
        out_ref[0] = y.astype(out_ref.dtype)

    return kernel


def _decoder_cost(B, L_in, n_res, bytes_accessed):
    L0 = L_in + 3
    flops = 2 * L0 * (4 * CP) * CP            # transpose-conv
    trans = L0 * CP                           # SiLU sigmoid
    L = L0
    for _ in range(n_res):
        Lo = 2 * L
        flops += 2 * Lo * L * CP              # upsample matmul
        flops += 3 * 2 * Lo * (3 * CP) * CP   # three convs
        trans += 2 * Lo * CP                  # two SiLUs
        L = Lo
    flops += 2 * L * (3 * CP) * CP            # output conv
    trans += L * CP                           # tanh
    return pl.CostEstimate(flops=B * flops, transcendentals=B * trans,
                           bytes_accessed=int(bytes_accessed))


def decoder_forward_pallas(kp, x_ncl, *, out_channels):
    """x_ncl: (B, latent_dim, L) PyTorch NCL layout -> (B, out_channels, L_out)."""
    B, latent, L_in = x_ncl.shape
    n_res = kp["u_pack"].shape[0]
    L_out = (L_in + 3) * (2 ** n_res)
    buf_rows = -(-max(L_in + 6, L_out + 2) // 8) * 8

    x = jnp.transpose(x_ncl, (0, 2, 1))                   # (B, L_in, latent)
    x = jnp.pad(x, ((0, 0), (0, 0), (0, CP - latent)))    # lane-pad channels to 128

    bytes_accessed = (x.size * 4 + kp["wt"].size * 2 + kp["w_all"].size * 2
                      + kp["scale_all"].size * 4 + kp["shift_all"].size * 4
                      + kp["u_pack"].size * 4 + B * L_out * CP * 4)

    out = pl.pallas_call(
        _make_decoder_kernel(L_in, n_res),
        out_shape=jax.ShapeDtypeStruct((B, L_out, CP), jnp.float32),
        grid=(B,),
        in_specs=[
            pl.BlockSpec((1, L_in, CP), lambda b: (b, 0, 0)),       # latent slab
            pl.BlockSpec(kp["wt"].shape, lambda b: (0, 0)),         # transpose-conv W
            pl.BlockSpec(kp["w_all"].shape, lambda b: (0, 0, 0)),   # all K=3 conv W
            pl.BlockSpec(kp["scale_all"].shape, lambda b: (0, 0)),  # folded BN scale
            pl.BlockSpec(kp["shift_all"].shape, lambda b: (0, 0)),  # folded bias/shift
            pl.BlockSpec(kp["u_pack"].shape, lambda b: (0, 0, 0)),  # upsample matrices
        ],
        out_specs=pl.BlockSpec((1, L_out, CP), lambda b: (b, 0, 0)),
        scratch_shapes=[pltpu.VMEM((buf_rows, CP), jnp.float32)],
        compiler_params=pltpu.CompilerParams(dimension_semantics=("parallel",)),
        cost_estimate=_decoder_cost(B, L_in, n_res, bytes_accessed),
    )(x, kp["wt"], kp["w_all"], kp["scale_all"], kp["shift_all"], kp["u_pack"])

    return jnp.transpose(out[:, :, :out_channels], (0, 2, 1))


# ----------------------------------------------------------------------------
# Parameter packing (lane-dense, bf16 weights, folded bias+BN affine)
# ----------------------------------------------------------------------------
def _upsample_matrix(L):
    # nn.Upsample(scale_factor=2, mode='linear', align_corners=False):
    #   y[2i] = 0.25*x[i-1] + 0.75*x[i];  y[2i+1] = 0.75*x[i] + 0.25*x[i+1]  (clamped)
    U = np.zeros((2 * L, L), np.float32)
    for j in range(2 * L):
        i = j // 2
        if j % 2 == 0:
            U[j, max(i - 1, 0)] += 0.25
            U[j, i] += 0.75
        else:
            U[j, i] += 0.75
            U[j, min(i + 1, L - 1)] += 0.25
    return U


def build_upsample_pack(L0, n_res):
    Lmax = L0 * 2 ** (n_res - 1)
    pack = np.zeros((n_res, 2 * Lmax, Lmax), np.float32)
    L = L0
    for blk in range(n_res):
        pack[blk, :2 * L, :L] = _upsample_matrix(L)
        L *= 2
    return jnp.asarray(pack)


def pack_decoder_params(params, L_in):
    def pad_taps(taps):
        K, cin, cout = taps.shape
        assert cin <= CP and cout <= CP, (cin, cout)
        t = jnp.zeros((K, CP, CP), jnp.float32).at[:, :cin, :cout].set(taps)
        return t.reshape(K * CP, CP).astype(jnp.bfloat16)

    def pad_vec(v):
        return jnp.pad(v.astype(jnp.float32), (0, CP - v.shape[0]))

    scales, shifts, w3 = [], [], []

    # transpose-conv (no BN): scale = 1, shift = bias
    wt = pad_taps(params["wt"])
    scales.append(pad_vec(jnp.ones_like(params["bt"])))
    shifts.append(pad_vec(params["bt"]))

    for rp in params["res"]:
        # conv3 (skip path, no BN)
        w3.append(pad_taps(rp["w3"]))
        scales.append(pad_vec(jnp.ones_like(rp["b3"])))
        shifts.append(pad_vec(rp["b3"]))
        # conv1 + BN1 (eval-mode affine folded with the bias)
        w3.append(pad_taps(rp["w1"]))
        scales.append(pad_vec(rp["bn1_scale"]))
        shifts.append(pad_vec(rp["bn1_scale"] * rp["b1"] + rp["bn1_shift"]))
        # conv2 + BN2
        w3.append(pad_taps(rp["w2"]))
        scales.append(pad_vec(rp["bn2_scale"]))
        shifts.append(pad_vec(rp["bn2_scale"] * rp["b2"] + rp["bn2_shift"]))

    # output conv (no BN)
    w3.append(pad_taps(params["wo"]))
    scales.append(pad_vec(jnp.ones_like(params["bo"])))
    shifts.append(pad_vec(params["bo"]))

    n_res = len(params["res"])
    return dict(
        wt=wt,                                # (4*CP, CP) bf16
        w_all=jnp.stack(w3),                  # (3*n_res+1, 3*CP, CP) bf16
        scale_all=jnp.stack(scales),          # (3*n_res+2, CP) f32
        shift_all=jnp.stack(shifts),          # (3*n_res+2, CP) f32
        u_pack=build_upsample_pack(L_in + 3, n_res),
    )


# ----------------------------------------------------------------------------
# Plain-JAX reference (same math: bf16 matmuls, f32 accumulate) for validation
# ----------------------------------------------------------------------------
def upsample_linear_x2(x):
    xm = jnp.concatenate([x[:, :1], x[:, :-1]], axis=1)
    xp = jnp.concatenate([x[:, 1:], x[:, -1:]], axis=1)
    even = 0.25 * xm + 0.75 * x
    odd = 0.75 * x + 0.25 * xp
    B, L, C = x.shape
    return jnp.stack([even, odd], axis=2).reshape(B, 2 * L, C)


def conv1d_bn_act_ref(x, w_taps, bias, scale, shift, *, pad, act="none", residual=None):
    y = jax.lax.conv_general_dilated(
        x.astype(jnp.bfloat16), w_taps.astype(jnp.bfloat16),
        window_strides=(1,), padding=[(pad, pad)],
        dimension_numbers=("NWC", "WIO", "NWC"),
        preferred_element_type=jnp.float32)
    y = y + bias.reshape(1, 1, -1)
    if residual is not None:
        y = y + residual
    y = y * scale.reshape(1, 1, -1) + shift.reshape(1, 1, -1)
    if act == "silu":
        y = y * jax.nn.sigmoid(y)
    elif act == "tanh2pi":
        y = jnp.tanh(y) * TWO_PI
    return y


def res_up_forward_ref(p, x):
    xu = upsample_linear_x2(x)
    skip = conv1d_bn_act_ref(xu, p["w3"], p["b3"], p["id_scale"], p["id_shift"],
                             pad=1, act="none")
    h = conv1d_bn_act_ref(xu, p["w1"], p["b1"], p["bn1_scale"], p["bn1_shift"],
                          pad=1, act="silu")
    return conv1d_bn_act_ref(h, p["w2"], p["b2"], p["bn2_scale"], p["bn2_shift"],
                             pad=1, act="silu", residual=skip)


def decoder_forward_ref(params, x_ncl):
    x = jnp.transpose(x_ncl, (0, 2, 1))
    h = conv1d_bn_act_ref(x, params["wt"], params["bt"],
                          params["id_scale_t"], params["id_shift_t"],
                          pad=3, act="silu")
    for rp in params["res"]:
        h = res_up_forward_ref(rp, h)
    h = conv1d_bn_act_ref(h, params["wo"], params["bo"],
                          params["id_scale_o"], params["id_shift_o"],
                          pad=1, act="tanh2pi")
    return jnp.transpose(h, (0, 2, 1))


# ----------------------------------------------------------------------------
# Deterministic synthetic parameters (same construction as before)
# ----------------------------------------------------------------------------
def conv_init(key, cin, cout, K):
    kw, kb = jax.random.split(key)
    bound = 1.0 / math.sqrt(cin * K)
    taps = jax.random.uniform(kw, (K, cin, cout), jnp.float32, -bound, bound)
    bias = jax.random.uniform(kb, (cout,), jnp.float32, -bound, bound)
    return taps, bias


def _bn_fold(c, eps=1e-4):
    # gamma=1, beta=0, running_mean=0, running_var=1 (fresh BatchNorm1d, eval mode)
    return (jnp.full((c,), 1.0 / math.sqrt(1.0 + eps), jnp.float32),
            jnp.zeros((c,), jnp.float32))


def init_res_up_params(key, cin, cout, K=3):
    k1, k2, k3 = jax.random.split(key, 3)
    mid = cin // 2
    w1, b1 = conv_init(k1, cin, mid, K)
    w2, b2 = conv_init(k2, mid, cout, K)
    w3, b3 = conv_init(k3, cin, cout, K)
    bn1_s, bn1_b = _bn_fold(mid)
    bn2_s, bn2_b = _bn_fold(cout)
    return dict(
        w1=w1, b1=b1, bn1_scale=bn1_s, bn1_shift=bn1_b,
        w2=w2, b2=b2, bn2_scale=bn2_s, bn2_shift=bn2_b,
        w3=w3, b3=b3,
        id_scale=jnp.ones((cout,), jnp.float32),
        id_shift=jnp.zeros((cout,), jnp.float32),
    )


def init_decoder_params(key, out_channels, ch, latent_dim):
    ks = jax.random.split(key, 6)
    wt, bt = conv_init(ks[0], latent_dim, ch * 16, 4)   # transpose-conv (correlation form)
    res = [
        init_res_up_params(ks[1], ch * 16, ch * 8),
        init_res_up_params(ks[2], ch * 8, ch * 4),
        init_res_up_params(ks[3], ch * 4, ch * 2),
        init_res_up_params(ks[4], ch * 2, ch),
    ]
    wo, bo = conv_init(ks[5], ch, out_channels, 3)
    return dict(
        wt=wt, bt=bt, res=res, wo=wo, bo=bo,
        id_scale_t=jnp.ones((ch * 16,), jnp.float32),
        id_shift_t=jnp.zeros((ch * 16,), jnp.float32),
        id_scale_o=jnp.ones((out_channels,), jnp.float32),
        id_shift_o=jnp.zeros((out_channels,), jnp.float32),
    )


# ----------------------------------------------------------------------------
if __name__ == "__main__":
    key = jax.random.PRNGKey(0)
    k_params, k_x = jax.random.split(key)

    out_channels, ch, latent_dim = 2, 8, 16
    B, L = 2, 1                                   # latent sequence length 1

    params = init_decoder_params(k_params, out_channels, ch, latent_dim)
    x = jax.random.normal(k_x, (B, latent_dim, L), jnp.float32)

    kparams = pack_decoder_params(params, L)

    fwd = jax.jit(partial(decoder_forward_pallas, out_channels=out_channels))
    y = jax.block_until_ready(fwd(kparams, x))

    # validate against a plain-JAX (lax.conv, matched bf16 matmuls) implementation
    y_ref = decoder_forward_ref(params, x)

    assert y.shape == (B, out_channels, (L + 3) * 16), y.shape
    assert bool(jnp.all(jnp.isfinite(y)))
    max_err = float(jnp.max(jnp.abs(y - y_ref)))
    assert bool(jnp.allclose(y, y_ref, atol=5e-3, rtol=5e-3)), max_err

    print("KERNEL_OK")
</pallas_src>

<mosaic_0001>
module attributes {stable_mosaic.version = 11 : i64} {
  func.func @kernel(%arg0: i32, %arg1: memref<1x1x128xf32, #tpu.memory_space<vmem>>, %arg2: memref<512x128xbf16, #tpu.memory_space<vmem>>, %arg3: memref<13x384x128xbf16, #tpu.memory_space<vmem>>, %arg4: memref<14x128xf32, #tpu.memory_space<vmem>>, %arg5: memref<14x128xf32, #tpu.memory_space<vmem>>, %arg6: memref<4x64x32xf32, #tpu.memory_space<vmem>>, %arg7: memref<1x64x128xf32, #tpu.memory_space<vmem>>, %arg8: memref<72x128xf32, #tpu.memory_space<vmem>>) attributes {dimension_semantics = [#tpu.dimension_semantics<parallel>], iteration_bounds = array<i64: 2>, scalar_prefetch = 0 : i64, scratch_operands = 1 : i64, tpu.core_type = #tpu.core_type<tc>, window_params = [{transform_indices = @transform_0, window_bounds = array<i64: 1, 1, 128>}, {pipeline_mode = #tpu.pipeline_mode<synchronous>, transform_indices = @transform_1, window_bounds = array<i64: 512, 128>}, {pipeline_mode = #tpu.pipeline_mode<synchronous>, transform_indices = @transform_2, window_bounds = array<i64: 13, 384, 128>}, {pipeline_mode = #tpu.pipeline_mode<synchronous>, transform_indices = @transform_3, window_bounds = array<i64: 14, 128>}, {pipeline_mode = #tpu.pipeline_mode<synchronous>, transform_indices = @transform_4, window_bounds = array<i64: 14, 128>}, {pipeline_mode = #tpu.pipeline_mode<synchronous>, transform_indices = @transform_5, window_bounds = array<i64: 4, 64, 32>}, {transform_indices = @transform_6, window_bounds = array<i64: 1, 64, 128>}]} {
    %cst = arith.constant 0.000000e+00 : f32
    %0 = vector.broadcast %cst : f32 to vector<72x128xf32>
    %c0 = arith.constant 0 : index
    %c0_0 = arith.constant 0 : index
    %1 = vector.load %arg8[%c0, %c0_0] : memref<72x128xf32, #tpu.memory_space<vmem>>, vector<72x128xf32>
    tpu.vector_store %arg8[%c0, %c0_0], %0 {strides = array<i32>} : memref<72x128xf32, #tpu.memory_space<vmem>>, vector<72x128xf32>,
    %c0_1 = arith.constant 0 : index
    %c0_2 = arith.constant 0 : index
    %c0_3 = arith.constant 0 : index
    %2 = vector.load %arg1[%c0_1, %c0_2, %c0_3] : memref<1x1x128xf32, #tpu.memory_space<vmem>>, vector<1x1x128xf32>
    %3 = vector.shape_cast %2 : vector<1x1x128xf32> to vector<1x128xf32>
    %c3 = arith.constant 3 : index
    %c0_4 = arith.constant 0 : index
    %4 = vector.load %arg8[%c3, %c0_4] : memref<72x128xf32, #tpu.memory_space<vmem>>, vector<1x128xf32>
    tpu.vector_store %arg8[%c3, %c0_4], %3 {strides = array<i32>} : memref<72x128xf32, #tpu.memory_space<vmem>>, vector<1x128xf32>,
    %c0_5 = arith.constant 0 : index
    %c0_6 = arith.constant 0 : index
    %5 = vector.load %arg2[%c0_5, %c0_6] : memref<512x128xbf16, #tpu.memory_space<vmem>>, vector<512x128xbf16>
    %c0_7 = arith.constant 0 : index
    %c0_8 = arith.constant 0 : index
    %6 = vector.load %arg8[%c0_7, %c0_8] : memref<72x128xf32, #tpu.memory_space<vmem>>, vector<4x128xf32>
    %c1 = arith.constant 1 : index
    %c0_9 = arith.constant 0 : index
    %7 = vector.load %arg8[%c1, %c0_9] : memref<72x128xf32, #tpu.memory_space<vmem>>, vector<4x128xf32>
    %c2 = arith.constant 2 : index
    %c0_10 = arith.constant 0 : index
    %8 = vector.load %arg8[%c2, %c0_10] : memref<72x128xf32, #tpu.memory_space<vmem>>, vector<4x128xf32>
    %c3_11 = arith.constant 3 : index
    %c0_12 = arith.constant 0 : index
    %9 = vector.load %arg8[%c3_11, %c0_12] : memref<72x128xf32, #tpu.memory_space<vmem>>, vector<4x128xf32>
    %10 = tpu.concatenate %6, %7, %8, %9 in 1 : vector<4x128xf32>, vector<4x128xf32>, vector<4x128xf32>, vector<4x128xf32> -> vector<4x512xf32>
    %11 = arith.truncf %10 : vector<4x512xf32> to vector<4x512xbf16>
    %cst_13 = arith.constant dense<0.000000e+00> : vector<4x128xf32>
    %12 = tpu.matmul %11, %5, %cst_13 {dimension_numbers = #tpu.dot_dimension_numbers<[1], [0], [0], [1], [0, 0, 1, 1], [], []>} : vector<4x512xbf16>, vector<512x128xbf16>, vector<4x128xf32> -> vector<4x128xf32>
    %c0_14 = arith.constant 0 : index
    %c0_15 = arith.constant 0 : index
    %13 = vector.load %arg5[%c0_14, %c0_15] : memref<14x128xf32, #tpu.memory_space<vmem>>, vector<1x128xf32>
    %14 = vector.broadcast %13 : vector<1x128xf32> to vector<4x128xf32>
    %15 = arith.addf %12, %14 : vector<4x128xf32>
    %16 = arith.negf %15 : vector<4x128xf32>
    %17 = math.exp %16 : vector<4x128xf32>
    %cst_16 = arith.constant 1.000000e+00 : f32
    %18 = vector.broadcast %cst_16 : f32 to vector<4x128xf32>
    %19 = arith.addf %18, %17 : vector<4x128xf32>
    %20 = arith.divf %18, %19 : vector<4x128xf32>
    %21 = arith.mulf %15, %20 : vector<4x128xf32>
    %c0_17 = arith.constant 0 : index
    %c0_18 = arith.constant 0 : index
    %c0_19 = arith.constant 0 : index
    %22 = vector.load %arg6[%c0_17, %c0_18, %c0_19] : memref<4x64x32xf32, #tpu.memory_space<vmem>>, vector<1x64x32xf32>
    %23 = vector.shape_cast %22 : vector<1x64x32xf32> to vector<64x32xf32>
    %24 = vector.extract_strided_slice %23 {offsets = [0, 0], sizes = [8, 4], strides = [1, 1]} : vector<64x32xf32> to vector<8x4xf32>
    %cst_20 = arith.constant dense<0.000000e+00> : vector<8x128xf32>
    %25 = tpu.matmul %24, %21, %cst_20 {dimension_numbers = #tpu.dot_dimension_numbers<[1], [0], [0], [1], [0, 0, 1, 1], [], []>} : vector<8x4xf32>, vector<4x128xf32>, vector<8x128xf32> -> vector<8x128xf32>
    %c1_21 = arith.constant 1 : index
    %c0_22 = arith.constant 0 : index
    %26 = vector.load %arg8[%c1_21, %c0_22] : memref<72x128xf32, #tpu.memory_space<vmem>>, vector<8x128xf32>
    tpu.vector_store %arg8[%c1_21, %c0_22], %25 {strides = array<i32>} : memref<72x128xf32, #tpu.memory_space<vmem>>, vector<8x128xf32>,
    %c0_23 = arith.constant 0 : index
    %c0_24 = arith.constant 0 : index
    %c0_25 = arith.constant 0 : index
    %27 = vector.load %arg3[%c0_23, %c0_24, %c0_25] : memref<13x384x128xbf16, #tpu.memory_space<vmem>>, vector<1x384x128xbf16>
    %28 = vector.shape_cast %27 : vector<1x384x128xbf16> to vector<384x128xbf16>
    %c0_26 = arith.constant 0 : index
    %c0_27 = arith.constant 0 : index
    %29 = vector.load %arg8[%c0_26, %c0_27] : memref<72x128xf32, #tpu.memory_space<vmem>>, vector<8x128xf32>
    %c1_28 = arith.constant 1 : index
    %c0_29 = arith.constant 0 : index
    %30 = vector.load %arg8[%c1_28, %c0_29] : memref<72x128xf32, #tpu.memory_space<vmem>>, vector<8x128xf32>
    %c2_30 = arith.constant 2 : index
    %c0_31 = arith.constant 0 : index
    %31 = vector.load %arg8[%c2_30, %c0_31] : memref<72x128xf32, #tpu.memory_space<vmem>>, vector<8x128xf32>
    %32 = tpu.concatenate %29, %30, %31 in 1 : vector<8x128xf32>, vector<8x128xf32>, vector<8x128xf32> -> vector<8x384xf32>
    %33 = arith.truncf %32 : vector<8x384xf32> to vector<8x384xbf16>
    %cst_32 = arith.constant dense<0.000000e+00> : vector<8x128xf32>
    %34 = tpu.matmul %33, %28, %cst_32 {dimension_numbers = #tpu.dot_dimension_numbers<[1], [0], [0], [1], [0, 0, 1, 1], [], []>} : vector<8x384xbf16>, vector<384x128xbf16>, vector<8x128xf32> -> vector<8x128xf32>
    %c1_33 = arith.constant 1 : index
    %c0_34 = arith.constant 0 : index
    %35 = vector.load %arg5[%c1_33, %c0_34] : memref<14x128xf32, #tpu.memory_space<vmem>>, vector<1x128xf32>
    %36 = vector.broadcast %35 : vector<1x128xf32> to vector<8x128xf32>
    %37 = arith.addf %34, %36 : vector<8x128xf32>
    %c1_35 = arith.constant 1 : index
    %c0_36 = arith.constant 0 : index
    %c0_37 = arith.constant 0 : index
    %38 = vector.load %arg3[%c1_35, %c0_36, %c0_37] : memref<13x384x128xbf16, #tpu.memory_space<vmem>>, vector<1x384x128xbf16>
    %39 = vector.shape_cast %38 : vector<1x384x128xbf16> to vector<384x128xbf16>
    %c0_38 = arith.constant 0 : index
    %c0_39 = arith.constant 0 : index
    %40 = vector.load %arg8[%c0_38, %c0_39] : memref<72x128xf32, #tpu.memory_space<vmem>>, vector<8x128xf32>
    %c1_40 = arith.constant 1 : index
    %c0_41 = arith.constant 0 : index
    %41 = vector.load %arg8[%c1_40, %c0_41] : memref<72x128xf32, #tpu.memory_space<vmem>>, vector<8x128xf32>
    %c2_42 = arith.constant 2 : index
    %c0_43 = arith.constant 0 : index
    %42 = vector.load %arg8[%c2_42, %c0_43] : memref<72x128xf32, #tpu.memory_space<vmem>>, vector<8x128xf32>
    %43 = tpu.concatenate %40, %41, %42 in 1 : vector<8x128xf32>, vector<8x128xf32>, vector<8x128xf32> -> vector<8x384xf32>
    %44 = arith.truncf %43 : vector<8x384xf32> to vector<8x384xbf16>
    %cst_44 = arith.constant dense<0.000000e+00> : vector<8x128xf32>
    %45 = tpu.matmul %44, %39, %cst_44 {dimension_numbers = #tpu.dot_dimension_numbers<[1], [0], [0], [1], [0, 0, 1, 1], [], []>} : vector<8x384xbf16>, vector<384x128xbf16>, vector<8x128xf32> -> vector<8x128xf32>
    %c2_45 = arith.constant 2 : index
    %c0_46 = arith.constant 0 : index
    %46 = vector.load %arg5[%c2_45, %c0_46] : memref<14x128xf32, #tpu.memory_space<vmem>>, vector<1x128xf32>
    %c2_47 = arith.constant 2 : index
    %c0_48 = arith.constant 0 : index
    %47 = vector.load %arg4[%c2_47, %c0_48] : memref<14x128xf32, #tpu.memory_space<vmem>>, vector<1x128xf32>
    %48 = vector.broadcast %47 : vector<1x128xf32> to vector<8x128xf32>
    %49 = arith.mulf %45, %48 : vector<8x128xf32>
    %50 = vector.broadcast %46 : vector<1x128xf32> to vector<8x128xf32>
    %51 = arith.addf %49, %50 : vector<8x128xf32>
    %52 = arith.negf %51 : vector<8x128xf32>
    %53 = math.exp %52 : vector<8x128xf32>
    %cst_49 = arith.constant 1.000000e+00 : f32
    %54 = vector.broadcast %cst_49 : f32 to vector<8x128xf32>
    %55 = arith.addf %54, %53 : vector<8x128xf32>
    %56 = arith.divf %54, %55 : vector<8x128xf32>
    %57 = arith.mulf %51, %56 : vector<8x128xf32>
    %c1_50 = arith.constant 1 : index
    %c0_51 = arith.constant 0 : index
    %58 = vector.load %arg8[%c1_50, %c0_51] : memref<72x128xf32, #tpu.memory_space<vmem>>, vector<8x128xf32>
    tpu.vector_store %arg8[%c1_50, %c0_51], %57 {strides = array<i32>} : memref<72x128xf32, #tpu.memory_space<vmem>>, vector<8x128xf32>,
    %c2_52 = arith.constant 2 : index
    %c0_53 = arith.constant 0 : index
    %c0_54 = arith.constant 0 : index
    %59 = vector.load %arg3[%c2_52, %c0_53, %c0_54] : memref<13x384x128xbf16, #tpu.memory_space<vmem>>, vector<1x384x128xbf16>
    %60 = vector.shape_cast %59 : vector<1x384x128xbf16> to vector<384x128xbf16>
    %c0_55 = arith.constant 0 : index
    %c0_56 = arith.constant 0 : index
    %61 = vector.load %arg8[%c0_55, %c0_56] : memref<72x128xf32, #tpu.memory_space<vmem>>, vector<8x128xf32>
    %c1_57 = arith.constant 1 : index
    %c0_58 = arith.constant 0 : index
    %62 = vector.load %arg8[%c1_57, %c0_58] : memref<72x128xf32, #tpu.memory_space<vmem>>, vector<8x128xf32>
    %c2_59 = arith.constant 2 : index
    %c0_60 = arith.constant 0 : index
    %63 = vector.load %arg8[%c2_59, %c0_60] : memref<72x128xf32, #tpu.memory_space<vmem>>, vector<8x128xf32>
    %64 = tpu.concatenate %61, %62, %63 in 1 : vector<8x128xf32>, vector<8x128xf32>, vector<8x128xf32> -> vector<8x384xf32>
    %65 = arith.truncf %64 : vector<8x384xf32> to vector<8x384xbf16>
    %cst_61 = arith.constant dense<0.000000e+00> : vector<8x128xf32>
    %66 = tpu.matmul %65, %60, %cst_61 {dimension_numbers = #tpu.dot_dimension_numbers<[1], [0], [0], [1], [0, 0, 1, 1], [], []>} : vector<8x384xbf16>, vector<384x128xbf16>, vector<8x128xf32> -> vector<8x128xf32>
    %67 = arith.addf %66, %37 : vector<8x128xf32>
    %c3_62 = arith.constant 3 : index
    %c0_63 = arith.constant 0 : index
    %68 = vector.load %arg5[%c3_62, %c0_63] : memref<14x128xf32, #tpu.memory_space<vmem>>, vector<1x128xf32>
    %c3_64 = arith.constant 3 : index
    %c0_65 = arith.constant 0 : index
    %69 = vector.load %arg4[%c3_64, %c0_65] : memref<14x128xf32, #tpu.memory_space<vmem>>, vector<1x128xf32>
    %70 = vector.broadcast %69 : vector<1x128xf32> to vector<8x128xf32>
    %71 = arith.mulf %67, %70 : vector<8x128xf32>
    %72 = vector.broadcast %68 : vector<1x128xf32> to vector<8x128xf32>
    %73 = arith.addf %71, %72 : vector<8x128xf32>
    %74 = arith.negf %73 : vector<8x128xf32>
    %75 = math.exp %74 : vector<8x128xf32>
    %cst_66 = arith.constant 1.000000e+00 : f32
    %76 = vector.broadcast %cst_66 : f32 to vector<8x128xf32>
    %77 = arith.addf %76, %75 : vector<8x128xf32>
    %78 = arith.divf %76, %77 : vector<8x128xf32>
    %79 = arith.mulf %73, %78 : vector<8x128xf32>
    %c1_67 = arith.constant 1 : index
    %c0_68 = arith.constant 0 : index
    %c0_69 = arith.constant 0 : index
    %80 = vector.load %arg6[%c1_67, %c0_68, %c0_69] : memref<4x64x32xf32, #tpu.memory_space<vmem>>, vector<1x64x32xf32>
    %81 = vector.shape_cast %80 : vector<1x64x32xf32> to vector<64x32xf32>
    %82 = vector.extract_strided_slice %81 {offsets = [0, 0], sizes = [16, 8], strides = [1, 1]} : vector<64x32xf32> to vector<16x8xf32>
    %cst_70 = arith.constant dense<0.000000e+00> : vector<16x128xf32>
    %83 = tpu.matmul %82, %79, %cst_70 {dimension_numbers = #tpu.dot_dimension_numbers<[1], [0], [0], [1], [0, 0, 1, 1], [], []>} : vector<16x8xf32>, vector<8x128xf32>, vector<16x128xf32> -> vector<16x128xf32>
    %c1_71 = arith.constant 1 : index
    %c0_72 = arith.constant 0 : index
    %84 = vector.load %arg8[%c1_71, %c0_72] : memref<72x128xf32, #tpu.memory_space<vmem>>, vector<16x128xf32>
    tpu.vector_store %arg8[%c1_71, %c0_72], %83 {strides = array<i32>} : memref<72x128xf32, #tpu.memory_space<vmem>>, vector<16x128xf32>,
    %c3_73 = arith.constant 3 : index
    %c0_74 = arith.constant 0 : index
    %c0_75 = arith.constant 0 : index
    %85 = vector.load %arg3[%c3_73, %c0_74, %c0_75] : memref<13x384x128xbf16, #tpu.memory_space<vmem>>, vector<1x384x128xbf16>
    %86 = vector.shape_cast %85 : vector<1x384x128xbf16> to vector<384x128xbf16>
    %c0_76 = arith.constant 0 : index
    %c0_77 = arith.constant 0 : index
    %87 = vector.load %arg8[%c0_76, %c0_77] : memref<72x128xf32, #tpu.memory_space<vmem>>, vector<16x128xf32>
    %c1_78 = arith.constant 1 : index
    %c0_79 = arith.constant 0 : index
    %88 = vector.load %arg8[%c1_78, %c0_79] : memref<72x128xf32, #tpu.memory_space<vmem>>, vector<16x128xf32>
    %c2_80 = arith.constant 2 : index
    %c0_81 = arith.constant 0 : index
    %89 = vector.load %arg8[%c2_80, %c0_81] : memref<72x128xf32, #tpu.memory_space<vmem>>, vector<16x128xf32>
    %90 = tpu.concatenate %87, %88, %89 in 1 : vector<16x128xf32>, vector<16x128xf32>, vector<16x128xf32> -> vector<16x384xf32>
    %91 = arith.truncf %90 : vector<16x384xf32> to vector<16x384xbf16>
    %cst_82 = arith.constant dense<0.000000e+00> : vector<16x128xf32>
    %92 = tpu.matmul %91, %86, %cst_82 {dimension_numbers = #tpu.dot_dimension_numbers<[1], [0], [0], [1], [0, 0, 1, 1], [], []>} : vector<16x384xbf16>, vector<384x128xbf16>, vector<16x128xf32> -> vector<16x128xf32>
    %c4 = arith.constant 4 : index
    %c0_83 = arith.constant 0 : index
    %93 = vector.load %arg5[%c4, %c0_83] : memref<14x128xf32, #tpu.memory_space<vmem>>, vector<1x128xf32>
    %94 = vector.broadcast %93 : vector<1x128xf32> to vector<16x128xf32>
    %95 = arith.addf %92, %94 : vector<16x128xf32>
    %c4_84 = arith.constant 4 : index
    %c0_85 = arith.constant 0 : index
    %c0_86 = arith.constant 0 : index
    %96 = vector.load %arg3[%c4_84, %c0_85, %c0_86] : memref<13x384x128xbf16, #tpu.memory_space<vmem>>, vector<1x384x128xbf16>
    %97 = vector.shape_cast %96 : vector<1x384x128xbf16> to vector<384x128xbf16>
    %c0_87 = arith.constant 0 : index
    %c0_88 = arith.constant 0 : index
    %98 = vector.load %arg8[%c0_87, %c0_88] : memref<72x128xf32, #tpu.memory_space<vmem>>, vector<16x128xf32>
    %c1_89 = arith.constant 1 : index
    %c0_90 = arith.constant 0 : index
    %99 = vector.load %arg8[%c1_89, %c0_90] : memref<72x128xf32, #tpu.memory_space<vmem>>, vector<16x128xf32>
    %c2_91 = arith.constant 2 : index
    %c0_92 = arith.constant 0 : index
    %100 = vector.load %arg8[%c2_91, %c0_92] : memref<72x128xf32, #tpu.memory_space<vmem>>, vector<16x128xf32>
    %101 = tpu.concatenate %98, %99, %100 in 1 : vector<16x128xf32>, vector<16x128xf32>, vector<16x128xf32> -> vector<16x384xf32>
    %102 = arith.truncf %101 : vector<16x384xf32> to vector<16x384xbf16>
    %cst_93 = arith.constant dense<0.000000e+00> : vector<16x128xf32>
    %103 = tpu.matmul %102, %97, %cst_93 {dimension_numbers = #tpu.dot_dimension_numbers<[1], [0], [0], [1], [0, 0, 1, 1], [], []>} : vector<16x384xbf16>, vector<384x128xbf16>, vector<16x128xf32> -> vector<16x128xf32>
    %c5 = arith.constant 5 : index
    %c0_94 = arith.constant 0 : index
    %104 = vector.load %arg5[%c5, %c0_94] : memref<14x128xf32, #tpu.memory_space<vmem>>, vector<1x128xf32>
    %c5_95 = arith.constant 5 : index
    %c0_96 = arith.constant 0 : index
    %105 = vector.load %arg4[%c5_95, %c0_96] : memref<14x128xf32, #tpu.memory_space<vmem>>, vector<1x128xf32>
    %106 = vector.broadcast %105 : vector<1x128xf32> to vector<16x128xf32>
    %107 = arith.mulf %103, %106 : vector<16x128xf32>
    %108 = vector.broadcast %104 : vector<1x128xf32> to vector<16x128xf32>
    %109 = arith.addf %107, %108 : vector<16x128xf32>
    %110 = arith.negf %109 : vector<16x128xf32>
    %111 = math.exp %110 : vector<16x128xf32>
    %cst_97 = arith.constant 1.000000e+00 : f32
    %112 = vector.broadcast %cst_97 : f32 to vector<16x128xf32>
    %113 = arith.addf %112, %111 : vector<16x128xf32>
    %114 = arith.divf %112, %113 : vector<16x128xf32>
    %115 = arith.mulf %109, %114 : vector<16x128xf32>
    %c1_98 = arith.constant 1 : index
    %c0_99 = arith.constant 0 : index
    %116 = vector.load %arg8[%c1_98, %c0_99] : memref<72x128xf32, #tpu.memory_space<vmem>>, vector<16x128xf32>
    tpu.vector_store %arg8[%c1_98, %c0_99], %115 {strides = array<i32>} : memref<72x128xf32, #tpu.memory_space<vmem>>, vector<16x128xf32>,
    %c5_100 = arith.constant 5 : index
    %c0_101 = arith.constant 0 : index
    %c0_102 = arith.constant 0 : index
    %117 = vector.load %arg3[%c5_100, %c0_101, %c0_102] : memref<13x384x128xbf16, #tpu.memory_space<vmem>>, vector<1x384x128xbf16>
    %118 = vector.shape_cast %117 : vector<1x384x128xbf16> to vector<384x128xbf16>
    %c0_103 = arith.constant 0 : index
    %c0_104 = arith.constant 0 : index
    %119 = vector.load %arg8[%c0_103, %c0_104] : memref<72x128xf32, #tpu.memory_space<vmem>>, vector<16x128xf32>
    %c1_105 = arith.constant 1 : index
    %c0_106 = arith.constant 0 : index
    %120 = vector.load %arg8[%c1_105, %c0_106] : memref<72x128xf32, #tpu.memory_space<vmem>>, vector<16x128xf32>
    %c2_107 = arith.constant 2 : index
    %c0_108 = arith.constant 0 : index
    %121 = vector.load %arg8[%c2_107, %c0_108] : memref<72x128xf32, #tpu.memory_space<vmem>>, vector<16x128xf32>
    %122 = tpu.concatenate %119, %120, %121 in 1 : vector<16x128xf32>, vector<16x128xf32>, vector<16x128xf32> -> vector<16x384xf32>
    %123 = arith.truncf %122 : vector<16x384xf32> to vector<16x384xbf16>
    %cst_109 = arith.constant dense<0.000000e+00> : vector<16x128xf32>
    %124 = tpu.matmul %123, %118, %cst_109 {dimension_numbers = #tpu.dot_dimension_numbers<[1], [0], [0], [1], [0, 0, 1, 1], [], []>} : vector<16x384xbf16>, vector<384x128xbf16>, vector<16x128xf32> -> vector<16x128xf32>
    %125 = arith.addf %124, %95 : vector<16x128xf32>
    %c6 = arith.constant 6 : index
    %c0_110 = arith.constant 0 : index
    %126 = vector.load %arg5[%c6, %c0_110] : memref<14x128xf32, #tpu.memory_space<vmem>>, vector<1x128xf32>
    %c6_111 = arith.constant 6 : index
    %c0_112 = arith.constant 0 : index
    %127 = vector.load %arg4[%c6_111, %c0_112] : memref<14x128xf32, #tpu.memory_space<vmem>>, vector<1x128xf32>
    %128 = vector.broadcast %127 : vector<1x128xf32> to vector<16x128xf32>
    %129 = arith.mulf %125, %128 : vector<16x128xf32>
    %130 = vector.broadcast %126 : vector<1x128xf32> to vector<16x128xf32>
    %131 = arith.addf %129, %130 : vector<16x128xf32>
    %132 = arith.negf %131 : vector<16x128xf32>
    %133 = math.exp %132 : vector<16x128xf32>
    %cst_113 = arith.constant 1.000000e+00 : f32
    %134 = vector.broadcast %cst_113 : f32 to vector<16x128xf32>
    %135 = arith.addf %134, %133 : vector<16x128xf32>
    %136 = arith.divf %134, %135 : vector<16x128xf32>
    %137 = arith.mulf %131, %136 : vector<16x128xf32>
    %c2_114 = arith.constant 2 : index
    %c0_115 = arith.constant 0 : index
    %c0_116 = arith.constant 0 : index
    %138 = vector.load %arg6[%c2_114, %c0_115, %c0_116] : memref<4x64x32xf32, #tpu.memory_space<vmem>>, vector<1x64x32xf32>
    %139 = vector.shape_cast %138 : vector<1x64x32xf32> to vector<64x32xf32>
    %140 = vector.extract_strided_slice %139 {offsets = [0, 0], sizes = [32, 16], strides = [1, 1]} : vector<64x32xf32> to vector<32x16xf32>
    %cst_117 = arith.constant dense<0.000000e+00> : vector<32x128xf32>
    %141 = tpu.matmul %140, %137, %cst_117 {dimension_numbers = #tpu.dot_dimension_numbers<[1], [0], [0], [1], [0, 0, 1, 1], [], []>} : vector<32x16xf32>, vector<16x128xf32>, vector<32x128xf32> -> vector<32x128xf32>
    %c1_118 = arith.constant 1 : index
    %c0_119 = arith.constant 0 : index
    %142 = vector.load %arg8[%c1_118, %c0_119] : memref<72x128xf32, #tpu.memory_space<vmem>>, vector<32x128xf32>
    tpu.vector_store %arg8[%c1_118, %c0_119], %141 {strides = array<i32>} : memref<72x128xf32, #tpu.memory_space<vmem>>, vector<32x128xf32>,
    %c6_120 = arith.constant 6 : index
    %c0_121 = arith.constant 0 : index
    %c0_122 = arith.constant 0 : index
    %143 = vector.load %arg3[%c6_120, %c0_121, %c0_122] : memref<13x384x128xbf16, #tpu.memory_space<vmem>>, vector<1x384x128xbf16>
    %144 = vector.shape_cast %143 : vector<1x384x128xbf16> to vector<384x128xbf16>
    %c0_123 = arith.constant 0 : index
    %c0_124 = arith.constant 0 : index
    %145 = vector.load %arg8[%c0_123, %c0_124] : memref<72x128xf32, #tpu.memory_space<vmem>>, vector<32x128xf32>
    %c1_125 = arith.constant 1 : index
    %c0_126 = arith.constant 0 : index
    %146 = vector.load %arg8[%c1_125, %c0_126] : memref<72x128xf32, #tpu.memory_space<vmem>>, vector<32x128xf32>
    %c2_127 = arith.constant 2 : index
    %c0_128 = arith.constant 0 : index
    %147 = vector.load %arg8[%c2_127, %c0_128] : memref<72x128xf32, #tpu.memory_space<vmem>>, vector<32x128xf32>
    %148 = tpu.concatenate %145, %146, %147 in 1 : vector<32x128xf32>, vector<32x128xf32>, vector<32x128xf32> -> vector<32x384xf32>
    %149 = arith.truncf %148 : vector<32x384xf32> to vector<32x384xbf16>
    %cst_129 = arith.constant dense<0.000000e+00> : vector<32x128xf32>
    %150 = tpu.matmul %149, %144, %cst_129 {dimension_numbers = #tpu.dot_dimension_numbers<[1], [0], [0], [1], [0, 0, 1, 1], [], []>} : vector<32x384xbf16>, vector<384x128xbf16>, vector<32x128xf32> -> vector<32x128xf32>
    %c7 = arith.constant 7 : index
    %c0_130 = arith.constant 0 : index
    %151 = vector.load %arg5[%c7, %c0_130] : memref<14x128xf32, #tpu.memory_space<vmem>>, vector<1x128xf32>
    %152 = vector.broadcast %151 : vector<1x128xf32> to vector<32x128xf32>
    %153 = arith.addf %150, %152 : vector<32x128xf32>
    %c7_131 = arith.constant 7 : index
    %c0_132 = arith.constant 0 : index
    %c0_133 = arith.constant 0 : index
    %154 = vector.load %arg3[%c7_131, %c0_132, %c0_133] : memref<13x384x128xbf16, #tpu.memory_space<vmem>>, vector<1x384x128xbf16>
    %155 = vector.shape_cast %154 : vector<1x384x128xbf16> to vector<384x128xbf16>
    %c0_134 = arith.constant 0 : index
    %c0_135 = arith.constant 0 : index
    %156 = vector.load %arg8[%c0_134, %c0_135] : memref<72x128xf32, #tpu.memory_space<vmem>>, vector<32x128xf32>
    %c1_136 = arith.constant 1 : index
    %c0_137 = arith.constant 0 : index
    %157 = vector.load %arg8[%c1_136, %c0_137] : memref<72x128xf32, #tpu.memory_space<vmem>>, vector<32x128xf32>
    %c2_138 = arith.constant 2 : index
    %c0_139 = arith.constant 0 : index
    %158 = vector.load %arg8[%c2_138, %c0_139] : memref<72x128xf32, #tpu.memory_space<vmem>>, vector<32x128xf32>
    %159 = tpu.concatenate %156, %157, %158 in 1 : vector<32x128xf32>, vector<32x128xf32>, vector<32x128xf32> -> vector<32x384xf32>
    %160 = arith.truncf %159 : vector<32x384xf32> to vector<32x384xbf16>
    %cst_140 = arith.constant dense<0.000000e+00> : vector<32x128xf32>
    %161 = tpu.matmul %160, %155, %cst_140 {dimension_numbers = #tpu.dot_dimension_numbers<[1], [0], [0], [1], [0, 0, 1, 1], [], []>} : vector<32x384xbf16>, vector<384x128xbf16>, vector<32x128xf32> -> vector<32x128xf32>
    %c8 = arith.constant 8 : index
    %c0_141 = arith.constant 0 : index
    %162 = vector.load %arg5[%c8, %c0_141] : memref<14x128xf32, #tpu.memory_space<vmem>>, vector<1x128xf32>
    %c8_142 = arith.constant 8 : index
    %c0_143 = arith.constant 0 : index
    %163 = vector.load %arg4[%c8_142, %c0_143] : memref<14x128xf32, #tpu.memory_space<vmem>>, vector<1x128xf32>
    %164 = vector.broadcast %163 : vector<1x128xf32> to vector<32x128xf32>
    %165 = arith.mulf %161, %164 : vector<32x128xf32>
    %166 = vector.broadcast %162 : vector<1x128xf32> to vector<32x128xf32>
    %167 = arith.addf %165, %166 : vector<32x128xf32>
    %168 = arith.negf %167 : vector<32x128xf32>
    %169 = math.exp %168 : vector<32x128xf32>
    %cst_144 = arith.constant 1.000000e+00 : f32
    %170 = vector.broadcast %cst_144 : f32 to vector<32x128xf32>
    %171 = arith.addf %170, %169 : vector<32x128xf32>
    %172 = arith.divf %170, %171 : vector<32x128xf32>
    %173 = arith.mulf %167, %172 : vector<32x128xf32>
    %c1_145 = arith.constant 1 : index
    %c0_146 = arith.constant 0 : index
    %174 = vector.load %arg8[%c1_145, %c0_146] : memref<72x128xf32, #tpu.memory_space<vmem>>, vector<32x128xf32>
    tpu.vector_store %arg8[%c1_145, %c0_146], %173 {strides = array<i32>} : memref<72x128xf32, #tpu.memory_space<vmem>>, vector<32x128xf32>,
    %c8_147 = arith.constant 8 : index
    %c0_148 = arith.constant 0 : index
    %c0_149 = arith.constant 0 : index
    %175 = vector.load %arg3[%c8_147, %c0_148, %c0_149] : memref<13x384x128xbf16, #tpu.memory_space<vmem>>, vector<1x384x128xbf16>
    %176 = vector.shape_cast %175 : vector<1x384x128xbf16> to vector<384x128xbf16>
    %c0_150 = arith.constant 0 : index
    %c0_151 = arith.constant 0 : index
    %177 = vector.load %arg8[%c0_150, %c0_151] : memref<72x128xf32, #tpu.memory_space<vmem>>, vector<32x128xf32>
    %c1_152 = arith.constant 1 : index
    %c0_153 = arith.constant 0 : index
    %178 = vector.load %arg8[%c1_152, %c0_153] : memref<72x128xf32, #tpu.memory_space<vmem>>, vector<32x128xf32>
    %c2_154 = arith.constant 2 : index
    %c0_155 = arith.constant 0 : index
    %179 = vector.load %arg8[%c2_154, %c0_155] : memref<72x128xf32, #tpu.memory_space<vmem>>, vector<32x128xf32>
    %180 = tpu.concatenate %177, %178, %179 in 1 : vector<32x128xf32>, vector<32x128xf32>, vector<32x128xf32> -> vector<32x384xf32>
    %181 = arith.truncf %180 : vector<32x384xf32> to vector<32x384xbf16>
    %cst_156 = arith.constant dense<0.000000e+00> : vector<32x128xf32>
    %182 = tpu.matmul %181, %176, %cst_156 {dimension_numbers = #tpu.dot_dimension_numbers<[1], [0], [0], [1], [0, 0, 1, 1], [], []>} : vector<32x384xbf16>, vector<384x128xbf16>, vector<32x128xf32> -> vector<32x128xf32>
    %183 = arith.addf %182, %153 : vector<32x128xf32>
    %c9 = arith.constant 9 : index
    %c0_157 = arith.constant 0 : index
    %184 = vector.load %arg5[%c9, %c0_157] : memref<14x128xf32, #tpu.memory_space<vmem>>, vector<1x128xf32>
    %c9_158 = arith.constant 9 : index
    %c0_159 = arith.constant 0 : index
    %185 = vector.load %arg4[%c9_158, %c0_159] : memref<14x128xf32, #tpu.memory_space<vmem>>, vector<1x128xf32>
    %186 = vector.broadcast %185 : vector<1x128xf32> to vector<32x128xf32>
    %187 = arith.mulf %183, %186 : vector<32x128xf32>
    %188 = vector.broadcast %184 : vector<1x128xf32> to vector<32x128xf32>
    %189 = arith.addf %187, %188 : vector<32x128xf32>
    %190 = arith.negf %189 : vector<32x128xf32>
    %191 = math.exp %190 : vector<32x128xf32>
    %cst_160 = arith.constant 1.000000e+00 : f32
    %192 = vector.broadcast %cst_160 : f32 to vector<32x128xf32>
    %193 = arith.addf %192, %191 : vector<32x128xf32>
    %194 = arith.divf %192, %193 : vector<32x128xf32>
    %195 = arith.mulf %189, %194 : vector<32x128xf32>
    %c3_161 = arith.constant 3 : index
    %c0_162 = arith.constant 0 : index
    %c0_163 = arith.constant 0 : index
    %196 = vector.load %arg6[%c3_161, %c0_162, %c0_163] : memref<4x64x32xf32, #tpu.memory_space<vmem>>, vector<1x64x32xf32>
    %197 = vector.shape_cast %196 : vector<1x64x32xf32> to vector<64x32xf32>
    %cst_164 = arith.constant dense<0.000000e+00> : vector<64x128xf32>
    %198 = tpu.matmul %197, %195, %cst_164 {dimension_numbers = #tpu.dot_dimension_numbers<[1], [0], [0], [1], [0, 0, 1, 1], [], []>} : vector<64x32xf32>, vector<32x128xf32>, vector<64x128xf32> -> vector<64x128xf32>
    %c1_165 = arith.constant 1 : index
    %c0_166 = arith.constant 0 : index
    %199 = vector.load %arg8[%c1_165, %c0_166] : memref<72x128xf32, #tpu.memory_space<vmem>>, vector<64x128xf32>
    tpu.vector_store %arg8[%c1_165, %c0_166], %198 {strides = array<i32>} : memref<72x128xf32, #tpu.memory_space<vmem>>, vector<64x128xf32>,
    %c9_167 = arith.constant 9 : index
    %c0_168 = arith.constant 0 : index
    %c0_169 = arith.constant 0 : index
    %200 = vector.load %arg3[%c9_167, %c0_168, %c0_169] : memref<13x384x128xbf16, #tpu.memory_space<vmem>>, vector<1x384x128xbf16>
    %201 = vector.shape_cast %200 : vector<1x384x128xbf16> to vector<384x128xbf16>
    %c0_170 = arith.constant 0 : index
    %c0_171 = arith.constant 0 : index
    %202 = vector.load %arg8[%c0_170, %c0_171] : memref<72x128xf32, #tpu.memory_space<vmem>>, vector<64x128xf32>
    %c1_172 = arith.constant 1 : index
    %c0_173 = arith.constant 0 : index
    %203 = vector.load %arg8[%c1_172, %c0_173] : memref<72x128xf32, #tpu.memory_space<vmem>>, vector<64x128xf32>
    %c2_174 = arith.constant 2 : index
    %c0_175 = arith.constant 0 : index
    %204 = vector.load %arg8[%c2_174, %c0_175] : memref<72x128xf32, #tpu.memory_space<vmem>>, vector<64x128xf32>
    %205 = tpu.concatenate %202, %203, %204 in 1 : vector<64x128xf32>, vector<64x128xf32>, vector<64x128xf32> -> vector<64x384xf32>
    %206 = arith.truncf %205 : vector<64x384xf32> to vector<64x384xbf16>
    %cst_176 = arith.constant dense<0.000000e+00> : vector<64x128xf32>
    %207 = tpu.matmul %206, %201, %cst_176 {dimension_numbers = #tpu.dot_dimension_numbers<[1], [0], [0], [1], [0, 0, 1, 1], [], []>} : vector<64x384xbf16>, vector<384x128xbf16>, vector<64x128xf32> -> vector<64x128xf32>
    %c10 = arith.constant 10 : index
    %c0_177 = arith.constant 0 : index
    %208 = vector.load %arg5[%c10, %c0_177] : memref<14x128xf32, #tpu.memory_space<vmem>>, vector<1x128xf32>
    %209 = vector.broadcast %208 : vector<1x128xf32> to vector<64x128xf32>
    %210 = arith.addf %207, %209 : vector<64x128xf32>
    %c10_178 = arith.constant 10 : index
    %c0_179 = arith.constant 0 : index
    %c0_180 = arith.constant 0 : index
    %211 = vector.load %arg3[%c10_178, %c0_179, %c0_180] : memref<13x384x128xbf16, #tpu.memory_space<vmem>>, vector<1x384x128xbf16>
    %212 = vector.shape_cast %211 : vector<1x384x128xbf16> to vector<384x128xbf16>
    %c0_181 = arith.constant 0 : index
    %c0_182 = arith.constant 0 : index
    %213 = vector.load %arg8[%c0_181, %c0_182] : memref<72x128xf32, #tpu.memory_space<vmem>>, vector<64x128xf32>
    %c1_183 = arith.constant 1 : index
    %c0_184 = arith.constant 0 : index
    %214 = vector.load %arg8[%c1_183, %c0_184] : memref<72x128xf32, #tpu.memory_space<vmem>>, vector<64x128xf32>
    %c2_185 = arith.constant 2 : index
    %c0_186 = arith.constant 0 : index
    %215 = vector.load %arg8[%c2_185, %c0_186] : memref<72x128xf32, #tpu.memory_space<vmem>>, vector<64x128xf32>
    %216 = tpu.concatenate %213, %214, %215 in 1 : vector<64x128xf32>, vector<64x128xf32>, vector<64x128xf32> -> vector<64x384xf32>
    %217 = arith.truncf %216 : vector<64x384xf32> to vector<64x384xbf16>
    %cst_187 = arith.constant dense<0.000000e+00> : vector<64x128xf32>
    %218 = tpu.matmul %217, %212, %cst_187 {dimension_numbers = #tpu.dot_dimension_numbers<[1], [0], [0], [1], [0, 0, 1, 1], [], []>} : vector<64x384xbf16>, vector<384x128xbf16>, vector<64x128xf32> -> vector<64x128xf32>
    %c11 = arith.constant 11 : index
    %c0_188 = arith.constant 0 : index
    %219 = vector.load %arg5[%c11, %c0_188] : memref<14x128xf32, #tpu.memory_space<vmem>>, vector<1x128xf32>
    %c11_189 = arith.constant 11 : index
    %c0_190 = arith.constant 0 : index
    %220 = vector.load %arg4[%c11_189, %c0_190] : memref<14x128xf32, #tpu.memory_space<vmem>>, vector<1x128xf32>
    %221 = vector.broadcast %220 : vector<1x128xf32> to vector<64x128xf32>
    %222 = arith.mulf %218, %221 : vector<64x128xf32>
    %223 = vector.broadcast %219 : vector<1x128xf32> to vector<64x128xf32>
    %224 = arith.addf %222, %223 : vector<64x128xf32>
    %225 = arith.negf %224 : vector<64x128xf32>
    %226 = math.exp %225 : vector<64x128xf32>
    %cst_191 = arith.constant 1.000000e+00 : f32
    %227 = vector.broadcast %cst_191 : f32 to vector<64x128xf32>
    %228 = arith.addf %227, %226 : vector<64x128xf32>
    %229 = arith.divf %227, %228 : vector<64x128xf32>
    %230 = arith.mulf %224, %229 : vector<64x128xf32>
    %c1_192 = arith.constant 1 : index
    %c0_193 = arith.constant 0 : index
    %231 = vector.load %arg8[%c1_192, %c0_193] : memref<72x128xf32, #tpu.memory_space<vmem>>, vector<64x128xf32>
    tpu.vector_store %arg8[%c1_192, %c0_193], %230 {strides = array<i32>} : memref<72x128xf32, #tpu.memory_space<vmem>>, vector<64x128xf32>,
    %c11_194 = arith.constant 11 : index
    %c0_195 = arith.constant 0 : index
    %c0_196 = arith.constant 0 : index
    %232 = vector.load %arg3[%c11_194, %c0_195, %c0_196] : memref<13x384x128xbf16, #tpu.memory_space<vmem>>, vector<1x384x128xbf16>
    %233 = vector.shape_cast %232 : vector<1x384x128xbf16> to vector<384x128xbf16>
    %c0_197 = arith.constant 0 : index
    %c0_198 = arith.constant 0 : index
    %234 = vector.load %arg8[%c0_197, %c0_198] : memref<72x128xf32, #tpu.memory_space<vmem>>, vector<64x128xf32>
    %c1_199 = arith.constant 1 : index
    %c0_200 = arith.constant 0 : index
    %235 = vector.load %arg8[%c1_199, %c0_200] : memref<72x128xf32, #tpu.memory_space<vmem>>, vector<64x128xf32>
    %c2_201 = arith.constant 2 : index
    %c0_202 = arith.constant 0 : index
    %236 = vector.load %arg8[%c2_201, %c0_202] : memref<72x128xf32, #tpu.memory_space<vmem>>, vector<64x128xf32>
    %237 = tpu.concatenate %234, %235, %236 in 1 : vector<64x128xf32>, vector<64x128xf32>, vector<64x128xf32> -> vector<64x384xf32>
    %238 = arith.truncf %237 : vector<64x384xf32> to vector<64x384xbf16>
    %cst_203 = arith.constant dense<0.000000e+00> : vector<64x128xf32>
    %239 = tpu.matmul %238, %233, %cst_203 {dimension_numbers = #tpu.dot_dimension_numbers<[1], [0], [0], [1], [0, 0, 1, 1], [], []>} : vector<64x384xbf16>, vector<384x128xbf16>, vector<64x128xf32> -> vector<64x128xf32>
    %240 = arith.addf %239, %210 : vector<64x128xf32>
    %c12 = arith.constant 12 : index
    %c0_204 = arith.constant 0 : index
    %241 = vector.load %arg5[%c12, %c0_204] : memref<14x128xf32, #tpu.memory_space<vmem>>, vector<1x128xf32>
    %c12_205 = arith.constant 12 : index
    %c0_206 = arith.constant 0 : index
    %242 = vector.load %arg4[%c12_205, %c0_206] : memref<14x128xf32, #tpu.memory_space<vmem>>, vector<1x128xf32>
    %243 = vector.broadcast %242 : vector<1x128xf32> to vector<64x128xf32>
    %244 = arith.mulf %240, %243 : vector<64x128xf32>
    %245 = vector.broadcast %241 : vector<1x128xf32> to vector<64x128xf32>
    %246 = arith.addf %244, %245 : vector<64x128xf32>
    %247 = arith.negf %246 : vector<64x128xf32>
    %248 = math.exp %247 : vector<64x128xf32>
    %cst_207 = arith.constant 1.000000e+00 : f32
    %249 = vector.broadcast %cst_207 : f32 to vector<64x128xf32>
    %250 = arith.addf %249, %248 : vector<64x128xf32>
    %251 = arith.divf %249, %250 : vector<64x128xf32>
    %252 = arith.mulf %246, %251 : vector<64x128xf32>
    %c1_208 = arith.constant 1 : index
    %c0_209 = arith.constant 0 : index
    %253 = vector.load %arg8[%c1_208, %c0_209] : memref<72x128xf32, #tpu.memory_space<vmem>>, vector<64x128xf32>
    tpu.vector_store %arg8[%c1_208, %c0_209], %252 {strides = array<i32>} : memref<72x128xf32, #tpu.memory_space<vmem>>, vector<64x128xf32>,
    %c12_210 = arith.constant 12 : index
    %c0_211 = arith.constant 0 : index
    %c0_212 = arith.constant 0 : index
    %254 = vector.load %arg3[%c12_210, %c0_211, %c0_212] : memref<13x384x128xbf16, #tpu.memory_space<vmem>>, vector<1x384x128xbf16>
    %255 = vector.shape_cast %254 : vector<1x384x128xbf16> to vector<384x128xbf16>
    %c0_213 = arith.constant 0 : index
    %c0_214 = arith.constant 0 : index
    %256 = vector.load %arg8[%c0_213, %c0_214] : memref<72x128xf32, #tpu.memory_space<vmem>>, vector<64x128xf32>
    %c1_215 = arith.constant 1 : index
    %c0_216 = arith.constant 0 : index
    %257 = vector.load %arg8[%c1_215, %c0_216] : memref<72x128xf32, #tpu.memory_space<vmem>>, vector<64x128xf32>
    %c2_217 = arith.constant 2 : index
    %c0_218 = arith.constant 0 : index
    %258 = vector.load %arg8[%c2_217, %c0_218] : memref<72x128xf32, #tpu.memory_space<vmem>>, vector<64x128xf32>
    %259 = tpu.concatenate %256, %257, %258 in 1 : vector<64x128xf32>, vector<64x128xf32>, vector<64x128xf32> -> vector<64x384xf32>
    %260 = arith.truncf %259 : vector<64x384xf32> to vector<64x384xbf16>
    %cst_219 = arith.constant dense<0.000000e+00> : vector<64x128xf32>
    %261 = tpu.matmul %260, %255, %cst_219 {dimension_numbers = #tpu.dot_dimension_numbers<[1], [0], [0], [1], [0, 0, 1, 1], [], []>} : vector<64x384xbf16>, vector<384x128xbf16>, vector<64x128xf32> -> vector<64x128xf32>
    %c13 = arith.constant 13 : index
    %c0_220 = arith.constant 0 : index
    %262 = vector.load %arg5[%c13, %c0_220] : memref<14x128xf32, #tpu.memory_space<vmem>>, vector<1x128xf32>
    %263 = vector.broadcast %262 : vector<1x128xf32> to vector<64x128xf32>
    %264 = arith.addf %261, %263 : vector<64x128xf32>
    %265 = math.tanh %264 : vector<64x128xf32>
    %cst_221 = arith.constant 6.28318548 : f32
    %266 = vector.broadcast %cst_221 : f32 to vector<64x128xf32>
    %267 = arith.mulf %265, %266 : vector<64x128xf32>
    %c0_222 = arith.constant 0 : index
    %c0_223 = arith.constant 0 : index
    %c0_224 = arith.constant 0 : index
    %268 = vector.load %arg7[%c0_222, %c0_223, %c0_224] : memref<1x64x128xf32, #tpu.memory_space<vmem>>, vector<1x64x128xf32>
    %269 = vector.shape_cast %268 : vector<1x64x128xf32> to vector<64x128xf32>
    %270 = vector.shape_cast %267 : vector<64x128xf32> to vector<1x64x128xf32>
    tpu.vector_store %arg7[%c0_222, %c0_223, %c0_224], %270 {strides = array<i32>} : memref<1x64x128xf32, #tpu.memory_space<vmem>>, vector<1x64x128xf32>,
    return
  }
  func.func @transform_0(%arg0: i32) -> (i32, i32, i32) {
    %c0_i32 = arith.constant 0 : i32
    %c0_i32_0 = arith.constant 0 : i32
    %c0_i32_1 = arith.constant 0 : i32
    return %arg0, %c0_i32, %c0_i32_0 : i32, i32, i32
  }
  func.func @transform_1(%arg0: i32) -> (i32, i32) {
    %c0_i32 = arith.constant 0 : i32
    %c0_i32_0 = arith.constant 0 : i32
    %c0_i32_1 = arith.constant 0 : i32
    return %c0_i32, %c0_i32_0 : i32, i32
  }
  func.func @transform_2(%arg0: i32) -> (i32, i32, i32) {
    %c0_i32 = arith.constant 0 : i32
    %c0_i32_0 = arith.constant 0 : i32
    %c0_i32_1 = arith.constant 0 : i32
    %c0_i32_2 = arith.constant 0 : i32
    return %c0_i32, %c0_i32_0, %c0_i32_1 : i32, i32, i32
  }
  func.func @transform_3(%arg0: i32) -> (i32, i32) {
    %c0_i32 = arith.constant 0 : i32
    %c0_i32_0 = arith.constant 0 : i32
    %c0_i32_1 = arith.constant 0 : i32
    return %c0_i32, %c0_i32_0 : i32, i32
  }
  func.func @transform_4(%arg0: i32) -> (i32, i32) {
    %c0_i32 = arith.constant 0 : i32
    %c0_i32_0 = arith.constant 0 : i32
    %c0_i32_1 = arith.constant 0 : i32
    return %c0_i32, %c0_i32_0 : i32, i32
  }
  func.func @transform_5(%arg0: i32) -> (i32, i32, i32) {
    %c0_i32 = arith.constant 0 : i32
    %c0_i32_0 = arith.constant 0 : i32
    %c0_i32_1 = arith.constant 0 : i32
    %c0_i32_2 = arith.constant 0 : i32
    return %c0_i32, %c0_i32_0, %c0_i32_1 : i32, i32, i32
  }
  func.func @transform_6(%arg0: i32) -> (i32, i32, i32) {
    %c0_i32 = arith.constant 0 : i32
    %c0_i32_0 = arith.constant 0 : i32
    %c0_i32_1 = arith.constant 0 : i32
    return %arg0, %c0_i32, %c0_i32_0 : i32, i32, i32
  }
}

</mosaic_0001>

<bundles_post_ra>
// kernel: decoder_forward_pallas.1
= control target key start
LH: loop header
LB: loop body
LE: loop exit
PB: predicated region body
PF: predicated region fallthrough
CT: control target
= control target key end

     0   :  { %11 = vsyncpa [#allocation4], 0  ;;  %s7777_s0 = inlined_call_operand.vmem [shape: f32[2,1,128], index: 0, kind: input, shape index: {}]   ;;  %s7778_s1 = inlined_call_operand.hbm [shape: bf16[512,128], index: 1, kind: input, shape index: {}]   ;;  %s7779_s2 = inlined_call_operand.hbm [shape: bf16[13,384,128], index: 2, kind: input, shape index: {}]   ;;  %s7780_s3 = inlined_call_operand.hbm [shape: f32[14,128], index: 3, kind: input, shape index: {}]   ;;  %s7781_s4 = inlined_call_operand.hbm [shape: f32[14,128], index: 4, kind: input, shape index: {}]   ;;  %s7782_s5 = inlined_call_operand.vmem [shape: f32[4,64,32], index: 5, kind: input, shape index: {}]   ;;  %s7783_s6 = inlined_call_operand.vmem [shape: f32[2,64,128], index: 6, kind: output, shape index: {}]  }
   0x1   :  { %12 = vsyncpa [#allocation6], 0 }
   0x2   :  { %13 = vsyncpa [#allocation9], 0  ;;  %s7346_s21 = smov 0  }
   0x3 LB: > { %s7352_s22 = sadd.s32 4294967295, %s7300_s21   ;;  %p5149_p0 = scmp.ge.s32.totalorder %s7300_s21, 1  ;;  %s7300_s21 = sphi %s7346_s21, %s19_s21  }
   0x4   : > { %p181_p1 = scmp.lt.s32.totalorder %s7300_s21, 3  ;;  %p6975_p2 = scmp.eq.s32.totalorder %s7352_s22, 0 }
   0x5   : > { %s206_s25 = sshll.u32 %s7779_s2, 4  ;;  %s192_s29 = sshll.u32 %s7778_s1, 4  ;;  %s207_s25 = int_to_ptr.hbm [resolvable:$true] %s206_s25  ;;  %s193_s29 = int_to_ptr.hbm [resolvable:$true] %s192_s29 }
   0x6   : > { %p7360_p3 = pnand %p5149_p0, %p181_p1  ;;  %s7302_s30 = smov [#allocation5]  }
   0x7   : > { %s208_s7 = sshll.u32 %s7302_s30, 4  ;;  %s7303_s9 = smov [#allocation3]   ;;  %s209_s7 = int_to_ptr.vmem [resolvable:$true] %s208_s7 }
   0x8   : > { %p6962_p4 = pneg %p7360_p3  ;;  %s194_s10 = sshll.u32 %s7303_s9, 4  ;;  %s195_s10 = int_to_ptr.vmem [resolvable:$true] %s194_s10 }
   0x9   : > { %s220_s13 = sshll.u32 %s7780_s3, 4  ;;  %s7304_s14 = smov 64   ;;  %s221_s13 = int_to_ptr.hbm [resolvable:$true] %s220_s13 }
   0xa   : > { %p7371_p5 = pnand %p6975_p2, %p6962_p4  ;;  %s7305_s15 = smov 4  }
   0xb   : > { %s7306_s16 = smov [#allocation7]   ;;  %s7307_s18 = smov 128  }
   0xc   : > { %6968 = dma.hbm_to_vmem [thread:$0]  (!%p7371_p5), %s207_s25, 39936, %s209_s7, [#allocation6], %s7304_s14, %s7304_s14, %s7305_s15  }
   0xd   : > { %6965 = dma.hbm_to_vmem [thread:$0]  (!%p7371_p5), %s193_s29, 4096, %s195_s10, [#allocation4], %s7304_s14, %s7304_s14, %s7305_s15  }
   0xe   : > { %s222_s17 = sshll.u32 %s7306_s16, 4  ;;  %s7308_s19 = smov 8   ;;  %s223_s17 = int_to_ptr.vmem [resolvable:$true] %s222_s17 }
   0xf   : > { %6971 = dma.hbm_to_vmem [thread:$0]  (!%p7371_p5), %s221_s13, 256, %s223_s17, [#allocation6], %s7307_s18, %s7307_s18, %s7308_s19  }
  0x10   : > { %s234_s24 = sshll.u32 %s7781_s4, 4  ;;  %s7309_s27 = smov [#allocation8]   ;;  %s235_s24 = int_to_ptr.hbm [resolvable:$true] %s234_s24 }
  0x11   : > { %s236_s28 = sshll.u32 %s7309_s27, 4  ;;  %261 = sbr.rel (%p7360_p3) target bundleno = 2652 (0xa5c), region = 44  ;;  %s237_s28 = int_to_ptr.vmem [resolvable:$true] %s236_s28 }
  0x12   : > { %6974 = dma.hbm_to_vmem [thread:$0]  (!%p7371_p5), %s235_s24, 256, %s237_s28, [#allocation9], %s7307_s18, %s7307_s18, %s7308_s19  }
  0x16   : > { %7287 = dma.done.wait (%p6975_p2), [#allocation4], 4096  }
  0x17   : > { %7289 = vsyncadd (%p6975_p2), [#allocation4], 4294963200 }
  0x18   : > { %7291 = dma.done.wait (%p6975_p2), [#allocation6], 40192  }
  0x19   : > { %7293 = vsyncadd (%p6975_p2), [#allocation6], 4294927104 }
  0x1a   : > { %7295 = dma.done.wait (%p6975_p2), [#allocation9], 256  }
  0x1b   : > { %7297 = vsyncadd (%p6975_p2), [#allocation9], 4294967040  ;;  %p305_p6 = scmp.lt.s32.totalorder %s7352_s22, 1  ;;  %v7310_v0 = vmov 0.0   ;;  %v6609_v1 = vld [vmem:[#allocation3 + $0x38] sm:$0xff]  ;;  %v6608_v3 = vld [vmem:[#allocation3 + $0x30] sm:$0xff] }
  0x1c   : > { %313 = vst [vmem:[#allocation2] sm:$0xff] %v7310_v0  ;;  %v6625_v2 = vld [vmem:[#allocation3 + $0xb8] sm:$0xff]  ;;  %590 = vmatpush.bf16.msra.mxu1 %v6609_v1  ;;  %v6624_v5 = vld [vmem:[#allocation3 + $0xb0] sm:$0xff]  ;;  %v6607_v7 = vld [vmem:[#allocation3 + $0x28] sm:$0xff]  ;;  %vm667_vm4 = vcmask 1043456   ;;  %vm663_vm5 = vcmask 31744  }
  0x1d   : > { %314 = vst [vmem:[#allocation2 + $0x8] sm:$0xff] %v7310_v0  ;;  %s7791_s22 = smov (!%p305_p6, %s7352_s22), 1  ;;  %v6633_v4 = vld [vmem:[#allocation3 + $0xf8] sm:$0xff]  ;;  %616 = vmatpush.bf16.msra.mxu2 %v6625_v2  ;;  %v6632_v6 = vld [vmem:[#allocation3 + $0xf0] sm:$0xff]  ;;  %v6623_v9 = vld [vmem:[#allocation3 + $0xa8] sm:$0xff]  ;;  %vm1457_vm14 = vcmask 64512  }
  0x1e   : > { %315 = vst [vmem:[#allocation2 + $0x10] sm:$0xff] %v7310_v0  ;;  %s307_s29 = scalar_lea.vmem %s7777_s0, %s7791_s22  ;;  %629 = vmatpush.bf16.msra.mxu3 %v6633_v4  ;;  %v6631_v10 = vld [vmem:[#allocation3 + $0xe8] sm:$0xff]  ;;  %v6606_v11 = vld [vmem:[#allocation3 + $0x20] sm:$0xff]  ;;  %v6605_v14 = vld [vmem:[#allocation3 + $0x18] sm:$0xff]  ;;  %s6601_s14 = sshll.u32 %s7791_s22, 6 }
  0x1f   : > { %316 = vst [vmem:[#allocation2 + $0x18] sm:$0xff] %v7310_v0  ;;  %v322_v8 = vld [vmem:[%s307_s29] sm:$0x1]  ;;  %v6622_v12 = vld [vmem:[#allocation3 + $0xa0] sm:$0xff]  ;;  %v6604_v17 = vld [vmem:[#allocation3 + $0x10] sm:$0xff]  ;;  %s7758_s17 = scalar_lea.vmem %s7783_s6, %s6601_s14 }
  0x20   : > { %317 = vst [vmem:[#allocation2 + $0x20] sm:$0xff] %v7310_v0  ;;  %591 = vmatpush.bf16.msra.mxu1 %v6608_v3  ;;  %v6630_v13 = vld [vmem:[#allocation3 + $0xe0] sm:$0xff]  ;;  %v6621_v15 = vld [vmem:[#allocation3 + $0x98] sm:$0xff]  ;;  %v6620_v18 = vld [vmem:[#allocation3 + $0x90] sm:$0xff] }
  0x21   : > { %318 = vst [vmem:[#allocation2 + $0x28] sm:$0xff] %v7310_v0  ;;  %617 = vmatpush.bf16.msra.mxu2 %v6624_v5  ;;  %v6629_v16 = vld [vmem:[#allocation3 + $0xd8] sm:$0xff]  ;;  %v6628_v19 = vld [vmem:[#allocation3 + $0xd0] sm:$0xff]  ;;  %v6603_v20 = vld [vmem:[#allocation3 + $0x8] sm:$0xff] }
  0x22   : > { %319 = vst [vmem:[#allocation2 + $0x30] sm:$0xff] %v7310_v0  ;;  %630 = vmatpush.bf16.msra.mxu3 %v6632_v6  ;;  %v6619_v21 = vld [vmem:[#allocation3 + $0x88] sm:$0xff]  ;;  %v6602_v23 = vld [vmem:[#allocation3] sm:$0xff]  ;;  %v6617_v25 = vld [vmem:[#allocation3 + $0x78] sm:$0xff] }
  0x23   : > { %320 = vst [vmem:[#allocation2 + $0x38] sm:$0xff] %v7310_v0  ;;  %v6627_v22 = vld [vmem:[#allocation3 + $0xc8] sm:$0xff]  ;;  %v6618_v26 = vld [vmem:[#allocation3 + $0x80] sm:$0xff]  ;;  %v6616_v32 = vld [vmem:[#allocation3 + $0x70] sm:$0xff] }
  0x24   : > { %321 = vst [vmem:[#allocation2 + $0x40] sm:$0xff] %v7310_v0  ;;  %592 = vmatpush.bf16.msra.mxu1 %v6607_v7  ;;  %v6626_v28 = vld [vmem:[#allocation3 + $0xc0] sm:$0xff]  ;;  %v6615_v34 = vld [vmem:[#allocation3 + $0x68] sm:$0xff]  ;;  %v6613_v36 = vld [vmem:[#allocation3 + $0x58] sm:$0xff] }
  0x25   : > { %323 = vst [vmem:[#allocation2 + $0x3] sm:$0x1] %v322_v8  ;;  %618 = vmatpush.bf16.msra.mxu2 %v6623_v9  ;;  %v6614_v35 = vld [vmem:[#allocation3 + $0x60] sm:$0xff]  ;;  %v6612_v37 = vld [vmem:[#allocation3 + $0x50] sm:$0xff]  ;;  %v6611_v38 = vld [vmem:[#allocation3 + $0x48] sm:$0xff] }
  0x26   : > { %631 = vmatpush.bf16.msra.mxu3 %v6631_v10  ;;  %v6610_v39 = vld [vmem:[#allocation3 + $0x40] sm:$0xff]  ;;  %v7000_v48 = vld [vmem:[#allocation8] ss:$0 sm:$0xff]  ;;  %v6641_v54 = vld [vmem:[#allocation5 + $0x38] sm:$0xff] }
  0x27   : > { %v6649_v55 = vld [vmem:[#allocation5 + $0x78] sm:$0xff]  ;;  %v6640_v58 = vld [vmem:[#allocation5 + $0x30] sm:$0xff]  ;;  %v6639_v62 = vld [vmem:[#allocation5 + $0x28] sm:$0xff] }
  0x28   : > { %593 = vmatpush.bf16.msra.mxu1 %v6606_v11  ;;  %v6648_v59 = vld [vmem:[#allocation5 + $0x70] sm:$0xff]  ;;  %v6657_v60 = vld [vmem:[#allocation5 + $0xb8] sm:$0xff]  ;;  %v6647_v63 = vld [vmem:[#allocation5 + $0x68] sm:$0xff] }
  0x29   : > { %619 = vmatpush.bf16.msra.mxu2 %v6622_v12  ;;  %v6656_v61 = vld [vmem:[#allocation5 + $0xb0] sm:$0xff]  ;;  %v6655_v0 = vld [vmem:[#allocation5 + $0xa8] sm:$0xff]  ;;  %v6638_v3 = vld [vmem:[#allocation5 + $0x20] sm:$0xff] }
  0x2a   : > { %632 = vmatpush.bf16.msra.mxu3 %v6630_v13  ;;  %v6646_v4 = vld [vmem:[#allocation5 + $0x60] sm:$0xff]  ;;  %v6637_v6 = vld [vmem:[#allocation5 + $0x18] sm:$0xff]  ;;  %v6636_v10 = vld [vmem:[#allocation5 + $0x10] sm:$0xff] }
  0x2b   : > { %v6654_v5 = vld [vmem:[#allocation5 + $0xa0] sm:$0xff]  ;;  %v6645_v7 = vld [vmem:[#allocation5 + $0x58] sm:$0xff]  ;;  %v6644_v11 = vld [vmem:[#allocation5 + $0x50] sm:$0xff] }
  0x2c   : > { %594 = vmatpush.bf16.msra.mxu1 %v6605_v14  ;;  %v388_v24 = vld [vmem:[#allocation2] sm:$0xf] }
  0x2d   : > { %620 = vmatpush.bf16.msra.mxu2 %v6621_v15  ;;  %v390_v27 = vld [vmem:[#allocation2 + $0x2] sm:$0xf]  ;;  %v392_v30 = vpack.c.bf16 %v388_v24, %v388_v24  ;;  %v6635_v15 = vld [vmem:[#allocation5 + $0x8] sm:$0xff] }
  0x2e   : > { %633 = vmatpush.bf16.msra.mxu3 %v6629_v16  ;;  %v391_v29 = vld [vmem:[#allocation2 + $0x3] sm:$0xf]  ;;  %v394_v31 = vpack.c.bf16 %v390_v27, %v390_v27  ;;  %v6643_v16 = vld [vmem:[#allocation5 + $0x48] sm:$0xff] }
  0x2f   : > { %v395_v33 = vpack.c.bf16 %v391_v29, %v391_v29  ;;  %v389_v40 = vld [vmem:[#allocation2 + $0x1] sm:$0xf] }
  0x30   : > { %595 = vmatpush.bf16.msra.mxu1 %v6604_v17  ;;  %v393_v41 = vpack.c.bf16 %v389_v40, %v389_v40  ;;  %v6653_v8 = vld [vmem:[#allocation5 + $0x98] sm:$0xff]  ;;  %v6651_v40 = vld [vmem:[#allocation5 + $0x88] sm:$0xff] }
  0x31   : > { %621 = vmatpush.bf16.msra.mxu2 %v6620_v18  ;;  %v6673_v24 = vld [vmem:[#allocation5 + $0x138] sm:$0xff] }
  0x32   : > { %634 = vmatpush.bf16.msra.mxu3 %v6628_v19  ;;  %v6665_v29 = vld [vmem:[#allocation5 + $0xf8] sm:$0xff] }
  0x34   : > { %596 = vmatpush.bf16.msra.mxu1 %v6603_v20 }
  0x35   : > { %622 = vmatpush.bf16.msra.mxu2 %v6619_v21  ;;  %v6634_v21 = vld [vmem:[#allocation5] sm:$0xff] }
  0x36   : > { %635 = vmatpush.bf16.msra.mxu3 %v6627_v22  ;;  %v6642_v22 = vld [vmem:[#allocation5 + $0x40] sm:$0xff] }
  0x38   : > { %597 = vmatpush.bf16.msra.mxu1 %v6602_v23 }
  0x39   : > { %623 = vmatpush.bf16.msra.mxu2 %v6618_v26  ;;  %v6681_v26 = vld [vmem:[#allocation5 + $0x178] sm:$0xff] }
  0x3a   : > { %636 = vmatpush.bf16.msra.mxu3 %v6626_v28  ;;  %v662_v28 = vld [vmem:[%s7782_s5] sm:$0xff] }
  0x3b   : > { %598 = vmatmul.bf16.vlgmr.msra.gmra.mxu1 %v392_v30  ;;  %v6664_v30 = vld [vmem:[#allocation5 + $0xf0] sm:$0xff] }
  0x3c   : > { %603 = vmatpush.bf16.msrb.mxu1 %v6617_v25  ;;  %624 = vmatmul.bf16.vlgmr.msra.gmra.mxu2 %v394_v31  ;;  %v6663_v31 = vld [vmem:[#allocation5 + $0xe8] sm:$0xff] }
  0x3d   : > { %637 = vmatmul.bf16.vlgmr.msra.gmra.mxu3 %v395_v33  ;;  %905 = vmatpush.bf16.msrb.mxu2 %v6649_v55  ;;  %v6661_v33 = vld [vmem:[#allocation5 + $0xd8] sm:$0xff] }
  0x3e   : > { %918 = vmatpush.bf16.msrb.mxu3 %v6657_v60  ;;  %v6697_v60 = vld [vmem:[#allocation5 + $0x1f8] sm:$0xff] }
  0x40   : > { %604 = vmatpush.bf16.msrb.mxu1 %v6616_v32  ;;  %v6662_v32 = vld [vmem:[#allocation5 + $0xe0] sm:$0xff] }
  0x41   : > { %906 = vmatpush.bf16.msrb.mxu2 %v6648_v59 }
  0x42   : > { %919 = vmatpush.bf16.msrb.mxu3 %v6656_v61  ;;  %v7001_v61 = vld [vmem:[#allocation8 + $0x1] ss:$0 sm:$0xff] }
  0x44   : > { %605 = vmatpush.bf16.msrb.mxu1 %v6615_v34  ;;  %v6680_v34 = vld [vmem:[#allocation5 + $0x170] sm:$0xff] }
  0x45   : > { %907 = vmatpush.bf16.msrb.mxu2 %v6647_v63 }
  0x46   : > { %920 = vmatpush.bf16.msrb.mxu3 %v6655_v0 }
  0x48   : > { %606 = vmatpush.bf16.msrb.mxu1 %v6614_v35  ;;  %v6679_v35 = vld [vmem:[#allocation5 + $0x168] sm:$0xff] }
  0x49   : > { %908 = vmatpush.bf16.msrb.mxu2 %v6646_v4  ;;  %v6705_v4 = vld [vmem:[#allocation5 + $0x238] sm:$0xff] }
  0x4a   : > { %921 = vmatpush.bf16.msrb.mxu3 %v6654_v5  ;;  %v6695_v5 = vld [vmem:[#allocation5 + $0x1e8] sm:$0xff] }
  0x4c   : > { %607 = vmatpush.bf16.msrb.mxu1 %v6613_v36  ;;  %v6652_v36 = vld [vmem:[#allocation5 + $0x90] sm:$0xff] }
  0x4d   : > { %909 = vmatpush.bf16.msrb.mxu2 %v6645_v7  ;;  %v6688_v7 = vld [vmem:[#allocation5 + $0x1b0] sm:$0xff] }
  0x4e   : > { %922 = vmatpush.bf16.msrb.mxu3 %v6653_v8  ;;  %v6704_v8 = vld [vmem:[#allocation5 + $0x230] sm:$0xff] }
  0x50   : > { %608 = vmatpush.bf16.msrb.mxu1 %v6612_v37  ;;  %v6660_v37 = vld [vmem:[#allocation5 + $0xd0] sm:$0xff] }
  0x51   : > { %910 = vmatpush.bf16.msrb.mxu2 %v6644_v11 }
  0x52   : > { %923 = vmatpush.bf16.msrb.mxu3 %v6652_v36 }
  0x54   : > { %609 = vmatpush.bf16.msrb.mxu1 %v6611_v38  ;;  %v6672_v38 = vld [vmem:[#allocation5 + $0x130] sm:$0xff] }
  0x55   : > { %911 = vmatpush.bf16.msrb.mxu2 %v6643_v16  ;;  %v6703_v16 = vld [vmem:[#allocation5 + $0x228] sm:$0xff] }
  0x56   : > { %924 = vmatpush.bf16.msrb.mxu3 %v6651_v40 }
  0x58   : > { %610 = vmatpush.bf16.msrb.mxu1 %v6610_v39  ;;  %v6678_v39 = vld [vmem:[#allocation5 + $0x160] sm:$0xff] }
  0x59   : > { %912 = vmatpush.bf16.msrb.mxu2 %v6642_v22 }
  0x5b   : > { %611 = vmatmul.bf16.vlgmr.msrb.gmra.mxu1 %v393_v41  ;;  %v6659_v41 = vld [vmem:[#allocation5 + $0xc8] sm:$0xff] }
  0x5c   : > { %892 = vmatpush.bf16.msra.mxu1 %v6641_v54 }
  0x5d   : > { %1150 = vmatpush.bf16.msra.mxu2 %v6681_v26  ;;  %v6685_v26 = vld [vmem:[#allocation5 + $0x198] sm:$0xff] }
  0x60   : > { %893 = vmatpush.bf16.msra.mxu1 %v6640_v58 }
  0x61   : > { %1151 = vmatpush.bf16.msra.mxu2 %v6680_v34  ;;  %v6690_v34 = vld [vmem:[#allocation5 + $0x1c0] sm:$0xff] }
  0x64   : > { %894 = vmatpush.bf16.msra.mxu1 %v6639_v62  ;;  %v6696_v62 = vld [vmem:[#allocation5 + $0x1f0] sm:$0xff] }
  0x65   : > { %1152 = vmatpush.bf16.msra.mxu2 %v6679_v35 }
  0x68   : > { %895 = vmatpush.bf16.msra.mxu1 %v6638_v3  ;;  %v6689_v3 = vld [vmem:[#allocation5 + $0x1b8] sm:$0xff] }
  0x69   : > { %1153 = vmatpush.bf16.msra.mxu2 %v6678_v39 }
  0x6c   : > { %896 = vmatpush.bf16.msra.mxu1 %v6637_v6 }
  0x70   : > { %897 = vmatpush.bf16.msra.mxu1 %v6636_v10 }
  0x74   : > { %898 = vmatpush.bf16.msra.mxu1 %v6635_v15  ;;  %v6687_v15 = vld [vmem:[#allocation5 + $0x1a8] sm:$0xff] }
  0x78   : > { %899 = vmatpush.bf16.msra.mxu1 %v6634_v21 }
  0x7c   : > { %1137 = vmatpush.bf16.msrb.mxu1 %v6673_v24  ;;  %v7002_v24 = vld [vmem:[#allocation7 + $0x2] ss:$0 sm:$0xff] }
  0x80   : > { %1138 = vmatpush.bf16.msrb.mxu1 %v6672_v38  ;;  %v6699_v38 = vld [vmem:[#allocation5 + $0x208] sm:$0xff] }
  0xb8   : > { %v599_v42 = vpop.f32.mrf.mxu1 }
  0xb9   : > { %v600_v49 = vadd.f32 %v7000_v48, %v599_v42  ;;  %v6671_v42 = vld [vmem:[#allocation5 + $0x128] sm:$0xff]  ;;  %v6669_v48 = vld [vmem:[#allocation5 + $0x118] sm:$0xff] }
  0xba   : > { %1139 = vmatpush.bf16.msrb.mxu1 %v6671_v42  ;;  %v6698_v42 = vld [vmem:[#allocation5 + $0x200] sm:$0xff] }
  0xbf   : > { %v625_v43 = vpop.f32.mrf.mxu2 }
  0xc0   : > { %v601_v44 = vpop.f32.mrf.mxu1  ;;  %v638_v45 = vpop.f32.mrf.mxu3 }
  0xc1   : > { %v6650_v44 = vld [vmem:[#allocation5 + $0x80] sm:$0xff] }
  0xc2   : > { %925 = vmatpush.bf16.msrb.mxu3 %v6650_v44 }
  0xc6   : > { %1389 = vmatpush.bf16.msra.mxu3 %v6689_v3 }
  0xc7   : > { %v627_v46 = vpop.f32.mrf.mxu2 }
  0xc8   : > { %v640_v47 = vpop.f32.mrf.mxu3  ;;  %v6670_v46 = vld [vmem:[#allocation5 + $0x120] sm:$0xff] }
  0xc9   : > { %v6676_v47 = vld [vmem:[#allocation5 + $0x150] sm:$0xff]  ;;  %1140 = vmatpush.bf16.msrb.mxu1 %v6670_v46 }
  0xca   : > { %1390 = vmatpush.bf16.msra.mxu3 %v6688_v7 }
  0xcd   : > { %1141 = vmatpush.bf16.msrb.mxu1 %v6669_v48 }
  0xce   : > { %1391 = vmatpush.bf16.msra.mxu3 %v6687_v15 }
  0xd8   : > { %v612_v50 = vpop.f32.mrf.mxu1 }
  0xd9   : > { %v613_v51 = vadd.f32 %v612_v50, %v600_v49  ;;  %v6675_v49 = vld [vmem:[#allocation5 + $0x148] sm:$0xff]  ;;  %v6668_v50 = vld [vmem:[#allocation5 + $0x110] sm:$0xff] }
  0xda   : > { %1142 = vmatpush.bf16.msrb.mxu1 %v6668_v50 }
  0xdb   : > { %v626_v52 = vadd.f32 %v625_v43, %v613_v51  ;;  %v6677_v43 = vld [vmem:[#allocation5 + $0x158] sm:$0xff]  ;;  %v6674_v51 = vld [vmem:[#allocation5 + $0x140] sm:$0xff] }
  0xdc   : > { %1154 = vmatpush.bf16.msra.mxu2 %v6677_v43 }
  0xdd   : > { %v7411_v53 = vadd.f32 %v638_v45, %v626_v52  ;;  %v6658_v45 = vld [vmem:[#allocation5 + $0xc0] sm:$0xff]  ;;  %v6667_v52 = vld [vmem:[#allocation5 + $0x108] sm:$0xff] }
  0xde   : > { %1143 = vmatpush.bf16.msrb.mxu1 %v6667_v52 }
  0xdf   : > { %v5290_v56 = vmul.f32 -1.442695, %v7411_v53 }
  0xe0   : > { %v614_v57 = vpop.f32.mrf.mxu1  ;;  %1155 = vmatpush.bf16.msra.mxu2 %v6676_v47 }
  0xe1   : > { %7022 = vpow2.f32 %v5290_v56 }
  0xe4   : > { %1156 = vmatpush.bf16.msra.mxu2 %v6675_v49 }
  0xe7   : > { %v7023_v1 = vpop.eup %7022 }
  0xe8   : > { %v645_v2 = vadd.f32 1.0, %v7023_v1  ;;  %1157 = vmatpush.bf16.msra.mxu2 %v6674_v51 }
  0xea   : > { %7024 = vrcp.f32 %v645_v2  ;;  %v657_v14 = vand.u32 2147483648, %v645_v2  ;;  %v655_v18 = vand.u32 2147483647, %v645_v2  ;;  %vm651_vm1 = vweird.f32 %v645_v2 }
  0xec   : > { %v658_v20 = vor.u32 1.1754944e-38, %v657_v14  ;;  %vm656_vm3 = vcmp.eq.f32.partialorder %v655_v18, 8.507059e+37  ;;  %v6686_v18 = vld [vmem:[#allocation5 + $0x1a0] sm:$0xff] }
  0xed   : > { %1392 = vmatpush.bf16.msra.mxu3 %v6686_v18  ;;  %v6737_v18 = vld [vmem:[#allocation5 + $0x338] sm:$0xff] }
  0xf0   : > { %v7025_v9 = vpop.eup %7024 }
  0xf1   : > { %v647_v12 = vmul.f32 %v7025_v9, %v645_v2  ;;  %vm652_vm0 = vweird.f32 %v7025_v9  ;;  %1393 = vmatpush.bf16.msra.mxu3 %v6685_v26 }
  0xf2   : > { %vm653_vm2 = vmor %vm651_vm1, %vm652_vm0 }
  0xf3   : > { %v648_v13 = vsub.f32 1.0, %v647_v12 }
  0xf5   : > { %v649_v17 = vmul.f32 %v7025_v9, %v648_v13 }
  0xf7   : > { %v650_v19 = vadd.f32 %v7025_v9, %v649_v17  ;;  %v6693_v17 = vld [vmem:[#allocation5 + $0x1d8] sm:$0xff] }
  0xf9   : > { %v654_v23 = vsel %vm653_vm2, %v7025_v9, %v650_v19  ;;  %v6694_v9 = vld [vmem:[#allocation5 + $0x1e0] sm:$0xff] }
  0xfa   : > { %v659_v25 = vsel %vm656_vm3, %v658_v20, %v654_v23  ;;  %v6702_v19 = vld [vmem:[#allocation5 + $0x220] sm:$0xff]  ;;  %v6692_v20 = vld [vmem:[#allocation5 + $0x1d0] sm:$0xff] }
  0xfb   : > { %v661_v27 = vmul.f32 %v659_v25, %v7411_v53  ;;  %v6666_v53 = vld [vmem:[#allocation5 + $0x100] sm:$0xff] }
  0xfc   : > { %1144 = vmatpush.bf16.msrb.mxu1 %v6666_v53 }
  0xfd   : > { %5291 = vmatpush.msk.msra.mxu0 %vm667_vm4, %v661_v27  ;;  %v6701_v27 = vld [vmem:[#allocation5 + $0x218] sm:$0xff] }
  0xfe   : > { %5292 = vmatmul.msk.f32.vlgmr.msra.gmra.mxu0 %vm663_vm5, %v662_v28  ;;  %v6691_v28 = vld [vmem:[#allocation5 + $0x1c8] sm:$0xff] }
  0xff   : > { %1124 = vmatpush.bf16.msrb.mxu0 %v6665_v29 }
 0x103   : > { %1125 = vmatpush.bf16.msrb.mxu0 %v6664_v30  ;;  %v7003_v30 = vld [vmem:[#allocation8 + $0x2] ss:$0 sm:$0xff] }
 0x107   : > { %1126 = vmatpush.bf16.msrb.mxu0 %v6663_v31 }
 0x10b   : > { %1127 = vmatpush.bf16.msrb.mxu0 %v6662_v32  ;;  %v6684_v32 = vld [vmem:[#allocation5 + $0x190] sm:$0xff] }
 0x10c   : > { %1394 = vmatpush.bf16.msra.mxu3 %v6684_v32 }
 0x10f   : > { %1128 = vmatpush.bf16.msrb.mxu0 %v6661_v33  ;;  %v6700_v33 = vld [vmem:[#allocation5 + $0x210] sm:$0xff] }
 0x113   : > { %1129 = vmatpush.bf16.msrb.mxu0 %v6660_v37  ;;  %v6683_v37 = vld [vmem:[#allocation5 + $0x188] sm:$0xff] }
 0x114   : > { %1395 = vmatpush.bf16.msra.mxu3 %v6683_v37 }
 0x117   : > { %1130 = vmatpush.bf16.msrb.mxu0 %v6659_v41  ;;  %v6682_v41 = vld [vmem:[#allocation5 + $0x180] sm:$0xff] }
 0x118   : > { %1396 = vmatpush.bf16.msra.mxu3 %v6682_v41  ;;  %v6707_v41 = vld [vmem:[#allocation5 + $0x248] sm:$0xff] }
 0x11b   : > { %1131 = vmatpush.bf16.msrb.mxu0 %v6658_v45 }
 0x11f   : > { %1402 = vmatpush.bf16.msra.mxu0 %v6697_v60 }
 0x123   : > { %1403 = vmatpush.bf16.msra.mxu0 %v6696_v62 }
 0x127   : > { %1404 = vmatpush.bf16.msra.mxu0 %v6695_v5 }
 0x12b   : > { %1405 = vmatpush.bf16.msra.mxu0 %v6694_v9 }
 0x12f   : > { %1406 = vmatpush.bf16.msra.mxu0 %v6693_v17  ;;  %v6720_v17 = vld [vmem:[#allocation5 + $0x2b0] sm:$0xff] }
 0x133   : > { %1407 = vmatpush.bf16.msra.mxu0 %v6692_v20  ;;  %v6719_v20 = vld [vmem:[#allocation5 + $0x2a8] sm:$0xff] }
 0x137   : > { %1408 = vmatpush.bf16.msra.mxu0 %v6691_v28  ;;  %v6709_v28 = vld [vmem:[#allocation5 + $0x258] sm:$0xff] }
 0x13b   : > { %1409 = vmatpush.bf16.msra.mxu0 %v6690_v34  ;;  %v6708_v34 = vld [vmem:[#allocation5 + $0x250] sm:$0xff] }
 0x17b   : > { %v688_v54 = vpop.f32.mrf.mxu0 }
 0x17c   : > { %691 = vst [vmem:[#allocation2 + $0x1] sm:$0xff] %v688_v54  ;;  %v744_v55 = vpack.c.bf16 %v688_v54, %v688_v54 }
 0x17e   : > { %913 = vmatmul.bf16.vlgmr.msrb.gmra.mxu2 %v744_v55 }
 0x183   : > { %v742_v56 = vld [vmem:[#allocation2 + $0x2] sm:$0xff] }
 0x184   : > { %v740_v57 = vld [vmem:[#allocation2] sm:$0xff]  ;;  %v745_v59 = vpack.c.bf16 %v742_v56, %v742_v56 }
 0x185   : > { %v743_v58 = vpack.c.bf16 %v740_v57, %v740_v57 }
 0x186   : > { %926 = vmatmul.bf16.vlgmr.msrb.gmra.mxu3 %v745_v59 }
 0x187   : > { %900 = vmatmul.bf16.vlgmr.msra.gmra.mxu1 %v743_v58  ;;  %1132 = vmatmul.bf16.vlgmr.msrb.gmra.mxu0 %v743_v58 }
 0x188   : > { %1415 = vmatpush.bf16.msra.mxu1 %v6705_v4  ;;  %v7004_v4 = vld [vmem:[#allocation7 + $0x3] ss:$0 sm:$0xff] }
 0x18c   : > { %1416 = vmatpush.bf16.msra.mxu1 %v6704_v8 }
 0x18e   : > { %1158 = vmatmul.bf16.vlgmr.msra.gmra.mxu2 %v745_v59 }
 0x190   : > { %1417 = vmatpush.bf16.msra.mxu1 %v6703_v16  ;;  %v6712_v16 = vld [vmem:[#allocation5 + $0x270] sm:$0xff] }
 0x194   : > { %1418 = vmatpush.bf16.msra.mxu1 %v6702_v19  ;;  %v6711_v19 = vld [vmem:[#allocation5 + $0x268] sm:$0xff] }
 0x197   : > { %1145 = vmatmul.bf16.vlgmr.msrb.gmra.mxu1 %v744_v55 }
 0x198   : > { %1419 = vmatpush.bf16.msra.mxu1 %v6701_v27 }
 0x19c   : > { %1420 = vmatpush.bf16.msra.mxu1 %v6700_v33 }
 0x1a0   : > { %1421 = vmatpush.bf16.msra.mxu1 %v6699_v38 }
 0x1a4   : > { %1422 = vmatpush.bf16.msra.mxu1 %v6698_v42  ;;  %v6715_v42 = vld [vmem:[#allocation5 + $0x288] sm:$0xff] }
 0x1a8   : > { %1928 = vmatpush.bf16.msrb.mxu1 %v6737_v18 }
 0x201   : > { %v914_v63 = vpop.f32.mrf.mxu2 }
 0x204   : > { %v901_v0 = vpop.f32.mrf.mxu1  ;;  %v1133_v2 = vpop.f32.mrf.mxu0 }
 0x205   : > { %v902_v1 = vadd.f32 %v7001_v61, %v901_v0 }
 0x207   : > { %v915_v6 = vadd.f32 %v914_v63, %v902_v1 }
 0x209   : > { %v927_v10 = vpop.f32.mrf.mxu3  ;;  %v916_v11 = vpop.f32.mrf.mxu2 }
 0x20a   : > { %v7418_v12 = vadd.f32 %v927_v10, %v915_v6  ;;  %v7005_v6 = vld [vmem:[#allocation8 + $0x3] ss:$0 sm:$0xff]  ;;  %v6713_v11 = vld [vmem:[#allocation5 + $0x278] sm:$0xff] }
 0x20b   : > { %1693 = vmatpush.bf16.msrb.mxu3 %v6713_v11 }
 0x20c   : > { %v903_v13 = vpop.f32.mrf.mxu1  ;;  %v1135_v14 = vpop.f32.mrf.mxu0 }
 0x20d   : > { %v6721_v13 = vld [vmem:[#allocation5 + $0x2b8] sm:$0xff] }
 0x20e   : > { %1707 = vmatpush.bf16.msrb.mxu0 %v6721_v13 }
 0x20f   : > { %1694 = vmatpush.bf16.msrb.mxu3 %v6712_v16 }
 0x211   : > { %v929_v21 = vpop.f32.mrf.mxu3  ;;  %v1159_v22 = vpop.f32.mrf.mxu2 }
 0x212   : > { %1708 = vmatpush.bf16.msrb.mxu0 %v6720_v17  ;;  %v6735_v21 = vld [vmem:[#allocation5 + $0x328] sm:$0xff] }
 0x213   : > { %1695 = vmatpush.bf16.msrb.mxu3 %v6711_v19 }
 0x214   : > { %v1146_v23 = vpop.f32.mrf.mxu1 }
 0x215   : > { %v1147_v25 = vadd.f32 %v1146_v23, %v1133_v2  ;;  %v6710_v23 = vld [vmem:[#allocation5 + $0x260] sm:$0xff] }
 0x216   : > { %1709 = vmatpush.bf16.msrb.mxu0 %v6719_v20  ;;  %v7427_v20 = vld [vmem:[#allocation8 + $0x4] ss:$0 sm:$0xff] }
 0x217   : > { %v1160_v29 = vadd.f32 %v1159_v22, %v1147_v25  ;;  %1696 = vmatpush.bf16.msrb.mxu3 %v6710_v23  ;;  %v6769_v23 = vld [vmem:[#allocation5 + $0x438] sm:$0xff] }
 0x219   : > { %v1166_v31 = vmul.f32 %v7002_v24, %v1160_v29  ;;  %v1161_v35 = vpop.f32.mrf.mxu2  ;;  %v6718_v24 = vld [vmem:[#allocation5 + $0x2a0] sm:$0xff]  ;;  %v6717_v29 = vld [vmem:[#allocation5 + $0x298] sm:$0xff] }
 0x21a   : > { %1710 = vmatpush.bf16.msrb.mxu0 %v6718_v24  ;;  %v6716_v35 = vld [vmem:[#allocation5 + $0x290] sm:$0xff] }
 0x21b   : > { %v1168_v36 = vadd.f32 %v7003_v30, %v1166_v31  ;;  %1697 = vmatpush.bf16.msrb.mxu3 %v6709_v28  ;;  %v6761_v28 = vld [vmem:[#allocation5 + $0x3f8] sm:$0xff] }
 0x21c   : > { %v1148_v39 = vpop.f32.mrf.mxu1 }
 0x21d   : > { %v5485_v40 = vmul.f32 -1.442695, %v1168_v36  ;;  %v5583_v39 = vld [vmem:[%s7782_s5 + $0x40] sm:$0xff] }
 0x21e   : > { %1711 = vmatpush.bf16.msrb.mxu0 %v6717_v29  ;;  %v6777_v29 = vld [vmem:[#allocation5 + $0x478] sm:$0xff] }
 0x21f   : > { %7026 = vpow2.f32 %v5485_v40  ;;  %v6729_v40 = vld [vmem:[#allocation5 + $0x2f8] sm:$0xff]  ;;  %1698 = vmatpush.bf16.msrb.mxu3 %v6708_v34 }
 0x222   : > { %1712 = vmatpush.bf16.msrb.mxu0 %v6716_v35 }
 0x223   : > { %1699 = vmatpush.bf16.msrb.mxu3 %v6707_v41  ;;  %v6765_v41 = vld [vmem:[#allocation5 + $0x418] sm:$0xff] }
 0x225   : > { %v7027_v43 = vpop.eup %7026 }
 0x226   : > { %v1172_v44 = vadd.f32 1.0, %v7027_v43  ;;  %v6728_v43 = vld [vmem:[#allocation5 + $0x2f0] sm:$0xff]  ;;  %1713 = vmatpush.bf16.msrb.mxu0 %v6715_v42 }
 0x228   : > { %7028 = vrcp.f32 %v1172_v44  ;;  %v1184_v48 = vand.u32 2147483648, %v1172_v44  ;;  %v1182_v50 = vand.u32 2147483647, %v1172_v44  ;;  %vm1178_vm7 = vweird.f32 %v1172_v44 }
 0x22a   : > { %v1185_v52 = vor.u32 1.1754944e-38, %v1184_v48  ;;  %vm1183_vm9 = vcmp.eq.f32.partialorder %v1182_v50, 8.507059e+37  ;;  %v6726_v48 = vld [vmem:[#allocation5 + $0x2e0] sm:$0xff]  ;;  %v6752_v50 = vld [vmem:[#allocation5 + $0x3b0] sm:$0xff] }
 0x22e   : > { %v7029_v45 = vpop.eup %7028 }
 0x22f   : > { %v1174_v46 = vmul.f32 %v7029_v45, %v1172_v44  ;;  %vm1179_vm6 = vweird.f32 %v7029_v45  ;;  %v5584_v44 = vld [vmem:[%s7782_s5 + $0x48] sm:$0xff] }
 0x230   : > { %vm1180_vm8 = vmor %vm1178_vm7, %vm1179_vm6 }
 0x231   : > { %v1175_v47 = vsub.f32 1.0, %v1174_v46  ;;  %v6714_v46 = vld [vmem:[#allocation5 + $0x280] sm:$0xff] }
 0x232   : > { %1714 = vmatpush.bf16.msrb.mxu0 %v6714_v46  ;;  %v6774_v46 = vld [vmem:[#allocation5 + $0x460] sm:$0xff] }
 0x233   : > { %v1176_v49 = vmul.f32 %v7029_v45, %v1175_v47  ;;  %v6753_v47 = vld [vmem:[#allocation5 + $0x3b8] sm:$0xff] }
 0x235   : > { %v1177_v51 = vadd.f32 %v7029_v45, %v1176_v49  ;;  %v6734_v49 = vld [vmem:[#allocation5 + $0x320] sm:$0xff] }
 0x237   : > { %v1181_v53 = vsel %vm1180_vm8, %v7029_v45, %v1177_v51  ;;  %v6727_v45 = vld [vmem:[#allocation5 + $0x2e8] sm:$0xff]  ;;  %v6706_v51 = vld [vmem:[#allocation5 + $0x240] sm:$0xff] }
 0x238   : > { %v1186_v54 = vsel %vm1183_vm9, %v1185_v52, %v1181_v53  ;;  %v6725_v52 = vld [vmem:[#allocation5 + $0x2d8] sm:$0xff]  ;;  %1700 = vmatpush.bf16.msrb.mxu3 %v6706_v51 }
 0x239   : > { %v1188_v55 = vmul.f32 %v1186_v54, %v1168_v36  ;;  %v6733_v53 = vld [vmem:[#allocation5 + $0x318] sm:$0xff] }
 0x23a   : > { %v6745_v54 = vld [vmem:[#allocation5 + $0x378] sm:$0xff] }
 0x23b   : > { %1189 = vst [vmem:[#allocation2 + $0x1] sm:$0xff] %v1188_v55  ;;  %v1243_v56 = vpack.c.bf16 %v1188_v55, %v1188_v55  ;;  %v6751_v55 = vld [vmem:[#allocation5 + $0x3a8] sm:$0xff] }
 0x23d   : > { %1410 = vmatmul.bf16.vlgmr.msra.gmra.mxu0 %v1243_v56  ;;  %v6724_v56 = vld [vmem:[#allocation5 + $0x2d0] sm:$0xff] }
 0x23e   : > { %1956 = vmatpush.bf16.msra.mxu0 %v6753_v47  ;;  %v6764_v47 = vld [vmem:[#allocation5 + $0x410] sm:$0xff] }
 0x242   : > { %v1239_v57 = vld [vmem:[#allocation2] sm:$0xff]  ;;  %1957 = vmatpush.bf16.msra.mxu0 %v6752_v50 }
 0x243   : > { %v1241_v58 = vld [vmem:[#allocation2 + $0x2] sm:$0xff]  ;;  %v1242_v59 = vpack.c.bf16 %v1239_v57, %v1239_v57  ;;  %v6732_v57 = vld [vmem:[#allocation5 + $0x310] sm:$0xff] }
 0x244   : > { %v1244_v60 = vpack.c.bf16 %v1241_v58, %v1241_v58  ;;  %v6744_v58 = vld [vmem:[#allocation5 + $0x370] sm:$0xff] }
 0x245   : > { %1397 = vmatmul.bf16.vlgmr.msra.gmra.mxu3 %v1242_v59  ;;  %v6750_v59 = vld [vmem:[#allocation5 + $0x3a0] sm:$0xff] }
 0x246   : > { %1423 = vmatmul.bf16.vlgmr.msra.gmra.mxu1 %v1244_v60  ;;  %1942 = vmatpush.bf16.msra.mxu3 %v6745_v54  ;;  %v6723_v60 = vld [vmem:[#allocation5 + $0x2c8] sm:$0xff]  ;;  %v6773_v54 = vld [vmem:[#allocation5 + $0x458] sm:$0xff] }
 0x247   : > { %1958 = vmatpush.bf16.msra.mxu0 %v6751_v55  ;;  %v6763_v55 = vld [vmem:[#allocation5 + $0x408] sm:$0xff] }
 0x24a   : > { %1943 = vmatpush.bf16.msra.mxu3 %v6744_v58 }
 0x24b   : > { %1959 = vmatpush.bf16.msra.mxu0 %v6750_v59  ;;  %v6756_v59 = vld [vmem:[#allocation5 + $0x3d0] sm:$0xff] }
 0x2ba   : > { %v1411_v61 = vpop.f32.mrf.mxu0 }
 0x2c2   : > { %v1413_v63 = vpop.f32.mrf.mxu0 }
 0x2c3   : > { %v1424_v62 = vpop.f32.mrf.mxu1  ;;  %v6749_v63 = vld [vmem:[#allocation5 + $0x398] sm:$0xff] }
 0x2c4   : > { %1960 = vmatpush.bf16.msra.mxu0 %v6749_v63  ;;  %v6755_v63 = vld [vmem:[#allocation5 + $0x3c8] sm:$0xff] }
 0x2c8   : > { %v1398_v0 = vpop.f32.mrf.mxu3 }
 0x2c9   : > { %v1399_v1 = vadd.f32 %v1398_v0, %v7418_v12  ;;  %v6736_v12 = vld [vmem:[#allocation5 + $0x330] sm:$0xff]  ;;  %v6722_v0 = vld [vmem:[#allocation5 + $0x2c0] sm:$0xff] }
 0x2ca   : > { %1929 = vmatpush.bf16.msrb.mxu1 %v6736_v12 }
 0x2cb   : > { %v1426_v2 = vpop.f32.mrf.mxu1  ;;  %v1412_v3 = vadd.f32 %v1411_v61, %v1399_v1  ;;  %v6731_v61 = vld [vmem:[#allocation5 + $0x308] sm:$0xff]  ;;  %v6730_v1 = vld [vmem:[#allocation5 + $0x300] sm:$0xff] }
 0x2cc   : > { %v6742_v2 = vld [vmem:[#allocation5 + $0x360] sm:$0xff] }
 0x2cd   : > { %v1425_v5 = vadd.f32 %v1424_v62, %v1412_v3  ;;  %v6743_v62 = vld [vmem:[#allocation5 + $0x368] sm:$0xff]  ;;  %v6748_v3 = vld [vmem:[#allocation5 + $0x390] sm:$0xff] }
 0x2ce   : > { %1930 = vmatpush.bf16.msrb.mxu1 %v6735_v21  ;;  %1944 = vmatpush.bf16.msra.mxu3 %v6743_v62 }
 0x2cf   : > { %v1431_v7 = vmul.f32 %v7004_v4, %v1425_v5  ;;  %1961 = vmatpush.bf16.msra.mxu0 %v6748_v3  ;;  %v6741_v4 = vld [vmem:[#allocation5 + $0x358] sm:$0xff]  ;;  %v6747_v5 = vld [vmem:[#allocation5 + $0x388] sm:$0xff] }
 0x2d0   : > { %v1400_v8 = vpop.f32.mrf.mxu3 }
 0x2d1   : > { %v1433_v9 = vadd.f32 %v7005_v6, %v1431_v7  ;;  %v6740_v6 = vld [vmem:[#allocation5 + $0x350] sm:$0xff]  ;;  %v6746_v7 = vld [vmem:[#allocation5 + $0x380] sm:$0xff]  ;;  %v6739_v8 = vld [vmem:[#allocation5 + $0x348] sm:$0xff] }
 0x2d2   : > { %1931 = vmatpush.bf16.msrb.mxu1 %v6734_v49  ;;  %1945 = vmatpush.bf16.msra.mxu3 %v6742_v2 }
 0x2d3   : > { %v5582_v10 = vmul.f32 -1.442695, %v1433_v9  ;;  %1962 = vmatpush.bf16.msra.mxu0 %v6747_v5  ;;  %v6770_v5 = vld [vmem:[#allocation5 + $0x440] sm:$0xff] }
 0x2d5   : > { %7030 = vpow2.f32 %v5582_v10 }
 0x2d6   : > { %1932 = vmatpush.bf16.msrb.mxu1 %v6733_v53  ;;  %1946 = vmatpush.bf16.msra.mxu3 %v6741_v4  ;;  %v6757_v53 = vld [vmem:[#allocation5 + $0x3d8] sm:$0xff]  ;;  %v6754_v4 = vld [vmem:[#allocation5 + $0x3c0] sm:$0xff] }
 0x2d7   : > { %1963 = vmatpush.bf16.msra.mxu0 %v6746_v7 }
 0x2da   : > { %1933 = vmatpush.bf16.msrb.mxu1 %v6732_v57  ;;  %1947 = vmatpush.bf16.msra.mxu3 %v6740_v6 }
 0x2db   : > { %v7031_v14 = vpop.eup %7030 }
 0x2dc   : > { %v1437_v15 = vadd.f32 1.0, %v7031_v14 }
 0x2de   : > { %7032 = vrcp.f32 %v1437_v15  ;;  %v1449_v27 = vand.u32 2147483648, %v1437_v15  ;;  %v1447_v31 = vand.u32 2147483647, %v1437_v15  ;;  %vm1443_vm11 = vweird.f32 %v1437_v15  ;;  %1934 = vmatpush.bf16.msrb.mxu1 %v6731_v61  ;;  %1948 = vmatpush.bf16.msra.mxu3 %v6739_v8  ;;  %v6762_v61 = vld [vmem:[#allocation5 + $0x400] sm:$0xff] }
 0x2e0   : > { %v1450_v33 = vor.u32 1.1754944e-38, %v1449_v27  ;;  %vm1448_vm13 = vcmp.eq.f32.partialorder %v1447_v31, 8.507059e+37  ;;  %v6760_v31 = vld [vmem:[#allocation5 + $0x3f0] sm:$0xff] }
 0x2e2   : > { %1935 = vmatpush.bf16.msrb.mxu1 %v6730_v1 }
 0x2e4   : > { %v7033_v22 = vpop.eup %7032 }
 0x2e5   : > { %v1439_v25 = vmul.f32 %v7033_v22, %v1437_v15  ;;  %vm1444_vm10 = vweird.f32 %v7033_v22 }
 0x2e6   : > { %vm1445_vm12 = vmor %vm1443_vm11, %vm1444_vm10  ;;  %2236 = vmatpush.bf16.msra.mxu1 %v6769_v23 }
 0x2e7   : > { %v1440_v26 = vsub.f32 1.0, %v1439_v25  ;;  %v6768_v25 = vld [vmem:[#allocation5 + $0x430] sm:$0xff] }
 0x2e9   : > { %v1441_v30 = vmul.f32 %v7033_v22, %v1440_v26 }
 0x2ea   : > { %2237 = vmatpush.bf16.msra.mxu1 %v6768_v25 }
 0x2eb   : > { %v1442_v32 = vadd.f32 %v7033_v22, %v1441_v30  ;;  %v6767_v30 = vld [vmem:[#allocation5 + $0x428] sm:$0xff] }
 0x2ed   : > { %v1446_v36 = vsel %vm1445_vm12, %v7033_v22, %v1442_v32  ;;  %v6776_v32 = vld [vmem:[#allocation5 + $0x470] sm:$0xff] }
 0x2ee   : > { %v1451_v37 = vsel %vm1448_vm13, %v1450_v33, %v1446_v36  ;;  %2238 = vmatpush.bf16.msra.mxu1 %v6767_v30  ;;  %v6766_v33 = vld [vmem:[#allocation5 + $0x420] sm:$0xff] }
 0x2ef   : > { %v1453_v38 = vmul.f32 %v1451_v37, %v1433_v9  ;;  %v6738_v9 = vld [vmem:[#allocation5 + $0x340] sm:$0xff] }
 0x2f0   : > { %1949 = vmatpush.bf16.msra.mxu3 %v6738_v9  ;;  %v7007_v37 = vld [vmem:[#allocation7 + $0x5] ss:$0 sm:$0xff] }
 0x2f1   : > { %1479 = vmatpush.msrb.mxu2 %v1453_v38 }
 0x2f2   : > { %5585 = vmatmul.msk.f32.vlgmr.msrb.gmra.mxu2 %vm1457_vm14, %v5583_v39  ;;  %2239 = vmatpush.bf16.msra.mxu1 %v6766_v33  ;;  %v6759_v39 = vld [vmem:[#allocation5 + $0x3e8] sm:$0xff] }
 0x2f3   : > { %1721 = vmatpush.bf16.msra.mxu2 %v6729_v40  ;;  %v6775_v40 = vld [vmem:[#allocation5 + $0x468] sm:$0xff] }
 0x2f6   : > { %2240 = vmatpush.bf16.msra.mxu1 %v6765_v41 }
 0x2f7   : > { %1722 = vmatpush.bf16.msra.mxu2 %v6728_v43  ;;  %v7008_v43 = vld [vmem:[#allocation8 + $0x5] ss:$0 sm:$0xff] }
 0x2fa   : > { %5586 = vmatmul.msk.f32.gmra.mxu2 %vm1457_vm14, %v5584_v44  ;;  %2241 = vmatpush.bf16.msra.mxu1 %v6764_v47 }
 0x2fb   : > { %1723 = vmatpush.bf16.msra.mxu2 %v6727_v45  ;;  %v6758_v45 = vld [vmem:[#allocation5 + $0x3e0] sm:$0xff] }
 0x2fe   : > { %2242 = vmatpush.bf16.msra.mxu1 %v6763_v55 }
 0x2ff   : > { %1724 = vmatpush.bf16.msra.mxu2 %v6726_v48 }
 0x302   : > { %2243 = vmatpush.bf16.msra.mxu1 %v6762_v61 }
 0x303   : > { %1725 = vmatpush.bf16.msra.mxu2 %v6725_v52 }
 0x307   : > { %1726 = vmatpush.bf16.msra.mxu2 %v6724_v56 }
 0x30b   : > { %1727 = vmatpush.bf16.msra.mxu2 %v6723_v60  ;;  %v6772_v60 = vld [vmem:[#allocation5 + $0x450] sm:$0xff] }
 0x30f   : > { %1728 = vmatpush.bf16.msra.mxu2 %v6722_v0  ;;  %v6771_v0 = vld [vmem:[#allocation5 + $0x448] sm:$0xff] }
 0x313   : > { %2222 = vmatpush.bf16.msrb.mxu2 %v6761_v28 }
 0x317   : > { %2223 = vmatpush.bf16.msrb.mxu2 %v6760_v31 }
 0x31b   : > { %2224 = vmatpush.bf16.msrb.mxu2 %v6759_v39 }
 0x31f   : > { %2225 = vmatpush.bf16.msrb.mxu2 %v6758_v45 }
 0x323   : > { %2226 = vmatpush.bf16.msrb.mxu2 %v6757_v53  ;;  %v7010_v53 = vld [vmem:[#allocation8 + $0x6] ss:$0 sm:$0xff] }
 0x327   : > { %2227 = vmatpush.bf16.msrb.mxu2 %v6756_v59 }
 0x32b   : > { %2228 = vmatpush.bf16.msrb.mxu2 %v6755_v63 }
 0x32f   : > { %2229 = vmatpush.bf16.msrb.mxu2 %v6754_v4 }
 0x375   : > { %v1481_v10 = vpop.f32.mrf.mxu2 }
 0x376   : > { %1487 = vst [vmem:[#allocation2 + $0x1] sm:$0xff] %v1481_v10 }
 0x37d   : > { %v1484_v11 = vpop.f32.mrf.mxu2  ;;  %v1538_v14 = vld [vmem:[#allocation2] sm:$0xff] }
 0x37e   : > { %1488 = vst [vmem:[#allocation2 + $0x9] sm:$0xff] %v1484_v11  ;;  %v1545_v13 = vpack.c.bf16 %v1484_v11, %v1481_v10 }
 0x380   : > { %1715 = vmatmul.bf16.vlgmr.msrb.gmra.mxu0 %v1545_v13 }
 0x385   : > { %v1539_v15 = vld [vmem:[#allocation2 + $0x8] sm:$0xff] }
 0x386   : > { %v1542_v16 = vld [vmem:[#allocation2 + $0x2] sm:$0xff]  ;;  %v1543_v17 = vld [vmem:[#allocation2 + $0xa] sm:$0xff]  ;;  %v1544_v18 = vpack.c.bf16 %v1539_v15, %v1538_v14 }
 0x387   : > { %v1546_v12 = vpack.c.bf16 %v1543_v17, %v1542_v16 }
 0x388   : > { %1701 = vmatmul.bf16.vlgmr.msrb.gmra.mxu3 %v1544_v18  ;;  %1936 = vmatmul.bf16.vlgmr.msrb.gmra.mxu1 %v1544_v18 }
 0x389   : > { %1729 = vmatmul.bf16.vlgmr.msra.gmra.mxu2 %v1546_v12  ;;  %2250 = vmatpush.bf16.msrb.mxu3 %v6777_v29 }
 0x38d   : > { %2251 = vmatpush.bf16.msrb.mxu3 %v6776_v32 }
 0x390   : > { %1964 = vmatmul.bf16.vlgmr.msra.gmra.mxu0 %v1546_v12 }
 0x391   : > { %2252 = vmatpush.bf16.msrb.mxu3 %v6775_v40 }
 0x395   : > { %2253 = vmatpush.bf16.msrb.mxu3 %v6774_v46 }
 0x398   : > { %1950 = vmatmul.bf16.vlgmr.msra.gmra.mxu3 %v1545_v13 }
 0x399   : > { %2254 = vmatpush.bf16.msrb.mxu3 %v6773_v54 }
 0x39d   : > { %2255 = vmatpush.bf16.msrb.mxu3 %v6772_v60 }
 0x3a1   : > { %2256 = vmatpush.bf16.msrb.mxu3 %v6771_v0 }
 0x3a5   : > { %2257 = vmatpush.bf16.msrb.mxu3 %v6770_v5 }
 0x3fd   : > { %v1716_v19 = vpop.f32.mrf.mxu0 }
 0x405   : > { %v7432_v26 = vpop.f32.mrf.mxu0  ;;  %v1937_v34 = vpop.f32.mrf.mxu1 }
 0x40b   : > { %v1702_v21 = vpop.f32.mrf.mxu3 }
 0x40c   : > { %v1703_v22 = vadd.f32 %v7427_v20, %v1702_v21  ;;  %v1730_v41 = vpop.f32.mrf.mxu2 }
 0x40d   : > { %v1965_v35 = vpop.f32.mrf.mxu0  ;;  %v1939_v49 = vpop.f32.mrf.mxu1 }
 0x40e   : > { %v7430_v24 = vadd.f32 %v1716_v19, %v1703_v22 }
 0x413   : > { %v7434_v27 = vpop.f32.mrf.mxu3 }
 0x415   : > { %v1967_v56 = vpop.f32.mrf.mxu0 }
 0x41b   : > { %v1951_v36 = vpop.f32.mrf.mxu3 }
 0x41c   : > { %v1952_v38 = vadd.f32 %v1951_v36, %v1937_v34 }
 0x41e   : > { %v1966_v42 = vadd.f32 %v1965_v35, %v1952_v38 }
 0x420   : > { %v1973_v44 = vmul.f32 %v7007_v37, %v1966_v42  ;;  %v1732_v42 = vpop.f32.mrf.mxu2 }
 0x422   : > { %v1976_v48 = vadd.f32 %v7008_v43, %v1973_v44  ;;  %v1705_v44 = vadd.f32 %v7427_v20, %v7434_v27 }
 0x423   : > { %v1953_v50 = vpop.f32.mrf.mxu3 }
 0x424   : > { %v5779_v51 = vmul.f32 -1.442695, %v1976_v48  ;;  %v1954_v52 = vadd.f32 %v1953_v50, %v1939_v49  ;;  %v1719_v49 = vadd.f32 %v7432_v26, %v1705_v44  ;;  %v6789_v44 = vld [vmem:[#allocation5 + $0x4d8] sm:$0xff] }
 0x426   : > { %7034 = vpow2.f32 %v5779_v51  ;;  %v1968_v57 = vadd.f32 %v1967_v56, %v1954_v52  ;;  %v7009_v51 = vld [vmem:[#allocation7 + $0x6] ss:$0 sm:$0xff]  ;;  %v1733_v54 = vadd.f32 %v1732_v42, %v1719_v49  ;;  %v5882_v42 = vld [vmem:[%s7782_s5 + $0x98] sm:$0xff]  ;;  %v6781_v49 = vld [vmem:[#allocation5 + $0x498] sm:$0xff] }
 0x428   : > { %v1974_v58 = vmul.f32 %v7007_v37, %v1968_v57 }
 0x42a   : > { %v1977_v62 = vadd.f32 %v7008_v43, %v1974_v58  ;;  %v1731_v43 = vadd.f32 %v1730_v41, %v7430_v24  ;;  %v5881_v41 = vld [vmem:[%s7782_s5 + $0x90] sm:$0xff] }
 0x42c   : > { %v7035_v1 = vpop.eup %7034  ;;  %v5780_v2 = vmul.f32 -1.442695, %v1977_v62 }
 0x42d   : > { %v1984_v3 = vadd.f32 1.0, %v7035_v1 }
 0x42e   : > { %7036 = vpow2.f32 %v5780_v2 }
 0x42f   : > { %7038 = vrcp.f32 %v1984_v3  ;;  %v1997_v11 = vand.u32 2147483648, %v1984_v3  ;;  %v1995_v14 = vand.u32 2147483647, %v1984_v3  ;;  %vm1991_vm0 = vweird.f32 %v1984_v3 }
 0x431   : > { %v1998_v17 = vor.u32 1.1754944e-38, %v1997_v11  ;;  %vm1996_vm2 = vcmp.eq.f32.partialorder %v1995_v14, 8.507059e+37 }
 0x434   : > { %v7037_v6 = vpop.eup %7036 }
 0x435   : > { %v7039_v7 = vpop.eup %7038  ;;  %v1985_v8 = vadd.f32 1.0, %v7037_v6 }
 0x436   : > { %v1987_v9 = vmul.f32 %v7039_v7, %v1984_v3  ;;  %vm1992_vm15 = vweird.f32 %v7039_v7 }
 0x437   : > { %7040 = vrcp.f32 %v1985_v8  ;;  %vm1993_vm1 = vmor %vm1991_vm0, %vm1992_vm15  ;;  %v2012_v23 = vand.u32 2147483648, %v1985_v8  ;;  %v2010_v28 = vand.u32 2147483647, %v1985_v8  ;;  %vm2006_vm4 = vweird.f32 %v1985_v8 }
 0x438   : > { %v1988_v10 = vsub.f32 1.0, %v1987_v9  ;;  %vm2317_vm15 = vcmask 130048  }
 0x439   : > { %v2013_v30 = vor.u32 1.1754944e-38, %v2012_v23  ;;  %vm2011_vm6 = vcmp.eq.f32.partialorder %v2010_v28, 8.507059e+37 }
 0x43a   : > { %v1989_v13 = vmul.f32 %v7039_v7, %v1988_v10 }
 0x43c   : > { %v1990_v15 = vadd.f32 %v7039_v7, %v1989_v13 }
 0x43d   : > { %v7041_v16 = vpop.eup %7040 }
 0x43e   : > { %v1994_v18 = vsel %vm1993_vm1, %v7039_v7, %v1990_v15  ;;  %v2002_v12 = vmul.f32 %v7041_v16, %v1985_v8  ;;  %vm2007_vm3 = vweird.f32 %v7041_v16 }
 0x43f   : > { %v1999_v19 = vsel %vm1996_vm2, %v1998_v17, %v1994_v18  ;;  %vm2008_vm5 = vmor %vm2006_vm4, %vm2007_vm3 }
 0x440   : > { %v2016_v21 = vmul.f32 %v1999_v19, %v1976_v48  ;;  %v2003_v22 = vsub.f32 1.0, %v2002_v12 }
 0x442   : > { %2018 = vst [vmem:[#allocation2 + $0x1] sm:$0xff] %v2016_v21  ;;  %v2004_v25 = vmul.f32 %v7041_v16, %v2003_v22  ;;  %v6809_v22 = vld [vmem:[#allocation5 + $0x578] sm:$0xff] }
 0x443   : > { %2826 = vmatpush.bf16.msra.mxu3 %v6809_v22 }
 0x444   : > { %v2005_v29 = vadd.f32 %v7041_v16, %v2004_v25 }
 0x446   : > { %v2009_v31 = vsel %vm2008_vm5, %v7041_v16, %v2005_v29  ;;  %v6784_v29 = vld [vmem:[#allocation5 + $0x4b0] sm:$0xff] }
 0x447   : > { %v2014_v32 = vsel %vm2011_vm6, %v2013_v30, %v2009_v31  ;;  %v6808_v30 = vld [vmem:[#allocation5 + $0x570] sm:$0xff]  ;;  %v6801_v31 = vld [vmem:[#allocation5 + $0x538] sm:$0xff] }
 0x448   : > { %v2017_v33 = vmul.f32 %v2014_v32, %v1977_v62  ;;  %2614 = vmatpush.bf16.msrb.mxu1 %v6801_v31  ;;  %2827 = vmatpush.bf16.msra.mxu3 %v6808_v30 }
 0x449   : > { %v2069_v35 = vld [vmem:[#allocation2] sm:$0xff] }
 0x44a   : > { %2019 = vst [vmem:[#allocation2 + $0x9] sm:$0xff] %v2017_v33  ;;  %v2076_v34 = vpack.c.bf16 %v2017_v33, %v2016_v21  ;;  %v6785_v21 = vld [vmem:[#allocation5 + $0x4b8] sm:$0xff] }
 0x44b   : > { %2576 = vmatpush.bf16.msra.mxu2 %v6785_v21 }
 0x44c   : > { %2244 = vmatmul.bf16.vlgmr.msra.gmra.mxu1 %v2076_v34  ;;  %v5879_v34 = vld [vmem:[%s7782_s5 + $0x80] sm:$0xff] }
 0x44f   : > { %2577 = vmatpush.bf16.msra.mxu2 %v6784_v29 }
 0x451   : > { %v2070_v36 = vld [vmem:[#allocation2 + $0x8] sm:$0xff] }
 0x452   : > { %v2073_v37 = vld [vmem:[#allocation2 + $0x2] sm:$0xff]  ;;  %v2074_v38 = vld [vmem:[#allocation2 + $0xa] sm:$0xff]  ;;  %v2075_v39 = vpack.c.bf16 %v2070_v36, %v2069_v35 }
 0x453   : > { %v2077_v40 = vpack.c.bf16 %v2074_v38, %v2073_v37  ;;  %v6793_v35 = vld [vmem:[#allocation5 + $0x4f8] sm:$0xff]  ;;  %v6783_v36 = vld [vmem:[#allocation5 + $0x4a8] sm:$0xff]  ;;  %v6792_v38 = vld [vmem:[#allocation5 + $0x4f0] sm:$0xff] }
 0x454   : > { %2230 = vmatmul.bf16.vlgmr.msrb.gmra.mxu2 %v2075_v39  ;;  %v6807_v37 = vld [vmem:[#allocation5 + $0x568] sm:$0xff]  ;;  %v5880_v39 = vld [vmem:[%s7782_s5 + $0x88] sm:$0xff] }
 0x455   : > { %2258 = vmatmul.bf16.vlgmr.msrb.gmra.mxu3 %v2077_v40  ;;  %2578 = vmatpush.bf16.msra.mxu2 %v6783_v36  ;;  %v6791_v40 = vld [vmem:[#allocation5 + $0x4e8] sm:$0xff]  ;;  %v7456_v36 = vld [vmem:[#allocation8 + $0x7] ss:$0 sm:$0xff] }
 0x456   : > { %2828 = vmatpush.bf16.msra.mxu3 %v6807_v37 }
 0x4c9   : > { %v2245_v45 = vpop.f32.mrf.mxu1 }
 0x4d1   : > { %v2247_v59 = vpop.f32.mrf.mxu1 }
 0x4d7   : > { %v2231_v46 = vpop.f32.mrf.mxu2 }
 0x4d8   : > { %v2232_v47 = vadd.f32 %v2231_v46, %v1731_v43  ;;  %v2259_v48 = vpop.f32.mrf.mxu3  ;;  %v6790_v43 = vld [vmem:[#allocation5 + $0x4e0] sm:$0xff]  ;;  %v6800_v46 = vld [vmem:[#allocation5 + $0x530] sm:$0xff] }
 0x4d9   : > { %2615 = vmatpush.bf16.msrb.mxu1 %v6800_v46 }
 0x4da   : > { %v2246_v50 = vadd.f32 %v2245_v45, %v2232_v47  ;;  %v6782_v45 = vld [vmem:[#allocation5 + $0x4a0] sm:$0xff] }
 0x4db   : > { %v6806_v47 = vld [vmem:[#allocation5 + $0x560] sm:$0xff]  ;;  %2579 = vmatpush.bf16.msra.mxu2 %v6782_v45  ;;  %v6841_v45 = vld [vmem:[#allocation5 + $0x678] sm:$0xff] }
 0x4dc   : > { %v2260_v52 = vadd.f32 %v2259_v48, %v2246_v50  ;;  %v6788_v48 = vld [vmem:[#allocation5 + $0x4d0] sm:$0xff]  ;;  %v6799_v50 = vld [vmem:[#allocation5 + $0x528] sm:$0xff]  ;;  %2829 = vmatpush.bf16.msra.mxu3 %v6806_v47 }
 0x4dd   : > { %2616 = vmatpush.bf16.msrb.mxu1 %v6799_v50  ;;  %v6833_v50 = vld [vmem:[#allocation5 + $0x638] sm:$0xff] }
 0x4de   : > { %v2267_v55 = vmul.f32 %v7009_v51, %v2260_v52  ;;  %v6787_v52 = vld [vmem:[#allocation5 + $0x4c8] sm:$0xff] }
 0x4df   : > { %v2233_v56 = vpop.f32.mrf.mxu2  ;;  %2580 = vmatpush.bf16.msra.mxu2 %v6781_v49 }
 0x4e0   : > { %v2270_v57 = vadd.f32 %v7010_v53, %v2267_v55  ;;  %v2234_v58 = vadd.f32 %v2233_v56, %v1733_v54  ;;  %v2261_v61 = vpop.f32.mrf.mxu3  ;;  %v6798_v54 = vld [vmem:[#allocation5 + $0x520] sm:$0xff]  ;;  %v6804_v55 = vld [vmem:[#allocation5 + $0x550] sm:$0xff] }
 0x4e1   : > { %v6786_v56 = vld [vmem:[#allocation5 + $0x4c0] sm:$0xff]  ;;  %2617 = vmatpush.bf16.msrb.mxu1 %v6798_v54  ;;  %v6832_v54 = vld [vmem:[#allocation5 + $0x630] sm:$0xff] }
 0x4e2   : > { %v5877_v24 = vmul.f32 -1.442695, %v2270_v57  ;;  %v2248_v60 = vadd.f32 %v2247_v59, %v2234_v58  ;;  %v6797_v58 = vld [vmem:[#allocation5 + $0x518] sm:$0xff]  ;;  %v6803_v59 = vld [vmem:[#allocation5 + $0x548] sm:$0xff] }
 0x4e4   : > { %7042 = vpow2.f32 %v5877_v24  ;;  %v2262_v20 = vadd.f32 %v2261_v61, %v2248_v60  ;;  %v6825_v24 = vld [vmem:[#allocation5 + $0x5f8] sm:$0xff]  ;;  %v6778_v60 = vld [vmem:[#allocation5 + $0x480] sm:$0xff]  ;;  %v6796_v61 = vld [vmem:[#allocation5 + $0x510] sm:$0xff] }
 0x4e5   : > { %2618 = vmatpush.bf16.msrb.mxu1 %v6797_v58 }
 0x4e6   : > { %v2268_v27 = vmul.f32 %v7009_v51, %v2262_v20  ;;  %v6805_v51 = vld [vmem:[#allocation5 + $0x558] sm:$0xff]  ;;  %v6802_v20 = vld [vmem:[#allocation5 + $0x540] sm:$0xff] }
 0x4e7   : > { %2830 = vmatpush.bf16.msra.mxu3 %v6805_v51  ;;  %v6839_v51 = vld [vmem:[#allocation5 + $0x668] sm:$0xff] }
 0x4e8   : > { %v2271_v62 = vadd.f32 %v7010_v53, %v2268_v27  ;;  %v6780_v53 = vld [vmem:[#allocation5 + $0x490] sm:$0xff] }
 0x4e9   : > { %2581 = vmatpush.bf16.msra.mxu2 %v6780_v53  ;;  %v6824_v27 = vld [vmem:[#allocation5 + $0x5f0] sm:$0xff]  ;;  %2619 = vmatpush.bf16.msrb.mxu1 %v6796_v61 }
 0x4ea   : > { %v7043_v63 = vpop.eup %7042  ;;  %v5878_v0 = vmul.f32 -1.442695, %v2271_v62 }
 0x4eb   : > { %v2278_v26 = vadd.f32 1.0, %v7043_v63  ;;  %2831 = vmatpush.bf16.msra.mxu3 %v6804_v55  ;;  %v6817_v63 = vld [vmem:[#allocation5 + $0x5b8] sm:$0xff]  ;;  %v6838_v55 = vld [vmem:[#allocation5 + $0x660] sm:$0xff] }
 0x4ec   : > { %7044 = vpow2.f32 %v5878_v0  ;;  %v6823_v0 = vld [vmem:[#allocation5 + $0x5e8] sm:$0xff] }
 0x4ed   : > { %7046 = vrcp.f32 %v2278_v26  ;;  %vm2285_vm8 = vweird.f32 %v2278_v26  ;;  %v2291_v13 = vand.u32 2147483648, %v2278_v26  ;;  %v2289_v16 = vand.u32 2147483647, %v2278_v26 }
 0x4ef   : > { %v2292_v19 = vor.u32 1.1754944e-38, %v2291_v13  ;;  %vm2290_vm14 = vcmp.eq.f32.partialorder %v2289_v16, 8.507059e+37  ;;  %2832 = vmatpush.bf16.msra.mxu3 %v6803_v59  ;;  %v6810_v16 = vld [vmem:[#allocation5 + $0x580] sm:$0xff]  ;;  %v6831_v59 = vld [vmem:[#allocation5 + $0x628] sm:$0xff] }
 0x4f2   : > { %v7045_v1 = vpop.eup %7044 }
 0x4f3   : > { %v7047_v2 = vpop.eup %7046  ;;  %v2279_v3 = vadd.f32 1.0, %v7045_v1  ;;  %2833 = vmatpush.bf16.msra.mxu3 %v6802_v20  ;;  %v6816_v1 = vld [vmem:[#allocation5 + $0x5b0] sm:$0xff]  ;;  %v7474_v20 = vld [vmem:[#allocation8 + $0x8] ss:$0 sm:$0xff] }
 0x4f4   : > { %v2281_v4 = vmul.f32 %v7047_v2, %v2278_v26  ;;  %vm2286_vm7 = vweird.f32 %v7047_v2  ;;  %v6794_v26 = vld [vmem:[#allocation5 + $0x500] sm:$0xff] }
 0x4f5   : > { %7048 = vrcp.f32 %v2279_v3  ;;  %v2306_v11 = vand.u32 2147483648, %v2279_v3  ;;  %v2304_v15 = vand.u32 2147483647, %v2279_v3  ;;  %vm2287_vm10 = vmor %vm2285_vm8, %vm2286_vm7  ;;  %vm2300_vm11 = vweird.f32 %v2279_v3 }
 0x4f6   : > { %v2282_v5 = vsub.f32 1.0, %v2281_v4  ;;  %v6821_v4 = vld [vmem:[#allocation5 + $0x5d8] sm:$0xff] }
 0x4f7   : > { %v2307_v12 = vor.u32 1.1754944e-38, %v2306_v11  ;;  %vm2305_vm13 = vcmp.eq.f32.partialorder %v2304_v15, 8.507059e+37  ;;  %v6818_v11 = vld [vmem:[#allocation5 + $0x5c0] sm:$0xff]  ;;  %v6811_v15 = vld [vmem:[#allocation5 + $0x588] sm:$0xff]  ;;  %3209 = vmatpush.bf16.msrb.mxu3 %v6841_v45 }
 0x4f8   : > { %v2283_v6 = vmul.f32 %v7047_v2, %v2282_v5  ;;  %v6814_v5 = vld [vmem:[#allocation5 + $0x5a0] sm:$0xff] }
 0x4fa   : > { %v2284_v10 = vadd.f32 %v7047_v2, %v2283_v6  ;;  %v6820_v6 = vld [vmem:[#allocation5 + $0x5d0] sm:$0xff] }
 0x4fb   : > { %v7049_v7 = vpop.eup %7048 }
 0x4fc   : > { %v2296_v8 = vmul.f32 %v7049_v7, %v2279_v3  ;;  %vm2301_vm9 = vweird.f32 %v7049_v7  ;;  %v2288_v18 = vsel %vm2287_vm10, %v7047_v2, %v2284_v10  ;;  %v6822_v2 = vld [vmem:[#allocation5 + $0x5e0] sm:$0xff]  ;;  %v6815_v3 = vld [vmem:[#allocation5 + $0x5a8] sm:$0xff]  ;;  %v6812_v10 = vld [vmem:[#allocation5 + $0x590] sm:$0xff] }
 0x4fd   : > { %vm2302_vm12 = vmor %vm2300_vm11, %vm2301_vm9  ;;  %v2293_v28 = vsel %vm2290_vm14, %v2292_v19, %v2288_v18 }
 0x4fe   : > { %v2297_v9 = vsub.f32 1.0, %v2296_v8  ;;  %v2310_v33 = vmul.f32 %v2293_v28, %v2270_v57  ;;  %v6779_v57 = vld [vmem:[#allocation5 + $0x488] sm:$0xff]  ;;  %v6813_v8 = vld [vmem:[#allocation5 + $0x598] sm:$0xff] }
 0x4ff   : > { %2582 = vmatpush.bf16.msra.mxu2 %v6779_v57  ;;  %v7472_v57 = vld [vmem:[#allocation7 + $0x8] ss:$0 sm:$0xff] }
 0x500   : > { %v2298_v14 = vmul.f32 %v7049_v7, %v2297_v9  ;;  %v6819_v9 = vld [vmem:[#allocation5 + $0x5c8] sm:$0xff] }
 0x502   : > { %v2299_v17 = vadd.f32 %v7049_v7, %v2298_v14 }
 0x503   : > { %2583 = vmatpush.bf16.msra.mxu2 %v6778_v60  ;;  %v6837_v60 = vld [vmem:[#allocation5 + $0x658] sm:$0xff] }
 0x504   : > { %v2303_v23 = vsel %vm2302_vm12, %v7049_v7, %v2299_v17 }
 0x505   : > { %v2308_v25 = vsel %vm2305_vm13, %v2307_v12, %v2303_v23 }
 0x506   : > { %v2311_v32 = vmul.f32 %v2308_v25, %v2271_v62  ;;  %v6795_v62 = vld [vmem:[#allocation5 + $0x508] sm:$0xff] }
 0x507   : > { %2620 = vmatpush.bf16.msrb.mxu1 %v6795_v62  ;;  %2845 = vmatpush.bf16.msrb.mxu2 %v6817_v63  ;;  %v6830_v63 = vld [vmem:[#allocation5 + $0x620] sm:$0xff] }
 0x508   : > { %2344 = vmatpush.msrb.mxu0 %v2311_v32 }
 0x50a   : > { %2345 = vmatpush.msrb.mxu0 %v2310_v33 }
 0x50b   : > { %5883 = vmatmul.msk.f32.vlgmr.msrb.gmra.mxu0 %vm2317_vm15, %v5879_v34  ;;  %2621 = vmatpush.bf16.msrb.mxu1 %v6794_v26  ;;  %v6836_v26 = vld [vmem:[#allocation5 + $0x650] sm:$0xff] }
 0x50c   : > { %2595 = vmatpush.bf16.msra.mxu0 %v6793_v35  ;;  %2846 = vmatpush.bf16.msrb.mxu2 %v6816_v1 }
 0x50f   : > { %3190 = vmatpush.bf16.msra.mxu1 %v6833_v50 }
 0x510   : > { %2596 = vmatpush.bf16.msra.mxu0 %v6792_v38  ;;  %2847 = vmatpush.bf16.msrb.mxu2 %v6815_v3 }
 0x513   : > { %5884 = vmatmul.msk.f32.gmra.mxu0 %vm2317_vm15, %v5880_v39  ;;  %3191 = vmatpush.bf16.msra.mxu1 %v6832_v54 }
 0x514   : > { %2597 = vmatpush.bf16.msra.mxu0 %v6791_v40  ;;  %2848 = vmatpush.bf16.msrb.mxu2 %v6814_v5 }
 0x517   : > { %3192 = vmatpush.bf16.msra.mxu1 %v6831_v59 }
 0x518   : > { %2598 = vmatpush.bf16.msra.mxu0 %v6790_v43  ;;  %2849 = vmatpush.bf16.msrb.mxu2 %v6813_v8  ;;  %v6835_v8 = vld [vmem:[#allocation5 + $0x648] sm:$0xff] }
 0x51b   : > { %5885 = vmatmul.msk.f32.gmra.mxu0 %vm2317_vm15, %v5881_v41  ;;  %3193 = vmatpush.bf16.msra.mxu1 %v6830_v63 }
 0x51c   : > { %2599 = vmatpush.bf16.msra.mxu0 %v6789_v44  ;;  %2850 = vmatpush.bf16.msrb.mxu2 %v6812_v10 }
 0x520   : > { %2600 = vmatpush.bf16.msra.mxu0 %v6788_v48  ;;  %2851 = vmatpush.bf16.msrb.mxu2 %v6811_v15  ;;  %v6840_v48 = vld [vmem:[#allocation5 + $0x670] sm:$0xff] }
 0x521   : > { %3210 = vmatpush.bf16.msrb.mxu3 %v6840_v48 }
 0x523   : > { %5886 = vmatmul.msk.f32.gmra.mxu0 %vm2317_vm15, %v5882_v42 }
 0x524   : > { %2601 = vmatpush.bf16.msra.mxu0 %v6787_v52  ;;  %2852 = vmatpush.bf16.msrb.mxu2 %v6810_v16 }
 0x525   : > { %3211 = vmatpush.bf16.msrb.mxu3 %v6839_v51 }
 0x528   : > { %2602 = vmatpush.bf16.msra.mxu0 %v6786_v56 }
 0x529   : > { %3212 = vmatpush.bf16.msrb.mxu3 %v6838_v55 }
 0x52c   : > { %2864 = vmatpush.bf16.msrb.mxu0 %v6825_v24  ;;  %v6849_v24 = vld [vmem:[#allocation5 + $0x6b8] sm:$0xff] }
 0x52d   : > { %3213 = vmatpush.bf16.msrb.mxu3 %v6837_v60 }
 0x530   : > { %2865 = vmatpush.bf16.msrb.mxu0 %v6824_v27 }
 0x531   : > { %3214 = vmatpush.bf16.msrb.mxu3 %v6836_v26 }
 0x534   : > { %2866 = vmatpush.bf16.msrb.mxu0 %v6823_v0  ;;  %v6848_v0 = vld [vmem:[#allocation5 + $0x6b0] sm:$0xff] }
 0x535   : > { %3215 = vmatpush.bf16.msrb.mxu3 %v6835_v8 }
 0x538   : > { %2867 = vmatpush.bf16.msrb.mxu0 %v6822_v2 }
 0x53c   : > { %2868 = vmatpush.bf16.msrb.mxu0 %v6821_v4 }
 0x540   : > { %2869 = vmatpush.bf16.msrb.mxu0 %v6820_v6  ;;  %v6829_v6 = vld [vmem:[#allocation5 + $0x618] sm:$0xff] }
 0x541   : > { %3194 = vmatpush.bf16.msra.mxu1 %v6829_v6 }
 0x544   : > { %2870 = vmatpush.bf16.msrb.mxu0 %v6819_v9 }
 0x548   : > { %2871 = vmatpush.bf16.msrb.mxu0 %v6818_v11  ;;  %v6828_v11 = vld [vmem:[#allocation5 + $0x610] sm:$0xff] }
 0x549   : > { %3195 = vmatpush.bf16.msra.mxu1 %v6828_v11 }
 0x588   : > { %v2347_v7 = vpop.f32.mrf.mxu0 }
 0x589   : > { %2359 = vst [vmem:[#allocation2 + $0x1] sm:$0xff] %v2347_v7 }
 0x590   : > { %v2350_v13 = vpop.f32.mrf.mxu0  ;;  %v2412_v18 = vld [vmem:[#allocation2] sm:$0xff] }
 0x591   : > { %2360 = vst [vmem:[#allocation2 + $0x9] sm:$0xff] %v2350_v13  ;;  %v2425_v14 = vpack.c.bf16 %v2350_v13, %v2347_v7  ;;  %v6847_v7 = vld [vmem:[#allocation5 + $0x6a8] sm:$0xff]  ;;  %v6846_v13 = vld [vmem:[#allocation5 + $0x6a0] sm:$0xff] }
 0x593   : > { %2603 = vmatmul.bf16.vlgmr.msra.gmra.mxu0 %v2425_v14 }
 0x598   : > { %v2353_v17 = vpop.f32.mrf.mxu0  ;;  %v2413_v12 = vld [vmem:[#allocation2 + $0x8] sm:$0xff] }
 0x599   : > { %2361 = vst [vmem:[#allocation2 + $0x11] sm:$0xff] %v2353_v17  ;;  %v2424_v19 = vpack.c.bf16 %v2413_v12, %v2412_v18  ;;  %v2420_v22 = vld [vmem:[#allocation2 + $0x2] sm:$0xff] }
 0x59b   : > { %2584 = vmatmul.bf16.vlgmr.msra.gmra.mxu2 %v2424_v19  ;;  %2834 = vmatmul.bf16.vlgmr.msra.gmra.mxu3 %v2424_v19 }
 0x59c   : > { %3228 = vmatpush.bf16.msra.mxu2 %v6849_v24 }
 0x5a0   : > { %v2356_v21 = vpop.f32.mrf.mxu0  ;;  %v2421_v23 = vld [vmem:[#allocation2 + $0xa] sm:$0xff]  ;;  %3229 = vmatpush.bf16.msra.mxu2 %v6848_v0 }
 0x5a1   : > { %2362 = vst [vmem:[#allocation2 + $0x19] sm:$0xff] %v2356_v21  ;;  %v2426_v25 = vpack.c.bf16 %v2421_v23, %v2420_v22  ;;  %v2428_v28 = vpack.c.bf16 %v2356_v21, %v2353_v17  ;;  %v2414_v29 = vld [vmem:[#allocation2 + $0x10] sm:$0xff]  ;;  %v6845_v23 = vld [vmem:[#allocation5 + $0x698] sm:$0xff] }
 0x5a2   : > { %v6827_v22 = vld [vmem:[#allocation5 + $0x608] sm:$0xff] }
 0x5a3   : > { %2622 = vmatmul.bf16.vlgmr.msrb.gmra.mxu1 %v2426_v25  ;;  %2608 = vmatmul.bf16.gmra.mxu0 %v2428_v28 }
 0x5a4   : > { %3230 = vmatpush.bf16.msra.mxu2 %v6847_v7  ;;  %3196 = vmatpush.bf16.msra.mxu1 %v6827_v22 }
 0x5a8   : > { %v2415_v30 = vld [vmem:[#allocation2 + $0x18] sm:$0xff]  ;;  %3231 = vmatpush.bf16.msra.mxu2 %v6846_v13 }
 0x5a9   : > { %v2427_v31 = vpack.c.bf16 %v2415_v30, %v2414_v29  ;;  %v2422_v32 = vld [vmem:[#allocation2 + $0x12] sm:$0xff]  ;;  %v2423_v33 = vld [vmem:[#allocation2 + $0x1a] sm:$0xff]  ;;  %v6826_v30 = vld [vmem:[#allocation5 + $0x600] sm:$0xff] }
 0x5aa   : > { %v2429_v34 = vpack.c.bf16 %v2423_v33, %v2422_v32  ;;  %3197 = vmatpush.bf16.msra.mxu1 %v6826_v30 }
 0x5ab   : > { %2589 = vmatmul.bf16.gmra.mxu2 %v2427_v31  ;;  %2839 = vmatmul.bf16.gmra.mxu3 %v2427_v31  ;;  %v6844_v31 = vld [vmem:[#allocation5 + $0x690] sm:$0xff] }
 0x5ac   : > { %3232 = vmatpush.bf16.msra.mxu2 %v6845_v23 }
 0x5b0   : > { %3233 = vmatpush.bf16.msra.mxu2 %v6844_v31 }
 0x5b3   : > { %2627 = vmatmul.bf16.gmra.mxu1 %v2429_v34  ;;  %2872 = vmatmul.bf16.vlgmr.msrb.gmra.mxu0 %v2426_v25 }
 0x5bb   : > { %2853 = vmatmul.bf16.vlgmr.msrb.gmra.mxu2 %v2425_v14  ;;  %v6834_v14 = vld [vmem:[#allocation5 + $0x640] sm:$0xff] }
 0x5bc   : > { %3216 = vmatpush.bf16.msrb.mxu3 %v6834_v14 }
 0x5c3   : > { %2877 = vmatmul.bf16.gmra.mxu0 %v2429_v34 }
 0x5cb   : > { %2858 = vmatmul.bf16.gmra.mxu2 %v2428_v28 }
 0x610   : > { %v2604_v35 = vpop.f32.mrf.mxu0 }
 0x618   : > { %v7458_v37 = vpop.f32.mrf.mxu0 }
 0x61e   : > { %v2585_v38 = vpop.f32.mrf.mxu2  ;;  %v2835_v52 = vpop.f32.mrf.mxu3 }
 0x61f   : > { %v2586_v39 = vadd.f32 %v7456_v36, %v2585_v38 }
 0x620   : > { %v2609_v42 = vpop.f32.mrf.mxu0 }
 0x621   : > { %v7461_v40 = vadd.f32 %v2604_v35, %v2586_v39 }
 0x626   : > { %v7463_v41 = vpop.f32.mrf.mxu2  ;;  %v2837_v27 = vpop.f32.mrf.mxu3 }
 0x628   : > { %v7466_v46 = vpop.f32.mrf.mxu0 }
 0x62e   : > { %v2590_v43 = vpop.f32.mrf.mxu2  ;;  %v2840_v15 = vpop.f32.mrf.mxu3 }
 0x62f   : > { %v2591_v44 = vadd.f32 %v7456_v36, %v2590_v43 }
 0x630   : > { %v2873_v53 = vpop.f32.mrf.mxu0 }
 0x631   : > { %v7468_v47 = vadd.f32 %v2609_v42, %v2591_v44  ;;  %v6843_v42 = vld [vmem:[#allocation5 + $0x688] sm:$0xff] }
 0x632   : > { %3234 = vmatpush.bf16.msra.mxu2 %v6843_v42 }
 0x636   : > { %v7470_v49 = vpop.f32.mrf.mxu2  ;;  %v2842_v33 = vpop.f32.mrf.mxu3 }
 0x638   : > { %v2875_v1 = vpop.f32.mrf.mxu0 }
 0x63e   : > { %v2854_v56 = vpop.f32.mrf.mxu2 }
 0x63f   : > { %v2855_v58 = vadd.f32 %v2854_v56, %v2835_v52 }
 0x640   : > { %v2878_v17 = vpop.f32.mrf.mxu0 }
 0x641   : > { %v2874_v61 = vadd.f32 %v2873_v53, %v2855_v58  ;;  %v6842_v53 = vld [vmem:[#allocation5 + $0x680] sm:$0xff] }
 0x642   : > { %3235 = vmatpush.bf16.msra.mxu2 %v6842_v53 }
 0x643   : > { %v2886_v62 = vmul.f32 %v7472_v57, %v2874_v61 }
 0x645   : > { %v7478_v2 = vadd.f32 %v7474_v20, %v2886_v62 }
 0x646   : > { %v2856_v3 = vpop.f32.mrf.mxu2 }
 0x647   : > { %v6079_v4 = vmul.f32 -1.442695, %v7478_v2  ;;  %v2857_v5 = vadd.f32 %v2856_v3, %v2837_v27 }
 0x648   : > { %v2880_v45 = vpop.f32.mrf.mxu0 }
 0x649   : > { %7050 = vpow2.f32 %v6079_v4  ;;  %v2876_v9 = vadd.f32 %v2875_v1, %v2857_v5 }
 0x64b   : > { %v2887_v10 = vmul.f32 %v7472_v57, %v2876_v9 }
 0x64d   : > { %v7483_v16 = vadd.f32 %v7474_v20, %v2887_v10 }
 0x64e   : > { %v2859_v18 = vpop.f32.mrf.mxu2 }
 0x64f   : > { %v7051_v12 = vpop.eup %7050  ;;  %v6080_v19 = vmul.f32 -1.442695, %v7483_v16  ;;  %v2860_v21 = vadd.f32 %v2859_v18, %v2840_v15 }
 0x650   : > { %v2907_v25 = vadd.f32 1.0, %v7051_v12 }
 0x651   : > { %7052 = vpow2.f32 %v6080_v19  ;;  %v2879_v28 = vadd.f32 %v2878_v17, %v2860_v21 }
 0x652   : > { %7054 = vrcp.f32 %v2907_v25  ;;  %v2922_v54 = vand.u32 2147483648, %v2907_v25  ;;  %v2920_v56 = vand.u32 2147483647, %v2907_v25  ;;  %vm2916_vm1 = vweird.f32 %v2907_v25 }
 0x653   : > { %v2888_v29 = vmul.f32 %v7472_v57, %v2879_v28 }
 0x654   : > { %v2923_v27 = vor.u32 1.1754944e-38, %v2922_v54  ;;  %vm2921_vm3 = vcmp.eq.f32.partialorder %v2920_v56, 8.507059e+37 }
 0x655   : > { %v7488_v32 = vadd.f32 %v7474_v20, %v2888_v29 }
 0x656   : > { %v2861_v34 = vpop.f32.mrf.mxu2 }
 0x657   : > { %v7053_v35 = vpop.eup %7052  ;;  %v6081_v38 = vmul.f32 -1.442695, %v7488_v32  ;;  %v2862_v39 = vadd.f32 %v2861_v34, %v2842_v33 }
 0x658   : > { %v7055_v43 = vpop.eup %7054  ;;  %v2908_v44 = vadd.f32 1.0, %v7053_v35 }
 0x659   : > { %v2912_v48 = vmul.f32 %v7055_v43, %v2907_v25  ;;  %7056 = vpow2.f32 %v6081_v38  ;;  %v2881_v50 = vadd.f32 %v2880_v45, %v2862_v39  ;;  %vm2917_vm0 = vweird.f32 %v7055_v43 }
 0x65a   : > { %7058 = vrcp.f32 %v2908_v44  ;;  %vm2918_vm2 = vmor %vm2916_vm1, %vm2917_vm0  ;;  %v2937_v1 = vand.u32 2147483648, %v2908_v44  ;;  %v2935_v4 = vand.u32 2147483647, %v2908_v44  ;;  %vm2931_vm5 = vweird.f32 %v2908_v44 }
 0x65b   : > { %v2913_v51 = vsub.f32 1.0, %v2912_v48  ;;  %v2889_v52 = vmul.f32 %v7472_v57, %v2881_v50 }
 0x65c   : > { %v2938_v8 = vor.u32 1.1754944e-38, %v2937_v1  ;;  %vm2936_vm7 = vcmp.eq.f32.partialorder %v2935_v4, 8.507059e+37 }
 0x65d   : > { %v2914_v55 = vmul.f32 %v7055_v43, %v2913_v51  ;;  %v7493_v58 = vadd.f32 %v7474_v20, %v2889_v52 }
 0x65f   : > { %v7057_v59 = vpop.eup %7056  ;;  %v2915_v24 = vadd.f32 %v7055_v43, %v2914_v55  ;;  %v6082_v60 = vmul.f32 -1.442695, %v7493_v58 }
 0x660   : > { %v7059_v61 = vpop.eup %7058  ;;  %v2909_v62 = vadd.f32 1.0, %v7057_v59 }
 0x661   : > { %v2919_v63 = vsel %vm2918_vm2, %v7055_v43, %v2915_v24  ;;  %v2927_v57 = vmul.f32 %v7059_v61, %v2908_v44  ;;  %7060 = vpow2.f32 %v6082_v60  ;;  %vm2932_vm4 = vweird.f32 %v7059_v61  ;;  %v2623_v24 = vpop.f32.mrf.mxu1 }
 0x662   : > { %v2924_v0 = vsel %vm2921_vm3, %v2923_v27, %v2919_v63  ;;  %7062 = vrcp.f32 %v2909_v62  ;;  %vm2933_vm6 = vmor %vm2931_vm5, %vm2932_vm4  ;;  %v2952_v15 = vand.u32 2147483648, %v2909_v62  ;;  %v2950_v18 = vand.u32 2147483647, %v2909_v62 }
 0x663   : > { %v2971_v26 = vmul.f32 %v2924_v0, %v7478_v2  ;;  %v2928_v20 = vsub.f32 1.0, %v2927_v57  ;;  %vm2946_vm9 = vweird.f32 %v2909_v62  ;;  %v2588_v63 = vadd.f32 %v7456_v36, %v7463_v41 }
 0x664   : > { %v2953_v22 = vor.u32 1.1754944e-38, %v2952_v15  ;;  %vm2951_vm11 = vcmp.eq.f32.partialorder %v2950_v18, 8.507059e+37  ;;  %v2624_v57 = vadd.f32 %v2623_v24, %v7461_v40  ;;  %v2593_v40 = vadd.f32 %v7456_v36, %v7470_v49 }
 0x665   : > { %2975 = vst [vmem:[#allocation2 + $0x1] sm:$0xff] %v2971_v26  ;;  %v2929_v3 = vmul.f32 %v7059_v61, %v2928_v20  ;;  %v2607_v20 = vadd.f32 %v7458_v37, %v2588_v63 }
 0x667   : > { %v7061_v5 = vpop.eup %7060  ;;  %v2930_v6 = vadd.f32 %v7059_v61, %v2929_v3 }
 0x668   : > { %v7063_v7 = vpop.eup %7062  ;;  %v2910_v9 = vadd.f32 1.0, %v7061_v5 }
 0x669   : > { %v2934_v10 = vsel %vm2933_vm6, %v7059_v61, %v2930_v6  ;;  %v2942_v11 = vmul.f32 %v7063_v7, %v2909_v62  ;;  %vm2947_vm8 = vweird.f32 %v7063_v7  ;;  %v2625_v60 = vpop.f32.mrf.mxu1 }
 0x66a   : > { %v2939_v13 = vsel %vm2936_vm7, %v2938_v8, %v2934_v10  ;;  %7064 = vrcp.f32 %v2910_v9  ;;  %vm2948_vm10 = vmor %vm2946_vm9, %vm2947_vm8  ;;  %v2967_v30 = vand.u32 2147483648, %v2910_v9  ;;  %v2965_v35 = vand.u32 2147483647, %v2910_v9  ;;  %v7015_v10 = vld [vmem:[#allocation8 + $0x9] ss:$0 sm:$0xff] }
 0x66b   : > { %v2972_v2 = vmul.f32 %v2939_v13, %v7483_v16  ;;  %v2943_v14 = vsub.f32 1.0, %v2942_v11  ;;  %vm2961_vm13 = vweird.f32 %v2910_v9  ;;  %v2626_v4 = vadd.f32 %v2625_v60, %v2607_v20 }
 0x66c   : > { %v3028_v31 = vld [vmem:[#allocation2] sm:$0xff]  ;;  %v2968_v42 = vor.u32 1.1754944e-38, %v2967_v30  ;;  %vm2966_vm15 = vcmp.eq.f32.partialorder %v2965_v35, 8.507059e+37 }
 0x66d   : > { %2976 = vst [vmem:[#allocation2 + $0x9] sm:$0xff] %v2972_v2  ;;  %v2944_v17 = vmul.f32 %v7063_v7, %v2943_v14  ;;  %v3041_v12 = vpack.c.bf16 %v2972_v2, %v2971_v26 }
 0x66f   : > { %v2945_v19 = vadd.f32 %v7063_v7, %v2944_v17  ;;  %3217 = vmatmul.bf16.vlgmr.msrb.gmra.mxu3 %v3041_v12  ;;  %v2612_v12 = vadd.f32 %v7466_v46, %v2593_v40 }
 0x670   : > { %v7065_v21 = vpop.eup %7064 }
 0x671   : > { %v2949_v23 = vsel %vm2948_vm10, %v7063_v7, %v2945_v19  ;;  %v2957_v25 = vmul.f32 %v7065_v21, %v2910_v9  ;;  %vm2962_vm12 = vweird.f32 %v7065_v21  ;;  %v2628_v61 = vpop.f32.mrf.mxu1  ;;  %v7014_v7 = vld [vmem:[#allocation7 + $0x9] ss:$0 sm:$0xff] }
 0x672   : > { %v2954_v28 = vsel %vm2951_vm11, %v2953_v22, %v2949_v23  ;;  %vm2963_vm14 = vmor %vm2961_vm13, %vm2962_vm12  ;;  %v2629_v41 = vadd.f32 %v2628_v61, %v7468_v47 }
 0x673   : > { %v2973_v29 = vmul.f32 %v2954_v28, %v7488_v32  ;;  %v2958_v16 = vsub.f32 1.0, %v2957_v25 }
 0x674   : > { %v3029_v33 = vld [vmem:[#allocation2 + $0x8] sm:$0xff] }
 0x675   : > { %2977 = vst [vmem:[#allocation2 + $0x11] sm:$0xff] %v2973_v29  ;;  %v2959_v34 = vmul.f32 %v7065_v21, %v2958_v16  ;;  %v3040_v38 = vpack.c.bf16 %v3029_v33, %v3028_v31  ;;  %v3036_v32 = vld [vmem:[#allocation2 + $0x2] sm:$0xff] }
 0x677   : > { %v2960_v39 = vadd.f32 %v7065_v21, %v2959_v34  ;;  %3198 = vmatmul.bf16.vlgmr.msra.gmra.mxu1 %v3040_v38 }
 0x679   : > { %v2964_v43 = vsel %vm2963_vm14, %v7065_v21, %v2960_v39  ;;  %v2630_v27 = vpop.f32.mrf.mxu1 }
 0x67a   : > { %v2969_v44 = vsel %vm2966_vm15, %v2968_v42, %v2964_v43  ;;  %v2631_v28 = vadd.f32 %v2630_v27, %v2612_v12 }
 0x67b   : > { %v2974_v45 = vmul.f32 %v2969_v44, %v7493_v58 }
 0x67c   : > { %v3037_v48 = vld [vmem:[#allocation2 + $0xa] sm:$0xff] }
 0x67d   : > { %2978 = vst [vmem:[#allocation2 + $0x19] sm:$0xff] %v2974_v45  ;;  %v3042_v50 = vpack.c.bf16 %v3037_v48, %v3036_v32  ;;  %v3044_v51 = vpack.c.bf16 %v2974_v45, %v2973_v29  ;;  %v3030_v52 = vld [vmem:[#allocation2 + $0x10] sm:$0xff] }
 0x67f   : > { %3236 = vmatmul.bf16.vlgmr.msra.gmra.mxu2 %v3042_v50  ;;  %3222 = vmatmul.bf16.gmra.mxu3 %v3044_v51 }
 0x684   : > { %v3031_v53 = vld [vmem:[#allocation2 + $0x18] sm:$0xff] }
 0x685   : > { %v3043_v54 = vpack.c.bf16 %v3031_v53, %v3030_v52  ;;  %v3038_v55 = vld [vmem:[#allocation2 + $0x12] sm:$0xff]  ;;  %v3039_v56 = vld [vmem:[#allocation2 + $0x1a] sm:$0xff] }
 0x686   : > { %v3045_v59 = vpack.c.bf16 %v3039_v56, %v3038_v55 }
 0x687   : > { %3203 = vmatmul.bf16.gmra.mxu1 %v3043_v54 }
 0x68f   : > { %3241 = vmatmul.bf16.gmra.mxu2 %v3045_v59 }
 0x6f2   : > { %v3218_v62 = vpop.f32.mrf.mxu3 }
 0x6f4   : > { %v3199_v58 = vpop.f32.mrf.mxu1 }
 0x6f5   : > { %v3200_v0 = vadd.f32 %v3199_v58, %v2624_v57 }
 0x6f7   : > { %v3219_v1 = vadd.f32 %v3218_v62, %v3200_v0 }
 0x6fa   : > { %v3220_v5 = vpop.f32.mrf.mxu3 }
 0x6fc   : > { %v3201_v26 = vpop.f32.mrf.mxu1 }
 0x6fd   : > { %v3202_v8 = vadd.f32 %v3201_v26, %v2626_v4 }
 0x6ff   : > { %v3221_v13 = vadd.f32 %v3220_v5, %v3202_v8 }
 0x702   : > { %v3237_v3 = vpop.f32.mrf.mxu2  ;;  %v3223_v18 = vpop.f32.mrf.mxu3 }
 0x703   : > { %v3238_v6 = vadd.f32 %v3237_v3, %v3219_v1 }
 0x704   : > { %v3204_v11 = vpop.f32.mrf.mxu1 }
 0x705   : > { %v3250_v9 = vmul.f32 %v7014_v7, %v3238_v6  ;;  %v3205_v37 = vadd.f32 %v3204_v11, %v2629_v41 }
 0x707   : > { %v7507_v15 = vadd.f32 %v7015_v10, %v3250_v9  ;;  %v3224_v22 = vadd.f32 %v3223_v18, %v3205_v37 }
 0x709   : > { %v6179_v21 = vmul.f32 -1.442695, %v7507_v15 }
 0x70a   : > { %v3239_v2 = vpop.f32.mrf.mxu2  ;;  %v3225_v30 = vpop.f32.mrf.mxu3 }
 0x70b   : > { %v3240_v14 = vadd.f32 %v3239_v2, %v3221_v13  ;;  %7066 = vpow2.f32 %v6179_v21 }
 0x70c   : > { %v3206_v25 = vpop.f32.mrf.mxu1 }
 0x70d   : > { %v3251_v17 = vmul.f32 %v7014_v7, %v3240_v14  ;;  %v3207_v36 = vadd.f32 %v3206_v25, %v2631_v28 }
 0x70f   : > { %v7510_v19 = vadd.f32 %v7015_v10, %v3251_v17  ;;  %v3226_v31 = vadd.f32 %v3225_v30, %v3207_v36 }
 0x711   : > { %v6180_v23 = vmul.f32 -1.442695, %v7510_v19  ;;  %v7067_v33 = vpop.eup %7066 }
 0x712   : > { %v3242_v47 = vpop.f32.mrf.mxu2  ;;  %v7517_v39 = vadd.f32 1.0, %v7067_v33  ;;  %v6865_v33 = vld [vmem:[#allocation5 + $0x738] sm:$0xff] }
 0x713   : > { %v3243_v29 = vadd.f32 %v3242_v47, %v3224_v22  ;;  %7068 = vpow2.f32 %v6180_v23  ;;  %3682 = vmatpush.bf16.msra.mxu3 %v6865_v33  ;;  %v6890_v33 = vld [vmem:[#allocation5 + $0x800] sm:$0xff] }
 0x714   : > { %vm3280_vm0 = vweird.f32 %v7517_v39  ;;  %v3284_v14 = vand.u32 2147483647, %v7517_v39  ;;  %v3286_v37 = vand.u32 2147483648, %v7517_v39 }
 0x715   : > { %v3252_v49 = vmul.f32 %v7014_v7, %v3243_v29 }
 0x716   : > { %v3287_v28 = vor.u32 1.1754944e-38, %v3286_v37  ;;  %vm3285_vm15 = vcmp.eq.f32.partialorder %v3284_v14, 8.507059e+37  ;;  %v6889_v14 = vld [vmem:[#allocation5 + $0x7f8] sm:$0xff]  ;;  %v6895_v37 = vld [vmem:[#allocation5 + $0x828] sm:$0xff] }
 0x717   : > { %v7514_v16 = vadd.f32 %v7015_v10, %v3252_v49 }
 0x719   : > { %v6181_v46 = vmul.f32 -1.442695, %v7514_v16  ;;  %v7069_v35 = vpop.eup %7068 }
 0x71a   : > { %v3244_v34 = vpop.f32.mrf.mxu2  ;;  %v7519_v43 = vadd.f32 1.0, %v7069_v35  ;;  %v6856_v35 = vld [vmem:[#allocation5 + $0x6f0] sm:$0xff] }
 0x71b   : > { %7070 = vpow2.f32 %v6181_v46  ;;  %v3245_v38 = vadd.f32 %v3244_v34, %v3226_v31  ;;  %v6183_v31 = vld [vmem:[%s7782_s5 + $0xc0] sm:$0xff] }
 0x71c   : > { %7072 = vrcp.f32 %v7517_v39  ;;  %vm3295_vm6 = vweird.f32 %v7519_v43  ;;  %v3299_v8 = vand.u32 2147483647, %v7519_v43  ;;  %v3301_v9 = vand.u32 2147483648, %v7519_v43  ;;  %v6857_v46 = vld [vmem:[#allocation5 + $0x6f8] sm:$0xff] }
 0x71d   : > { %v3253_v42 = vmul.f32 %v7014_v7, %v3245_v38  ;;  %7074 = vrcp.f32 %v7519_v43  ;;  %v6881_v34 = vld [vmem:[#allocation5 + $0x7b8] sm:$0xff]  ;;  %3653 = vmatpush.bf16.msrb.mxu1 %v6857_v46  ;;  %v6864_v38 = vld [vmem:[#allocation5 + $0x730] sm:$0xff] }
 0x71e   : > { %v3302_v22 = vor.u32 1.1754944e-38, %v3301_v9  ;;  %vm3300_vm14 = vcmp.eq.f32.partialorder %v3299_v8, 8.507059e+37  ;;  %3683 = vmatpush.bf16.msra.mxu3 %v6864_v38  ;;  %v6884_v46 = vld [vmem:[#allocation5 + $0x7d0] sm:$0xff] }
 0x71f   : > { %v3258_v44 = vadd.f32 %v7015_v10, %v3253_v42  ;;  %v6880_v42 = vld [vmem:[#allocation5 + $0x7b0] sm:$0xff] }
 0x721   : > { %v7071_v45 = vpop.eup %7070  ;;  %v6182_v32 = vmul.f32 -1.442695, %v3258_v44  ;;  %3654 = vmatpush.bf16.msrb.mxu1 %v6856_v35 }
 0x722   : > { %v3273_v48 = vadd.f32 1.0, %v7071_v45  ;;  %v7523_v50 = vpop.eup %7072  ;;  %v6863_v45 = vld [vmem:[#allocation5 + $0x728] sm:$0xff] }
 0x723   : > { %7076 = vpow2.f32 %v6182_v32  ;;  %v7075_v51 = vpop.eup %7074  ;;  %v3276_v59 = vmul.f32 %v7523_v50, %v7517_v39  ;;  %vm3281_vm7 = vweird.f32 %v7523_v50  ;;  %v6873_v39 = vld [vmem:[#allocation5 + $0x778] sm:$0xff]  ;;  %v6879_v32 = vld [vmem:[#allocation5 + $0x7a8] sm:$0xff]  ;;  %3684 = vmatpush.bf16.msra.mxu3 %v6863_v45 }
 0x724   : > { %7078 = vrcp.f32 %v3273_v48  ;;  %v3291_v56 = vmul.f32 %v7075_v51, %v7519_v43  ;;  %vm3296_vm2 = vweird.f32 %v7075_v51  ;;  %vm3310_vm3 = vweird.f32 %v3273_v48  ;;  %vm3282_vm13 = vmor %vm3280_vm0, %vm3281_vm7  ;;  %3711 = vmatpush.bf16.msrb.mxu2 %v6873_v39  ;;  %v6187_v43 = vld [vmem:[%s7782_s5 + $0xe0] sm:$0xff] }
 0x725   : > { %v3277_v61 = vsub.f32 1.0, %v3276_v59  ;;  %v3314_v1 = vand.u32 2147483647, %v3273_v48  ;;  %v3316_v3 = vand.u32 2147483648, %v3273_v48  ;;  %vm7541_vm9 = vmor %vm3295_vm6, %vm3296_vm2  ;;  %vm3348_vm0 = vcmask 261120   ;;  %v6860_v59 = vld [vmem:[#allocation5 + $0x710] sm:$0xff] }
 0x726   : > { %v3292_v60 = vsub.f32 1.0, %v3291_v56  ;;  %v6878_v56 = vld [vmem:[#allocation5 + $0x7a0] sm:$0xff] }
 0x727   : > { %v3278_v57 = vmul.f32 %v7523_v50, %v3277_v61  ;;  %v3317_v40 = vor.u32 1.1754944e-38, %v3316_v3  ;;  %vm3315_vm12 = vcmp.eq.f32.partialorder %v3314_v1, 8.507059e+37  ;;  %v6877_v61 = vld [vmem:[#allocation5 + $0x798] sm:$0xff]  ;;  %v6850_v1 = vld [vmem:[#allocation5 + $0x6c0] sm:$0xff]  ;;  %v6868_v3 = vld [vmem:[#allocation5 + $0x750] sm:$0xff] }
 0x728   : > { %v3293_v63 = vmul.f32 %v7075_v51, %v3292_v60  ;;  %v6871_v60 = vld [vmem:[#allocation5 + $0x768] sm:$0xff] }
 0x729   : > { %v7077_v52 = vpop.eup %7076  ;;  %v3279_v2 = vadd.f32 %v7523_v50, %v3278_v57  ;;  %v6858_v57 = vld [vmem:[#allocation5 + $0x700] sm:$0xff] }
 0x72a   : > { %v7079_v53 = vpop.eup %7078  ;;  %v3274_v54 = vadd.f32 1.0, %v7077_v52  ;;  %v3294_v6 = vadd.f32 %v7075_v51, %v3293_v63  ;;  %v6862_v52 = vld [vmem:[#allocation5 + $0x720] sm:$0xff]  ;;  %v6876_v63 = vld [vmem:[#allocation5 + $0x790] sm:$0xff] }
 0x72b   : > { %v3306_v55 = vmul.f32 %v7079_v53, %v3273_v48  ;;  %vm3311_vm1 = vweird.f32 %v7079_v53  ;;  %v3283_v25 = vsel %vm3282_vm13, %v7523_v50, %v3279_v2  ;;  %v6188_v48 = vld [vmem:[%s7782_s5 + $0xe8] sm:$0xff]  ;;  %v6189_v50 = vld [vmem:[%s7782_s5 + $0xf0] sm:$0xff]  ;;  %3685 = vmatpush.bf16.msra.mxu3 %v6862_v52 }
 0x72c   : > { %7080 = vrcp.f32 %v3274_v54  ;;  %v3331_v20 = vand.u32 2147483648, %v3274_v54  ;;  %v3329_v5 = vand.u32 2147483647, %v3274_v54  ;;  %vm7530_vm5 = vmor %vm3310_vm3, %vm3311_vm1  ;;  %vm3325_vm8 = vweird.f32 %v3274_v54 }
 0x72d   : > { %v3307_v24 = vsub.f32 1.0, %v3306_v55  ;;  %v3298_v18 = vsel %vm7541_vm9, %v7075_v51, %v3294_v6  ;;  %v3288_v36 = vsel %vm3285_vm15, %v3287_v28, %v3283_v25  ;;  %v6190_v51 = vld [vmem:[%s7782_s5 + $0xf8] sm:$0xff]  ;;  %v6866_v6 = vld [vmem:[#allocation5 + $0x740] sm:$0xff]  ;;  %v6893_v28 = vld [vmem:[#allocation5 + $0x818] sm:$0xff] }
 0x72e   : > { %v3332_v41 = vor.u32 1.1754944e-38, %v3331_v20  ;;  %vm3330_vm11 = vcmp.eq.f32.partialorder %v3329_v5, 8.507059e+37  ;;  %v3303_v47 = vsel %vm3300_vm14, %v3302_v22, %v3298_v18  ;;  %v3335_v30 = vmul.f32 %v3288_v36, %v7507_v15  ;;  %v6186_v15 = vld [vmem:[%s7782_s5 + $0xd8] sm:$0xff]  ;;  %v6875_v20 = vld [vmem:[#allocation5 + $0x788] sm:$0xff]  ;;  %v6894_v18 = vld [vmem:[#allocation5 + $0x820] sm:$0xff] }
 0x72f   : > { %v3308_v27 = vmul.f32 %v7079_v53, %v3307_v24  ;;  %v3336_v49 = vmul.f32 %v3303_v47, %v7510_v19  ;;  %v6185_v19 = vld [vmem:[%s7782_s5 + $0xd0] sm:$0xff]  ;;  %v6872_v55 = vld [vmem:[#allocation5 + $0x770] sm:$0xff]  ;;  %v6853_v24 = vld [vmem:[#allocation5 + $0x6d8] sm:$0xff] }
 0x730   : > { %3712 = vmatpush.bf16.msrb.mxu2 %v6872_v55  ;;  %v6867_v5 = vld [vmem:[#allocation5 + $0x748] sm:$0xff]  ;;  %v6892_v36 = vld [vmem:[#allocation5 + $0x810] sm:$0xff] }
 0x731   : > { %v3309_v26 = vadd.f32 %v7079_v53, %v3308_v27  ;;  %v6859_v27 = vld [vmem:[#allocation5 + $0x708] sm:$0xff] }
 0x732   : > { %v7081_v58 = vpop.eup %7080  ;;  %v6887_v47 = vld [vmem:[#allocation5 + $0x7e8] sm:$0xff] }
 0x733   : > { %v3321_v62 = vmul.f32 %v7081_v58, %v3274_v54  ;;  %vm3326_vm4 = vweird.f32 %v7081_v58  ;;  %v3313_v11 = vsel %vm7530_vm5, %v7079_v53, %v3309_v26  ;;  %v6861_v53 = vld [vmem:[#allocation5 + $0x718] sm:$0xff]  ;;  %v6854_v54 = vld [vmem:[#allocation5 + $0x6e0] sm:$0xff] }
 0x734   : > { %vm3327_vm10 = vmor %vm3325_vm8, %vm3326_vm4  ;;  %v3318_v21 = vsel %vm3315_vm12, %v3317_v40, %v3313_v11  ;;  %3686 = vmatpush.bf16.msra.mxu3 %v6861_v53  ;;  %3713 = vmatpush.bf16.msrb.mxu2 %v6871_v60  ;;  %v6869_v26 = vld [vmem:[#allocation5 + $0x758] sm:$0xff]  ;;  %v6896_v11 = vld [vmem:[#allocation5 + $0x830] sm:$0xff] }
 0x735   : > { %v3322_v0 = vsub.f32 1.0, %v3321_v62  ;;  %v3337_v29 = vmul.f32 %v3318_v21, %v7514_v16  ;;  %v6184_v16 = vld [vmem:[%s7782_s5 + $0xc8] sm:$0xff] }
 0x736   : > { %v6870_v62 = vld [vmem:[#allocation5 + $0x760] sm:$0xff] }
 0x737   : > { %v3323_v4 = vmul.f32 %v7081_v58, %v3322_v0  ;;  %v6851_v0 = vld [vmem:[#allocation5 + $0x6c8] sm:$0xff] }
 0x738   : > { %3687 = vmatpush.bf16.msra.mxu3 %v6860_v59  ;;  %3714 = vmatpush.bf16.msrb.mxu2 %v6870_v62 }
 0x739   : > { %v3324_v10 = vadd.f32 %v7081_v58, %v3323_v4  ;;  %v6874_v4 = vld [vmem:[#allocation5 + $0x780] sm:$0xff] }
 0x73b   : > { %v3328_v17 = vsel %vm3327_vm10, %v7081_v58, %v3324_v10  ;;  %v6852_v58 = vld [vmem:[#allocation5 + $0x6d0] sm:$0xff]  ;;  %v6897_v10 = vld [vmem:[#allocation5 + $0x838] sm:$0xff] }
 0x73c   : > { %v3333_v12 = vsel %vm3330_vm11, %v3332_v41, %v3328_v17  ;;  %3688 = vmatpush.bf16.msra.mxu3 %v6859_v27  ;;  %3715 = vmatpush.bf16.msrb.mxu2 %v6869_v26  ;;  %v6888_v17 = vld [vmem:[#allocation5 + $0x7f0] sm:$0xff] }
 0x73d   : > { %v3338_v23 = vmul.f32 %v3333_v12, %v3258_v44  ;;  %v6855_v44 = vld [vmem:[#allocation5 + $0x6e8] sm:$0xff] }
 0x73e   : > { %3655 = vmatpush.bf16.msrb.mxu1 %v6855_v44  ;;  %v6882_v44 = vld [vmem:[#allocation5 + $0x7c0] sm:$0xff] }
 0x73f   : > { %3385 = vmatpush.msra.mxu0 %v3338_v23 }
 0x740   : > { %3689 = vmatpush.bf16.msra.mxu3 %v6858_v57  ;;  %3716 = vmatpush.bf16.msrb.mxu2 %v6868_v3 }
 0x741   : > { %3386 = vmatpush.msra.mxu0 %v3337_v29  ;;  %v6886_v29 = vld [vmem:[#allocation5 + $0x7e0] sm:$0xff] }
 0x742   : > { %3656 = vmatpush.bf16.msrb.mxu1 %v6854_v54 }
 0x743   : > { %3387 = vmatpush.msra.mxu0 %v3336_v49 }
 0x744   : > { %3717 = vmatpush.bf16.msrb.mxu2 %v6867_v5  ;;  %3991 = vmatpush.bf16.msrb.mxu3 %v6897_v10 }
 0x745   : > { %3388 = vmatpush.msra.mxu0 %v3335_v30 }
 0x746   : > { %6191 = vmatmul.msk.f32.vlgmr.msra.gmra.mxu0 %vm3348_vm0, %v6183_v31  ;;  %3657 = vmatpush.bf16.msrb.mxu1 %v6853_v24 }
 0x747   : > { %3933 = vmatpush.bf16.msrb.mxu0 %v6881_v34 }
 0x748   : > { %3718 = vmatpush.bf16.msrb.mxu2 %v6866_v6  ;;  %3992 = vmatpush.bf16.msrb.mxu3 %v6896_v11 }
 0x74a   : > { %3658 = vmatpush.bf16.msrb.mxu1 %v6852_v58  ;;  %v7016_v58 = vld [vmem:[#allocation8 + $0xa] ss:$0 sm:$0xff] }
 0x74b   : > { %3934 = vmatpush.bf16.msrb.mxu0 %v6880_v42 }
 0x74c   : > { %3993 = vmatpush.bf16.msrb.mxu3 %v6895_v37 }
 0x74e   : > { %6192 = vmatmul.msk.f32.gmra.mxu0 %vm3348_vm0, %v6184_v16  ;;  %3659 = vmatpush.bf16.msrb.mxu1 %v6851_v0 }
 0x74f   : > { %3935 = vmatpush.bf16.msrb.mxu0 %v6879_v32 }
 0x750   : > { %3994 = vmatpush.bf16.msrb.mxu3 %v6894_v18 }
 0x752   : > { %3660 = vmatpush.bf16.msrb.mxu1 %v6850_v1 }
 0x753   : > { %3936 = vmatpush.bf16.msrb.mxu0 %v6878_v56 }
 0x754   : > { %3995 = vmatpush.bf16.msrb.mxu3 %v6893_v28 }
 0x756   : > { %6193 = vmatmul.msk.f32.gmra.mxu0 %vm3348_vm0, %v6185_v19  ;;  %3962 = vmatpush.bf16.msra.mxu1 %v6889_v14  ;;  %v6885_v19 = vld [vmem:[#allocation5 + $0x7d8] sm:$0xff] }
 0x757   : > { %3937 = vmatpush.bf16.msrb.mxu0 %v6877_v61 }
 0x758   : > { %3996 = vmatpush.bf16.msrb.mxu3 %v6892_v36 }
 0x75a   : > { %3963 = vmatpush.bf16.msra.mxu1 %v6888_v17 }
 0x75b   : > { %3938 = vmatpush.bf16.msrb.mxu0 %v6876_v63 }
 0x75e   : > { %6194 = vmatmul.msk.f32.gmra.mxu0 %vm3348_vm0, %v6186_v15  ;;  %3964 = vmatpush.bf16.msra.mxu1 %v6887_v47  ;;  %v6891_v15 = vld [vmem:[#allocation5 + $0x808] sm:$0xff] }
 0x75f   : > { %3939 = vmatpush.bf16.msrb.mxu0 %v6875_v20  ;;  %3997 = vmatpush.bf16.msrb.mxu3 %v6891_v15 }
 0x762   : > { %3965 = vmatpush.bf16.msra.mxu1 %v6886_v29 }
 0x763   : > { %3940 = vmatpush.bf16.msrb.mxu0 %v6874_v4  ;;  %3998 = vmatpush.bf16.msrb.mxu3 %v6890_v33 }
 0x766   : > { %6195 = vmatmul.msk.f32.gmra.mxu0 %vm3348_vm0, %v6187_v43  ;;  %3966 = vmatpush.bf16.msra.mxu1 %v6885_v19  ;;  %v6883_v43 = vld [vmem:[#allocation5 + $0x7c8] sm:$0xff] }
 0x76a   : > { %3967 = vmatpush.bf16.msra.mxu1 %v6884_v46 }
 0x76e   : > { %6196 = vmatmul.msk.f32.gmra.mxu0 %vm3348_vm0, %v6188_v48  ;;  %3968 = vmatpush.bf16.msra.mxu1 %v6883_v43  ;;  %v6904_v43 = vld [vmem:[#allocation5 + $0x870] sm:$0xff] }
 0x772   : > { %3969 = vmatpush.bf16.msra.mxu1 %v6882_v44 }
 0x776   : > { %6197 = vmatmul.msk.f32.gmra.mxu0 %vm3348_vm0, %v6189_v50 }
 0x77e   : > { %6198 = vmatmul.msk.f32.gmra.mxu0 %vm3348_vm0, %v6190_v51 }
 0x7c3   : > { %v3390_v7 = vpop.f32.mrf.mxu0 }
 0x7c4   : > { %3414 = vst [vmem:[#allocation2 + $0x1] sm:$0xff] %v3390_v7 }
 0x7cb   : > { %v3393_v8 = vpop.f32.mrf.mxu0  ;;  %v3471_v2 = vld [vmem:[#allocation2] sm:$0xff] }
 0x7cc   : > { %3415 = vst [vmem:[#allocation2 + $0x9] sm:$0xff] %v3393_v8  ;;  %v7590_v9 = vpack.c.bf16 %v3393_v8, %v3390_v7 }
 0x7ce   : > { %3690 = vmatmul.bf16.vlgmr.msra.gmra.mxu3 %v7590_v9 }
 0x7d3   : > { %v3396_v13 = vpop.f32.mrf.mxu0  ;;  %v3472_v41 = vld [vmem:[#allocation2 + $0x8] sm:$0xff] }
 0x7d4   : > { %3416 = vst [vmem:[#allocation2 + $0x11] sm:$0xff] %v3396_v13  ;;  %v3495_v40 = vpack.c.bf16 %v3472_v41, %v3471_v2  ;;  %v3487_v21 = vld [vmem:[#allocation2 + $0x2] sm:$0xff] }
 0x7d6   : > { %3661 = vmatmul.bf16.vlgmr.msrb.gmra.mxu1 %v3495_v40  ;;  %3941 = vmatmul.bf16.vlgmr.msrb.gmra.mxu0 %v3495_v40 }
 0x7db   : > { %v3399_v12 = vpop.f32.mrf.mxu0  ;;  %v3488_v22 = vld [vmem:[#allocation2 + $0xa] sm:$0xff] }
 0x7dc   : > { %3417 = vst [vmem:[#allocation2 + $0x19] sm:$0xff] %v3399_v12  ;;  %v7593_v23 = vpack.c.bf16 %v3488_v22, %v3487_v21  ;;  %v7595_v25 = vpack.c.bf16 %v3399_v12, %v3396_v13  ;;  %v3473_v30 = vld [vmem:[#allocation2 + $0x10] sm:$0xff] }
 0x7de   : > { %3719 = vmatmul.bf16.vlgmr.msrb.gmra.mxu2 %v7593_v23  ;;  %3695 = vmatmul.bf16.gmra.mxu3 %v7595_v25 }
 0x7e3   : > { %v3402_v49 = vpop.f32.mrf.mxu0  ;;  %v3474_v31 = vld [vmem:[#allocation2 + $0x18] sm:$0xff] }
 0x7e4   : > { %3418 = vst [vmem:[#allocation2 + $0x21] sm:$0xff] %v3402_v49  ;;  %v3498_v16 = vpack.c.bf16 %v3474_v31, %v3473_v30  ;;  %v3489_v35 = vld [vmem:[#allocation2 + $0x12] sm:$0xff]  ;;  %v6913_v30 = vld [vmem:[#allocation5 + $0x8b8] sm:$0xff] }
 0x7e5   : > { %4466 = vmatpush.bf16.msra.mxu0 %v6913_v30  ;;  %v6917_v30 = vld [vmem:[#allocation5 + $0x8d8] sm:$0xff] }
 0x7e6   : > { %3666 = vmatmul.bf16.gmra.mxu1 %v3498_v16  ;;  %3946 = vmatmul.bf16.gmra.mxu0 %v3498_v16  ;;  %v6912_v16 = vld [vmem:[#allocation5 + $0x8b0] sm:$0xff] }
 0x7e9   : > { %4467 = vmatpush.bf16.msra.mxu0 %v6912_v16 }
 0x7eb   : > { %v3405_v34 = vpop.f32.mrf.mxu0  ;;  %v3490_v38 = vld [vmem:[#allocation2 + $0x1a] sm:$0xff] }
 0x7ec   : > { %3419 = vst [vmem:[#allocation2 + $0x29] sm:$0xff] %v3405_v34  ;;  %v3500_v39 = vpack.c.bf16 %v3490_v38, %v3489_v35  ;;  %v3502_v42 = vpack.c.bf16 %v3405_v34, %v3402_v49  ;;  %v3475_v32 = vld [vmem:[#allocation2 + $0x20] sm:$0xff]  ;;  %v6911_v38 = vld [vmem:[#allocation5 + $0x8a8] sm:$0xff] }
 0x7ed   : > { %v6905_v35 = vld [vmem:[#allocation5 + $0x878] sm:$0xff]  ;;  %4468 = vmatpush.bf16.msra.mxu0 %v6911_v38 }
 0x7ee   : > { %3724 = vmatmul.bf16.gmra.mxu2 %v3500_v39  ;;  %3700 = vmatmul.bf16.gmra.mxu3 %v3502_v42 }
 0x7ef   : > { %4437 = vmatpush.bf16.msra.mxu2 %v6905_v35 }
 0x7f3   : > { %v3408_v45 = vpop.f32.mrf.mxu0  ;;  %v3476_v48 = vld [vmem:[#allocation2 + $0x28] sm:$0xff]  ;;  %4438 = vmatpush.bf16.msra.mxu2 %v6904_v43 }
 0x7f4   : > { %3420 = vst [vmem:[#allocation2 + $0x31] sm:$0xff] %v3408_v45  ;;  %v3501_v50 = vpack.c.bf16 %v3476_v48, %v3475_v32  ;;  %v3491_v52 = vld [vmem:[#allocation2 + $0x22] sm:$0xff] }
 0x7f5   : > { %v6910_v32 = vld [vmem:[#allocation5 + $0x8a0] sm:$0xff] }
 0x7f6   : > { %3671 = vmatmul.bf16.gmra.mxu1 %v3501_v50  ;;  %3951 = vmatmul.bf16.gmra.mxu0 %v3501_v50 }
 0x7f7   : > { %4469 = vmatpush.bf16.msra.mxu0 %v6910_v32 }
 0x7fb   : > { %v3411_v51 = vpop.f32.mrf.mxu0  ;;  %v3492_v53 = vld [vmem:[#allocation2 + $0x2a] sm:$0xff] }
 0x7fc   : > { %3421 = vst [vmem:[#allocation2 + $0x39] sm:$0xff] %v3411_v51  ;;  %v3503_v54 = vpack.c.bf16 %v3492_v53, %v3491_v52  ;;  %v3505_v55 = vpack.c.bf16 %v3411_v51, %v3408_v45  ;;  %v3477_v56 = vld [vmem:[#allocation2 + $0x30] sm:$0xff]  ;;  %v6921_v53 = vld [vmem:[#allocation5 + $0x8f8] sm:$0xff] }
 0x7fd   : > { %v7624_v52 = vld [vmem:[#allocation7 + $0xb] ss:$0 sm:$0xff]  ;;  %4495 = vmatpush.bf16.msrb.mxu1 %v6921_v53 }
 0x7fe   : > { %3729 = vmatmul.bf16.gmra.mxu2 %v3503_v54  ;;  %3705 = vmatmul.bf16.gmra.mxu3 %v3505_v55 }
 0x803   : > { %v3478_v59 = vld [vmem:[#allocation2 + $0x38] sm:$0xff] }
 0x804   : > { %v3504_v24 = vpack.c.bf16 %v3478_v59, %v3477_v56  ;;  %v3493_v60 = vld [vmem:[#allocation2 + $0x32] sm:$0xff]  ;;  %v3494_v61 = vld [vmem:[#allocation2 + $0x3a] sm:$0xff]  ;;  %v7626_v56 = vld [vmem:[#allocation8 + $0xb] ss:$0 sm:$0xff] }
 0x805   : > { %v3506_v27 = vpack.c.bf16 %v3494_v61, %v3493_v60  ;;  %v6909_v59 = vld [vmem:[#allocation5 + $0x898] sm:$0xff] }
 0x806   : > { %3676 = vmatmul.bf16.gmra.mxu1 %v3504_v24  ;;  %3956 = vmatmul.bf16.gmra.mxu0 %v3504_v24 }
 0x807   : > { %4470 = vmatpush.bf16.msra.mxu0 %v6909_v59 }
 0x80e   : > { %3734 = vmatmul.bf16.gmra.mxu2 %v3506_v27  ;;  %3999 = vmatmul.bf16.vlgmr.msrb.gmra.mxu3 %v7593_v23 }
 0x816   : > { %3970 = vmatmul.bf16.vlgmr.msra.gmra.mxu1 %v7590_v9 }
 0x81e   : > { %4004 = vmatmul.bf16.gmra.mxu3 %v3500_v39 }
 0x826   : > { %3975 = vmatmul.bf16.gmra.mxu1 %v7595_v25 }
 0x82e   : > { %4009 = vmatmul.bf16.gmra.mxu3 %v3503_v54  ;;  %v6903_v54 = vld [vmem:[#allocation5 + $0x868] sm:$0xff] }
 0x82f   : > { %4439 = vmatpush.bf16.msra.mxu2 %v6903_v54 }
 0x836   : > { %3980 = vmatmul.bf16.gmra.mxu1 %v3502_v42 }
 0x83e   : > { %4014 = vmatmul.bf16.gmra.mxu3 %v3506_v27 }
 0x846   : > { %3985 = vmatmul.bf16.gmra.mxu1 %v3505_v55 }
 0x851   : > { %v3691_v62 = vpop.f32.mrf.mxu3 }
 0x853   : > { %v3662_v63 = vpop.f32.mrf.mxu1  ;;  %v3942_v36 = vpop.f32.mrf.mxu0 }
 0x854   : > { %v3663_v57 = vadd.f32 %v7016_v58, %v3662_v63 }
 0x856   : > { %v7602_v0 = vadd.f32 %v3691_v62, %v3663_v57  ;;  %v6902_v62 = vld [vmem:[#allocation5 + $0x860] sm:$0xff] }
 0x857   : > { %4440 = vmatpush.bf16.msra.mxu2 %v6902_v62 }
 0x859   : > { %v3693_v26 = vpop.f32.mrf.mxu3 }
 0x85b   : > { %v3664_v20 = vpop.f32.mrf.mxu1  ;;  %v3944_v39 = vpop.f32.mrf.mxu0 }
 0x85c   : > { %v3665_v1 = vadd.f32 %v7016_v58, %v3664_v20  ;;  %v6908_v20 = vld [vmem:[#allocation5 + $0x890] sm:$0xff] }
 0x85d   : > { %4471 = vmatpush.bf16.msra.mxu0 %v6908_v20 }
 0x85e   : > { %v7604_v3 = vadd.f32 %v3693_v26, %v3665_v1 }
 0x861   : > { %v7606_v4 = vpop.f32.mrf.mxu2  ;;  %v3696_v5 = vpop.f32.mrf.mxu3 }
 0x863   : > { %v3667_v6 = vpop.f32.mrf.mxu1  ;;  %v3947_v24 = vpop.f32.mrf.mxu0 }
 0x864   : > { %v3668_v7 = vadd.f32 %v7016_v58, %v3667_v6 }
 0x866   : > { %v7608_v8 = vadd.f32 %v3696_v5, %v3668_v7  ;;  %v6901_v7 = vld [vmem:[#allocation5 + $0x858] sm:$0xff] }
 0x867   : > { %4441 = vmatpush.bf16.msra.mxu2 %v6901_v7 }
 0x869   : > { %v7610_v9 = vpop.f32.mrf.mxu2  ;;  %v3698_v10 = vpop.f32.mrf.mxu3 }
 0x86b   : > { %v3669_v11 = vpop.f32.mrf.mxu1 }
 0x86c   : > { %v3670_v13 = vadd.f32 %v7016_v58, %v3669_v11  ;;  %v6907_v11 = vld [vmem:[#allocation5 + $0x888] sm:$0xff] }
 0x86d   : > { %4472 = vmatpush.bf16.msra.mxu0 %v6907_v11 }
 0x86e   : > { %v7612_v2 = vadd.f32 %v3698_v10, %v3670_v13  ;;  %v6919_v10 = vld [vmem:[#allocation5 + $0x8e8] sm:$0xff] }
 0x871   : > { %v7614_v41 = vpop.f32.mrf.mxu2  ;;  %v3701_v40 = vpop.f32.mrf.mxu3 }
 0x873   : > { %v3672_v14 = vpop.f32.mrf.mxu1 }
 0x874   : > { %v3673_v37 = vadd.f32 %v7016_v58, %v3672_v14 }
 0x876   : > { %v3702_v17 = vadd.f32 %v3701_v40, %v3673_v37  ;;  %v3949_v37 = vpop.f32.mrf.mxu0 }
 0x879   : > { %v7616_v18 = vpop.f32.mrf.mxu2  ;;  %v3703_v12 = vpop.f32.mrf.mxu3 }
 0x87b   : > { %v3674_v21 = vpop.f32.mrf.mxu1 }
 0x87c   : > { %v3675_v22 = vadd.f32 %v7016_v58, %v3674_v21  ;;  %v6918_v21 = vld [vmem:[#allocation5 + $0x8e0] sm:$0xff] }
 0x87e   : > { %v3704_v23 = vadd.f32 %v3703_v12, %v3675_v22  ;;  %v6900_v12 = vld [vmem:[#allocation5 + $0x850] sm:$0xff]  ;;  %v6906_v22 = vld [vmem:[#allocation5 + $0x880] sm:$0xff]  ;;  %v3952_v43 = vpop.f32.mrf.mxu0 }
 0x87f   : > { %4442 = vmatpush.bf16.msra.mxu2 %v6900_v12  ;;  %4473 = vmatpush.bf16.msra.mxu0 %v6906_v22 }
 0x881   : > { %v3730_v25 = vpop.f32.mrf.mxu2  ;;  %v3706_v47 = vpop.f32.mrf.mxu3 }
 0x882   : > { %v7618_v28 = vadd.f32 %v3730_v25, %v3702_v17 }
 0x883   : > { %v3677_v29 = vpop.f32.mrf.mxu1 }
 0x884   : > { %v3678_v49 = vadd.f32 %v7016_v58, %v3677_v29 }
 0x886   : > { %v3707_v31 = vadd.f32 %v3706_v47, %v3678_v49  ;;  %v6899_v49 = vld [vmem:[#allocation5 + $0x848] sm:$0xff]  ;;  %v3954_v11 = vpop.f32.mrf.mxu0 }
 0x887   : > { %4443 = vmatpush.bf16.msra.mxu2 %v6899_v49 }
 0x889   : > { %v3732_v19 = vpop.f32.mrf.mxu2  ;;  %v3708_v15 = vpop.f32.mrf.mxu3 }
 0x88a   : > { %v7620_v46 = vadd.f32 %v3732_v19, %v3704_v23 }
 0x88b   : > { %v3679_v33 = vpop.f32.mrf.mxu1 }
 0x88c   : > { %v3680_v34 = vadd.f32 %v7016_v58, %v3679_v33  ;;  %v6920_v58 = vld [vmem:[#allocation5 + $0x8f0] sm:$0xff]  ;;  %v6898_v33 = vld [vmem:[#allocation5 + $0x840] sm:$0xff] }
 0x88d   : > { %4496 = vmatpush.bf16.msrb.mxu1 %v6920_v58  ;;  %4444 = vmatpush.bf16.msra.mxu2 %v6898_v33 }
 0x88e   : > { %v3709_v42 = vadd.f32 %v3708_v15, %v3680_v34  ;;  %v6916_v34 = vld [vmem:[#allocation5 + $0x8d0] sm:$0xff] }
 0x891   : > { %v3735_v44 = vpop.f32.mrf.mxu2  ;;  %v4000_v45 = vpop.f32.mrf.mxu3  ;;  %4497 = vmatpush.bf16.msrb.mxu1 %v6919_v10 }
 0x892   : > { %v7622_v48 = vadd.f32 %v3735_v44, %v3707_v31 }
 0x893   : > { %v3971_v50 = vpop.f32.mrf.mxu1 }
 0x894   : > { %v3972_v51 = vadd.f32 %v3971_v50, %v3942_v36  ;;  %v6915_v50 = vld [vmem:[#allocation5 + $0x8c8] sm:$0xff] }
 0x895   : > { %4498 = vmatpush.bf16.msrb.mxu1 %v6918_v21 }
 0x896   : > { %v4001_v55 = vadd.f32 %v4000_v45, %v3972_v51 }
 0x898   : > { %v4023_v60 = vmul.f32 %v7624_v52, %v4001_v55 }
 0x899   : > { %v3737_v61 = vpop.f32.mrf.mxu2  ;;  %v4002_v27 = vpop.f32.mrf.mxu3  ;;  %4499 = vmatpush.bf16.msrb.mxu1 %v6917_v30 }
 0x89a   : > { %v7629_v63 = vadd.f32 %v3737_v61, %v3709_v42  ;;  %v7632_v57 = vadd.f32 %v7626_v56, %v4023_v60 }
 0x89b   : > { %v3973_v26 = vpop.f32.mrf.mxu1 }
 0x89c   : > { %v6391_v1 = vmul.f32 -1.442695, %v7632_v57  ;;  %v3974_v5 = vadd.f32 %v3973_v26, %v3944_v39 }
 0x89d   : > { %4500 = vmatpush.bf16.msrb.mxu1 %v6916_v34 }
 0x89e   : > { %7082 = vpow2.f32 %v6391_v1  ;;  %v4003_v6 = vadd.f32 %v4002_v27, %v3974_v5  ;;  %v6914_v27 = vld [vmem:[#allocation5 + $0x8c0] sm:$0xff] }
 0x8a0   : > { %v4024_v13 = vmul.f32 %v7624_v52, %v4003_v6 }
 0x8a1   : > { %v4005_v40 = vpop.f32.mrf.mxu3  ;;  %4501 = vmatpush.bf16.msrb.mxu1 %v6915_v50 }
 0x8a2   : > { %v7637_v14 = vadd.f32 %v7626_v56, %v4024_v13 }
 0x8a3   : > { %v3976_v17 = vpop.f32.mrf.mxu1 }
 0x8a4   : > { %v7083_v23 = vpop.eup %7082  ;;  %v6392_v25 = vmul.f32 -1.442695, %v7637_v14  ;;  %v3977_v47 = vadd.f32 %v3976_v17, %v3947_v24 }
 0x8a5   : > { %v4064_v29 = vadd.f32 1.0, %v7083_v23  ;;  %4502 = vmatpush.bf16.msrb.mxu1 %v6914_v27 }
 0x8a6   : > { %7084 = vpow2.f32 %v6392_v25  ;;  %v4006_v36 = vadd.f32 %v4005_v40, %v3977_v47 }
 0x8a7   : > { %7086 = vrcp.f32 %v4064_v29  ;;  %v4083_v54 = vand.u32 2147483648, %v4064_v29  ;;  %v4081_v24 = vand.u32 2147483647, %v4064_v29  ;;  %vm4077_vm2 = vweird.f32 %v4064_v29 }
 0x8a8   : > { %v4025_v31 = vmul.f32 %v7624_v52, %v4006_v36 }
 0x8a9   : > { %v4007_v16 = vpop.f32.mrf.mxu3  ;;  %v4084_v5 = vor.u32 1.1754944e-38, %v4083_v54  ;;  %vm4082_vm4 = vcmp.eq.f32.partialorder %v4081_v24, 8.507059e+37 }
 0x8aa   : > { %v7642_v19 = vadd.f32 %v7626_v56, %v4025_v31 }
 0x8ab   : > { %v3978_v15 = vpop.f32.mrf.mxu1 }
 0x8ac   : > { %v7085_v35 = vpop.eup %7084  ;;  %v6393_v38 = vmul.f32 -1.442695, %v7642_v19  ;;  %v3979_v39 = vadd.f32 %v3978_v15, %v3949_v37 }
 0x8ad   : > { %v7087_v42 = vpop.eup %7086  ;;  %v4065_v44 = vadd.f32 1.0, %v7085_v35 }
 0x8ae   : > { %v4073_v45 = vmul.f32 %v7087_v42, %v4064_v29  ;;  %7088 = vpow2.f32 %v6393_v38  ;;  %v4008_v32 = vadd.f32 %v4007_v16, %v3979_v39  ;;  %vm4078_vm1 = vweird.f32 %v7087_v42 }
 0x8af   : > { %7090 = vrcp.f32 %v4065_v44  ;;  %vm4079_vm3 = vmor %vm4077_vm2, %vm4078_vm1  ;;  %v4098_v12 = vand.u32 2147483648, %v4065_v44  ;;  %v4096_v23 = vand.u32 2147483647, %v4065_v44  ;;  %vm4092_vm6 = vweird.f32 %v4065_v44 }
 0x8b0   : > { %v4074_v51 = vsub.f32 1.0, %v4073_v45  ;;  %v4026_v53 = vmul.f32 %v7624_v52, %v4008_v32 }
 0x8b1   : > { %v4010_v55 = vpop.f32.mrf.mxu3  ;;  %vm4097_vm8 = vcmp.eq.f32.partialorder %v4096_v23, 8.507059e+37 }
 0x8b2   : > { %v4075_v59 = vmul.f32 %v7087_v42, %v4074_v51  ;;  %v7647_v60 = vadd.f32 %v7626_v56, %v4026_v53 }
 0x8b3   : > { %v3981_v61 = vpop.f32.mrf.mxu1 }
 0x8b4   : > { %v7089_v58 = vpop.eup %7088  ;;  %v4076_v62 = vadd.f32 %v7087_v42, %v4075_v59  ;;  %v6394_v26 = vmul.f32 -1.442695, %v7647_v60  ;;  %v3982_v20 = vadd.f32 %v3981_v61, %v3952_v43 }
 0x8b5   : > { %v7091_v1 = vpop.eup %7090  ;;  %v4066_v6 = vadd.f32 1.0, %v7089_v58 }
 0x8b6   : > { %v4080_v7 = vsel %vm4079_vm3, %v7087_v42, %v4076_v62  ;;  %v4088_v10 = vmul.f32 %v7091_v1, %v4065_v44  ;;  %7092 = vpow2.f32 %v6394_v26  ;;  %v4011_v17 = vadd.f32 %v4010_v55, %v3982_v20  ;;  %v3957_v42 = vpop.f32.mrf.mxu0 }
 0x8b7   : > { %v4085_v13 = vsel %vm4082_vm4, %v4084_v5, %v4080_v7  ;;  %7094 = vrcp.f32 %v4066_v6  ;;  %vm4093_vm5 = vweird.f32 %v7091_v1  ;;  %v4113_v43 = vand.u32 2147483648, %v4066_v6 }
 0x8b8   : > { %v4192_v40 = vmul.f32 %v4085_v13, %v7632_v57  ;;  %v4089_v37 = vsub.f32 1.0, %v4088_v10  ;;  %v4027_v25 = vmul.f32 %v7624_v52, %v4011_v17  ;;  %vm4094_vm7 = vmor %vm4092_vm6, %vm4093_vm5  ;;  %v4099_v57 = vor.u32 1.1754944e-38, %v4098_v12 }
 0x8b9   : > { %v4012_v21 = vpop.f32.mrf.mxu3  ;;  %v4111_v32 = vand.u32 2147483647, %v4066_v6  ;;  %vm4107_vm10 = vweird.f32 %v4066_v6 }
 0x8ba   : > { %4200 = vst [vmem:[#allocation2 + $0x1] sm:$0xff] %v4192_v40  ;;  %v4090_v22 = vmul.f32 %v7091_v1, %v4089_v37  ;;  %v7653_v49 = vadd.f32 %v7626_v56, %v4027_v25 }
 0x8bb   : > { %v3983_v47 = vpop.f32.mrf.mxu1  ;;  %vm4112_vm12 = vcmp.eq.f32.partialorder %v4111_v32, 8.507059e+37 }
 0x8bc   : > { %v7093_v29 = vpop.eup %7092  ;;  %v4091_v36 = vadd.f32 %v7091_v1, %v4090_v22  ;;  %v3984_v16 = vadd.f32 %v3983_v47, %v3954_v11  ;;  %v6395_v34 = vmul.f32 -1.442695, %v7653_v49 }
 0x8bd   : > { %v7095_v30 = vpop.eup %7094  ;;  %v7655_v31 = vadd.f32 1.0, %v7093_v29 }
 0x8be   : > { %v4095_v15 = vsel %vm4094_vm7, %v7091_v1, %v4091_v36  ;;  %v4103_v33 = vmul.f32 %v7095_v30, %v4066_v6  ;;  %v4013_v44 = vadd.f32 %v4012_v21, %v3984_v16  ;;  %vm4108_vm9 = vweird.f32 %v7095_v30  ;;  %v3959_v22 = vpop.f32.mrf.mxu0 }
 0x8bf   : > { %v4100_v35 = vsel %vm4097_vm8, %v4099_v57, %v4095_v15  ;;  %7096 = vrcp.f32 %v7655_v31  ;;  %vm4109_vm11 = vmor %vm4107_vm10, %vm4108_vm9  ;;  %v4126_v11 = vand.u32 2147483647, %v7655_v31  ;;  %v4128_v13 = vand.u32 2147483648, %v7655_v31 }
 0x8c0   : > { %v4193_v38 = vmul.f32 %v4100_v35, %v7637_v14  ;;  %v4104_v39 = vsub.f32 1.0, %v4103_v33  ;;  %7098 = vpow2.f32 %v6395_v34  ;;  %v4028_v51 = vmul.f32 %v7624_v52, %v4013_v44 }
 0x8c1   : > { %v4015_v54 = vpop.f32.mrf.mxu3  ;;  %v4114_v14 = vor.u32 1.1754944e-38, %v4113_v43  ;;  %vm4122_vm14 = vweird.f32 %v7655_v31  ;;  %v4129_v29 = vor.u32 1.1754944e-38, %v4128_v13  ;;  %vm4127_vm0 = vcmp.eq.f32.partialorder %v4126_v11, 8.507059e+37 }
 0x8c2   : > { %4201 = vst [vmem:[#allocation2 + $0x9] sm:$0xff] %v4193_v38  ;;  %v4105_v45 = vmul.f32 %v7095_v30, %v4104_v39  ;;  %v4282_v50 = vpack.c.bf16 %v4193_v38, %v4192_v40  ;;  %v7662_v61 = vadd.f32 %v7626_v56, %v4028_v51  ;;  %v4257_v40 = vld [vmem:[#allocation2] sm:$0xff] }
 0x8c3   : > { %v3986_v53 = vpop.f32.mrf.mxu1 }
 0x8c4   : > { %v4106_v55 = vadd.f32 %v7095_v30, %v4105_v45  ;;  %v3987_v59 = vadd.f32 %v3986_v53, %v3957_v42  ;;  %4474 = vmatmul.bf16.vlgmr.msra.gmra.mxu0 %v4282_v50  ;;  %v6396_v5 = vmul.f32 -1.442695, %v7662_v61 }
 0x8c5   : > { %v7097_v24 = vpop.eup %7096 }
 0x8c6   : > { %v7099_v27 = vpop.eup %7098  ;;  %v4110_v58 = vsel %vm4109_vm11, %v7095_v30, %v4106_v55  ;;  %v4118_v62 = vmul.f32 %v7097_v24, %v7655_v31  ;;  %v4016_v26 = vadd.f32 %v4015_v54, %v3987_v59  ;;  %vm4123_vm13 = vweird.f32 %v7097_v24 }
 0x8c7   : > { %v4115_v20 = vsel %vm4112_vm12, %v4114_v14, %v4110_v58  ;;  %v4068_v1 = vadd.f32 1.0, %v7099_v27  ;;  %vm4124_vm15 = vmor %vm4122_vm14, %vm4123_vm13 }
 0x8c8   : > { %v4194_v6 = vmul.f32 %v4115_v20, %v7642_v19  ;;  %v4119_v7 = vsub.f32 1.0, %v4118_v62  ;;  %v4029_v10 = vmul.f32 %v7624_v52, %v4016_v26 }
 0x8c9   : > { %7100 = vrcp.f32 %v4068_v1  ;;  %v4258_v37 = vld [vmem:[#allocation2 + $0x8] sm:$0xff]  ;;  %v4017_v36 = vpop.f32.mrf.mxu3  ;;  %v4143_v50 = vand.u32 2147483648, %v4068_v1  ;;  %v4141_v54 = vand.u32 2147483647, %v4068_v1  ;;  %vm4137_vm2 = vweird.f32 %v4068_v1 }
 0x8ca   : > { %4202 = vst [vmem:[#allocation2 + $0x11] sm:$0xff] %v4194_v6  ;;  %v4120_v17 = vmul.f32 %v7097_v24, %v4119_v7  ;;  %7102 = vpow2.f32 %v6396_v5  ;;  %v7671_v12 = vadd.f32 %v7626_v56, %v4029_v10  ;;  %v4281_v21 = vpack.c.bf16 %v4258_v37, %v4257_v40  ;;  %v4273_v39 = vld [vmem:[#allocation2 + $0x2] sm:$0xff] }
 0x8cb   : > { %v3988_v19 = vpop.f32.mrf.mxu1  ;;  %v4144_v59 = vor.u32 1.1754944e-38, %v4143_v50  ;;  %vm4142_vm4 = vcmp.eq.f32.partialorder %v4141_v54, 8.507059e+37 }
 0x8cc   : > { %v4121_v23 = vadd.f32 %v7097_v24, %v4120_v17  ;;  %v6397_v25 = vmul.f32 -1.442695, %v7671_v12  ;;  %v3989_v47 = vadd.f32 %v3988_v19, %v3959_v22  ;;  %4445 = vmatmul.bf16.vlgmr.msra.gmra.mxu2 %v4281_v21 }
 0x8ce   : > { %v4125_v30 = vsel %vm4124_vm15, %v7097_v24, %v4121_v23  ;;  %7104 = vpow2.f32 %v6397_v25  ;;  %v4018_v57 = vadd.f32 %v4017_v36, %v3989_v47 }
 0x8cf   : > { %v7101_v16 = vpop.eup %7100  ;;  %v4130_v15 = vsel %vm4127_vm0, %v4129_v29, %v4125_v30 }
 0x8d0   : > { %v7103_v33 = vpop.eup %7102  ;;  %v4195_v34 = vmul.f32 %v4130_v15, %v7647_v60  ;;  %v4133_v35 = vmul.f32 %v7101_v16, %v4068_v1  ;;  %v4030_v31 = vmul.f32 %v7624_v52, %v4018_v57  ;;  %vm4138_vm1 = vweird.f32 %v7101_v16 }
 0x8d1   : > { %v4069_v38 = vadd.f32 1.0, %v7103_v33  ;;  %v4274_v42 = vld [vmem:[#allocation2 + $0xa] sm:$0xff]  ;;  %vm4139_vm3 = vmor %vm4137_vm2, %vm4138_vm1 }
 0x8d2   : > { %4203 = vst [vmem:[#allocation2 + $0x19] sm:$0xff] %v4195_v34  ;;  %v4134_v43 = vsub.f32 1.0, %v4133_v35  ;;  %v7679_v44 = vadd.f32 %v7626_v56, %v4030_v31  ;;  %v4283_v45 = vpack.c.bf16 %v4274_v42, %v4273_v39  ;;  %v4285_v32 = vpack.c.bf16 %v4195_v34, %v4194_v6  ;;  %v4259_v27 = vld [vmem:[#allocation2 + $0x10] sm:$0xff] }
 0x8d3   : > { %7106 = vrcp.f32 %v4069_v38  ;;  %v4156_v1 = vand.u32 2147483647, %v4069_v38  ;;  %v4158_v10 = vand.u32 2147483648, %v4069_v38  ;;  %vm4152_vm6 = vweird.f32 %v4069_v38 }
 0x8d4   : > { %v7105_v51 = vpop.eup %7104  ;;  %v4135_v53 = vmul.f32 %v7101_v16, %v4134_v43  ;;  %v6398_v60 = vmul.f32 -1.442695, %v7679_v44  ;;  %4503 = vmatmul.bf16.vlgmr.msrb.gmra.mxu1 %v4283_v45  ;;  %4479 = vmatmul.bf16.gmra.mxu0 %v4285_v32 }
 0x8d5   : > { %v4070_v52 = vadd.f32 1.0, %v7105_v51  ;;  %vm4157_vm8 = vcmp.eq.f32.partialorder %v4156_v1, 8.507059e+37 }
 0x8d6   : > { %v4136_v55 = vadd.f32 %v7101_v16, %v4135_v53  ;;  %7108 = vpow2.f32 %v6398_v60 }
 0x8d7   : > { %7110 = vrcp.f32 %v4070_v52  ;;  %v4173_v21 = vand.u32 2147483648, %v4070_v52  ;;  %v4171_v23 = vand.u32 2147483647, %v4070_v52  ;;  %vm4167_vm10 = vweird.f32 %v4070_v52 }
 0x8d8   : > { %v4140_v56 = vsel %vm4139_vm3, %v7101_v16, %v4136_v55 }
 0x8d9   : > { %v7107_v24 = vpop.eup %7106  ;;  %v4145_v14 = vsel %vm4142_vm4, %v4144_v59, %v4140_v56  ;;  %v4260_v58 = vld [vmem:[#allocation2 + $0x18] sm:$0xff]  ;;  %v4174_v15 = vor.u32 1.1754944e-38, %v4173_v21  ;;  %vm4172_vm12 = vcmp.eq.f32.partialorder %v4171_v23, 8.507059e+37  ;;  %v6945_v23 = vld [vmem:[#allocation5 + $0x9b8] sm:$0xff] }
 0x8da   : > { %v4196_v62 = vmul.f32 %v4145_v14, %v7653_v49  ;;  %v4148_v26 = vmul.f32 %v7107_v24, %v4069_v38  ;;  %v4284_v20 = vpack.c.bf16 %v4260_v58, %v4259_v27  ;;  %vm4153_vm5 = vweird.f32 %v7107_v24  ;;  %v4275_v47 = vld [vmem:[#allocation2 + $0x12] sm:$0xff]  ;;  %5001 = vmatpush.bf16.msrb.mxu0 %v6945_v23 }
 0x8db   : > { %vm4154_vm7 = vmor %vm4152_vm6, %vm4153_vm5  ;;  %v4159_v49 = vor.u32 1.1754944e-38, %v4158_v10  ;;  %v6935_v10 = vld [vmem:[#allocation5 + $0x968] sm:$0xff] }
 0x8dc   : > { %v7109_v5 = vpop.eup %7108  ;;  %4204 = vst [vmem:[#allocation2 + $0x21] sm:$0xff] %v4196_v62  ;;  %v4149_v6 = vsub.f32 1.0, %v4148_v26  ;;  %4450 = vmatmul.bf16.gmra.mxu2 %v4284_v20  ;;  %v6937_v20 = vld [vmem:[#allocation5 + $0x978] sm:$0xff]  ;;  %v6939_v23 = vld [vmem:[#allocation5 + $0x988] sm:$0xff] }
 0x8dd   : > { %v7111_v7 = vpop.eup %7110  ;;  %v4071_v11 = vadd.f32 1.0, %v7109_v5  ;;  %4972 = vmatpush.bf16.msrb.mxu2 %v6937_v20 }
 0x8de   : > { %v4150_v13 = vmul.f32 %v7107_v24, %v4149_v6  ;;  %v4163_v40 = vmul.f32 %v7111_v7, %v4070_v52  ;;  %vm4168_vm9 = vweird.f32 %v7111_v7  ;;  %v6929_v6 = vld [vmem:[#allocation5 + $0x938] sm:$0xff] }
 0x8df   : > { %7112 = vrcp.f32 %v4071_v11  ;;  %vm4169_vm11 = vmor %vm4167_vm10, %vm4168_vm9  ;;  %v4188_v42 = vand.u32 2147483648, %v4071_v11  ;;  %v4186_v43 = vand.u32 2147483647, %v4071_v11  ;;  %vm4182_vm14 = vweird.f32 %v4071_v11  ;;  %4943 = vmatpush.bf16.msra.mxu3 %v6929_v6 }
 0x8e0   : > { %v4151_v37 = vadd.f32 %v7107_v24, %v4150_v13  ;;  %v4164_v17 = vsub.f32 1.0, %v4163_v40 }
 0x8e1   : > { %v4189_v32 = vor.u32 1.1754944e-38, %v4188_v42  ;;  %vm4187_vm0 = vcmp.eq.f32.partialorder %v4186_v43, 8.507059e+37  ;;  %v6925_v43 = vld [vmem:[#allocation5 + $0x918] sm:$0xff] }
 0x8e2   : > { %v4155_v22 = vsel %vm4154_vm7, %v7107_v24, %v4151_v37  ;;  %v4165_v19 = vmul.f32 %v7111_v7, %v4164_v17  ;;  %v6928_v37 = vld [vmem:[#allocation5 + $0x930] sm:$0xff] }
 0x8e3   : > { %v4160_v25 = vsel %vm4157_vm8, %v4159_v49, %v4155_v22  ;;  %v4276_v29 = vld [vmem:[#allocation2 + $0x1a] sm:$0xff]  ;;  %v7688_v49 = vld [vmem:[#allocation7 + $0xc] ss:$0 sm:$0xff]  ;;  %4944 = vmatpush.bf16.msra.mxu3 %v6928_v37  ;;  %v7690_v22 = vld [vmem:[#allocation8 + $0xc] ss:$0 sm:$0xff] }
 0x8e4   : > { %v4197_v36 = vmul.f32 %v4160_v25, %v7662_v61  ;;  %v4166_v30 = vadd.f32 %v7111_v7, %v4165_v19  ;;  %v4286_v57 = vpack.c.bf16 %v4276_v29, %v4275_v47  ;;  %v4261_v50 = vld [vmem:[#allocation2 + $0x20] sm:$0xff]  ;;  %v6934_v19 = vld [vmem:[#allocation5 + $0x960] sm:$0xff]  ;;  %v6927_v47 = vld [vmem:[#allocation5 + $0x928] sm:$0xff] }
 0x8e5   : > { %v7113_v16 = vpop.eup %7112 }
 0x8e6   : > { %4205 = vst [vmem:[#allocation2 + $0x29] sm:$0xff] %v4197_v36  ;;  %v4170_v33 = vsel %vm4169_vm11, %v7111_v7, %v4166_v30  ;;  %v4178_v34 = vmul.f32 %v7113_v16, %v4071_v11  ;;  %4508 = vmatmul.bf16.gmra.mxu1 %v4286_v57  ;;  %v4288_v35 = vpack.c.bf16 %v4197_v36, %v4196_v62  ;;  %vm4183_vm13 = vweird.f32 %v7113_v16  ;;  %v6933_v57 = vld [vmem:[#allocation5 + $0x958] sm:$0xff] }
 0x8e7   : > { %v4175_v31 = vsel %vm4172_vm12, %v4174_v15, %v4170_v33  ;;  %vm4184_vm15 = vmor %vm4182_vm14, %vm4183_vm13  ;;  %v3721_v7 = vadd.f32 %v7606_v4, %v7602_v0  ;;  %v3723_v0 = vadd.f32 %v7610_v9, %v7604_v3  ;;  %4945 = vmatpush.bf16.msra.mxu3 %v6927_v47  ;;  %v6926_v9 = vld [vmem:[#allocation5 + $0x920] sm:$0xff] }
 0x8e8   : > { %v4198_v38 = vmul.f32 %v4175_v31, %v7671_v12  ;;  %v4179_v39 = vsub.f32 1.0, %v4178_v34  ;;  %4484 = vmatmul.bf16.gmra.mxu0 %v4288_v35  ;;  %v6944_v34 = vld [vmem:[#allocation5 + $0x9b0] sm:$0xff]  ;;  %v3726_v31 = vadd.f32 %v7614_v41, %v7608_v8 }
 0x8e9   : > { %5002 = vmatpush.bf16.msrb.mxu0 %v6944_v34  ;;  %v6932_v35 = vld [vmem:[#allocation5 + $0x950] sm:$0xff] }
 0x8ea   : > { %4206 = vst [vmem:[#allocation2 + $0x31] sm:$0xff] %v4198_v38  ;;  %v4180_v61 = vmul.f32 %v7113_v16, %v4179_v39 }
 0x8eb   : > { %4946 = vmatpush.bf16.msra.mxu3 %v6926_v9 }
 0x8ec   : > { %v4181_v45 = vadd.f32 %v7113_v16, %v4180_v61 }
 0x8ed   : > { %v4262_v51 = vld [vmem:[#allocation2 + $0x28] sm:$0xff] }
 0x8ee   : > { %v4185_v53 = vsel %vm4184_vm15, %v7113_v16, %v4181_v45  ;;  %v4287_v54 = vpack.c.bf16 %v4262_v51, %v4261_v50  ;;  %v4277_v12 = vld [vmem:[#allocation2 + $0x22] sm:$0xff]  ;;  %v6943_v45 = vld [vmem:[#allocation5 + $0x9a8] sm:$0xff] }
 0x8ef   : > { %v4190_v60 = vsel %vm4187_vm0, %v4189_v32, %v4185_v53  ;;  %v6931_v32 = vld [vmem:[#allocation5 + $0x948] sm:$0xff]  ;;  %4947 = vmatpush.bf16.msra.mxu3 %v6925_v43  ;;  %5003 = vmatpush.bf16.msrb.mxu0 %v6943_v45 }
 0x8f0   : > { %v4199_v52 = vmul.f32 %v4190_v60, %v7679_v44  ;;  %4455 = vmatmul.bf16.gmra.mxu2 %v4287_v54  ;;  %v6936_v44 = vld [vmem:[#allocation5 + $0x970] sm:$0xff] }
 0x8f1   : > { %v4278_v55 = vld [vmem:[#allocation2 + $0x2a] sm:$0xff]  ;;  %4973 = vmatpush.bf16.msrb.mxu2 %v6936_v44 }
 0x8f2   : > { %4207 = vst [vmem:[#allocation2 + $0x39] sm:$0xff] %v4199_v52  ;;  %v4289_v59 = vpack.c.bf16 %v4278_v55, %v4277_v12  ;;  %v4291_v56 = vpack.c.bf16 %v4199_v52, %v4198_v38  ;;  %v4263_v14 = vld [vmem:[#allocation2 + $0x30] sm:$0xff]  ;;  %v6924_v52 = vld [vmem:[#allocation5 + $0x910] sm:$0xff]  ;;  %v6942_v12 = vld [vmem:[#allocation5 + $0x9a0] sm:$0xff] }
 0x8f3   : > { %v6930_v55 = vld [vmem:[#allocation5 + $0x940] sm:$0xff]  ;;  %4948 = vmatpush.bf16.msra.mxu3 %v6924_v52  ;;  %5004 = vmatpush.bf16.msrb.mxu0 %v6942_v12 }
 0x8f5   : > { %4974 = vmatpush.bf16.msrb.mxu2 %v6935_v10  ;;  %v6940_v10 = vld [vmem:[#allocation5 + $0x990] sm:$0xff] }
 0x8f6   : > { %4513 = vmatmul.bf16.gmra.mxu1 %v4289_v59  ;;  %v3728_v59 = vadd.f32 %v7616_v18, %v7612_v2 }
 0x8f8   : > { %4489 = vmatmul.bf16.gmra.mxu0 %v4291_v56 }
 0x8f9   : > { %v4264_v24 = vld [vmem:[#allocation2 + $0x38] sm:$0xff]  ;;  %4975 = vmatpush.bf16.msrb.mxu2 %v6934_v19 }
 0x8fa   : > { %v4290_v27 = vpack.c.bf16 %v4264_v24, %v4263_v14  ;;  %v4279_v58 = vld [vmem:[#allocation2 + $0x32] sm:$0xff]  ;;  %v4280_v62 = vld [vmem:[#allocation2 + $0x3a] sm:$0xff] }
 0x8fb   : > { %v4292_v26 = vpack.c.bf16 %v4280_v62, %v4279_v58  ;;  %v6923_v58 = vld [vmem:[#allocation5 + $0x908] sm:$0xff]  ;;  %v6941_v62 = vld [vmem:[#allocation5 + $0x998] sm:$0xff] }
 0x8fc   : > { %4949 = vmatpush.bf16.msra.mxu3 %v6923_v58  ;;  %5005 = vmatpush.bf16.msrb.mxu0 %v6941_v62 }
 0x8fd   : > { %4976 = vmatpush.bf16.msrb.mxu2 %v6933_v57 }
 0x900   : > { %4460 = vmatmul.bf16.gmra.mxu2 %v4290_v27  ;;  %5006 = vmatpush.bf16.msrb.mxu0 %v6940_v10 }
 0x901   : > { %4977 = vmatpush.bf16.msrb.mxu2 %v6932_v35 }
 0x904   : > { %5007 = vmatpush.bf16.msrb.mxu0 %v6939_v23 }
 0x905   : > { %4978 = vmatpush.bf16.msrb.mxu2 %v6931_v32 }
 0x906   : > { %4518 = vmatmul.bf16.gmra.mxu1 %v4292_v26 }
 0x909   : > { %4979 = vmatpush.bf16.msrb.mxu2 %v6930_v55 }
 0x941   : > { %v4475_v5 = vpop.f32.mrf.mxu0 }
 0x949   : > { %v4477_v13 = vpop.f32.mrf.mxu0 }
 0x94f   : > { %v4446_v1 = vpop.f32.mrf.mxu2 }
 0x950   : > { %v4447_v11 = vadd.f32 %v4446_v1, %v3721_v7  ;;  %v6922_v1 = vld [vmem:[#allocation5 + $0x900] sm:$0xff] }
 0x951   : > { %v4504_v40 = vpop.f32.mrf.mxu1  ;;  %v4480_v33 = vpop.f32.mrf.mxu0  ;;  %4950 = vmatpush.bf16.msra.mxu3 %v6922_v1 }
 0x952   : > { %v4476_v17 = vadd.f32 %v4475_v5, %v4447_v11 }
 0x954   : > { %v4505_v21 = vadd.f32 %v4504_v40, %v4476_v17 }
 0x956   : > { %v4527_v4 = vmul.f32 %v7688_v49, %v4505_v21 }
 0x957   : > { %v4448_v25 = vpop.f32.mrf.mxu2 }
 0x958   : > { %v7696_v29 = vadd.f32 %v7690_v22, %v4527_v4  ;;  %v4449_v36 = vadd.f32 %v4448_v25, %v3723_v0 }
 0x959   : > { %v4506_v30 = vpop.f32.mrf.mxu1  ;;  %v4482_v41 = vpop.f32.mrf.mxu0 }
 0x95a   : > { %v6495_v16 = vmul.f32 -1.442695, %v7696_v29  ;;  %v4478_v15 = vadd.f32 %v4477_v13, %v4449_v36 }
 0x95c   : > { %7114 = vpow2.f32 %v6495_v16  ;;  %v4507_v3 = vadd.f32 %v4506_v30, %v4478_v15 }
 0x95e   : > { %v4528_v38 = vmul.f32 %v7688_v49, %v4507_v3  ;;  %v6938_v3 = vld [vmem:[#allocation5 + $0x980] sm:$0xff] }
 0x95f   : > { %v4451_v39 = vpop.f32.mrf.mxu2  ;;  %5008 = vmatpush.bf16.msrb.mxu0 %v6938_v3 }
 0x960   : > { %v7703_v42 = vadd.f32 %v7690_v22, %v4528_v38  ;;  %v4452_v61 = vadd.f32 %v4451_v39, %v3726_v31 }
 0x962   : > { %v7115_v50 = vpop.eup %7114  ;;  %v6496_v51 = vmul.f32 -1.442695, %v7703_v42  ;;  %v4481_v53 = vadd.f32 %v4480_v33, %v4452_v61 }
 0x963   : > { %v4568_v54 = vadd.f32 1.0, %v7115_v50  ;;  %v4509_v60 = vpop.f32.mrf.mxu1 }
 0x964   : > { %7116 = vpow2.f32 %v6496_v51  ;;  %v4510_v8 = vadd.f32 %v4509_v60, %v4481_v53 }
 0x965   : > { %7118 = vrcp.f32 %v4568_v54  ;;  %v4587_v40 = vand.u32 2147483648, %v4568_v54  ;;  %v4485_v37 = vpop.f32.mrf.mxu0  ;;  %v4585_v21 = vand.u32 2147483647, %v4568_v54  ;;  %vm4581_vm2 = vweird.f32 %v4568_v54 }
 0x966   : > { %v4529_v56 = vmul.f32 %v7688_v49, %v4510_v8 }
 0x967   : > { %v4453_v24 = vpop.f32.mrf.mxu2  ;;  %v4588_v36 = vor.u32 1.1754944e-38, %v4587_v40  ;;  %vm4586_vm4 = vcmp.eq.f32.partialorder %v4585_v21, 8.507059e+37 }
 0x968   : > { %v7710_v14 = vadd.f32 %v7690_v22, %v4529_v56  ;;  %v4454_v27 = vadd.f32 %v4453_v24, %v3728_v59 }
 0x96a   : > { %v7117_v26 = vpop.eup %7116  ;;  %v6497_v20 = vmul.f32 -1.442695, %v7710_v14  ;;  %v4483_v5 = vadd.f32 %v4482_v41, %v4454_v27 }
 0x96b   : > { %v7119_v44 = vpop.eup %7118  ;;  %v4569_v6 = vadd.f32 1.0, %v7117_v26  ;;  %v4511_v7 = vpop.f32.mrf.mxu1 }
 0x96c   : > { %v4577_v2 = vmul.f32 %v7119_v44, %v4568_v54  ;;  %7120 = vpow2.f32 %v6497_v20  ;;  %v4512_v18 = vadd.f32 %v4511_v7, %v4483_v5  ;;  %vm4582_vm1 = vweird.f32 %v7119_v44 }
 0x96d   : > { %7122 = vrcp.f32 %v4569_v6  ;;  %vm4583_vm3 = vmor %vm4581_vm2, %vm4582_vm1  ;;  %v4602_v38 = vand.u32 2147483648, %v4569_v6  ;;  %v4600_v61 = vand.u32 2147483647, %v4569_v6  ;;  %v4487_v45 = vpop.f32.mrf.mxu0  ;;  %vm4596_vm6 = vweird.f32 %v4569_v6 }
 0x96e   : > { %v4578_v11 = vsub.f32 1.0, %v4577_v2  ;;  %v4530_v13 = vmul.f32 %v7688_v49, %v4512_v18 }
 0x96f   : > { %v4603_v54 = vor.u32 1.1754944e-38, %v4602_v38  ;;  %vm4601_vm8 = vcmp.eq.f32.partialorder %v4600_v61, 8.507059e+37 }
 0x970   : > { %v4579_v17 = vmul.f32 %v7119_v44, %v4578_v11  ;;  %v7715_v19 = vadd.f32 %v7690_v22, %v4530_v13 }
 0x972   : > { %v7121_v0 = vpop.eup %7120  ;;  %v4580_v4 = vadd.f32 %v7119_v44, %v4579_v17  ;;  %v6498_v25 = vmul.f32 -1.442695, %v7715_v19 }
 0x973   : > { %v7123_v47 = vpop.eup %7122  ;;  %v4570_v30 = vadd.f32 1.0, %v7121_v0  ;;  %v4456_v57 = vpop.f32.mrf.mxu2 }
 0x974   : > { %v4514_v16 = vpop.f32.mrf.mxu1  ;;  %v4584_v15 = vsel %vm4583_vm3, %v7119_v44, %v4580_v4  ;;  %v4592_v33 = vmul.f32 %v7123_v47, %v4569_v6  ;;  %7124 = vpow2.f32 %v6498_v25  ;;  %v4457_v31 = vadd.f32 %v4456_v57, %v7618_v28 }
 0x975   : > { %v4589_v34 = vsel %vm4586_vm4, %v4588_v36, %v4584_v15  ;;  %7126 = vrcp.f32 %v4570_v30  ;;  %vm4597_vm5 = vweird.f32 %v7123_v47  ;;  %v4615_v24 = vand.u32 2147483647, %v4570_v30  ;;  %v4490_v7 = vpop.f32.mrf.mxu0 }
 0x976   : > { %v4696_v9 = vmul.f32 %v4589_v34, %v7696_v29  ;;  %v4593_v35 = vsub.f32 1.0, %v4592_v33  ;;  %v4486_v43 = vadd.f32 %v4485_v37, %v4457_v31  ;;  %vm4598_vm7 = vmor %vm4596_vm6, %vm4597_vm5  ;;  %v4617_v27 = vand.u32 2147483648, %v4570_v30 }
 0x977   : > { %vm4611_vm10 = vweird.f32 %v4570_v30  ;;  %vm4616_vm12 = vcmp.eq.f32.partialorder %v4615_v24, 8.507059e+37 }
 0x978   : > { %4704 = vst [vmem:[#allocation2 + $0x1] sm:$0xff] %v4696_v9  ;;  %v4594_v39 = vmul.f32 %v7123_v47, %v4593_v35  ;;  %v4515_v51 = vadd.f32 %v4514_v16, %v4486_v43  ;;  %v4618_v6 = vor.u32 1.1754944e-38, %v4617_v27 }
 0x97a   : > { %v7125_v32 = vpop.eup %7124  ;;  %v4595_v50 = vadd.f32 %v7123_v47, %v4594_v39  ;;  %v4531_v52 = vmul.f32 %v7688_v49, %v4515_v51 }
 0x97b   : > { %v7127_v53 = vpop.eup %7126  ;;  %v4571_v60 = vadd.f32 1.0, %v7125_v32  ;;  %v4458_v29 = vpop.f32.mrf.mxu2 }
 0x97c   : > { %v4516_v8 = vpop.f32.mrf.mxu1  ;;  %v4599_v41 = vsel %vm4598_vm7, %v7123_v47, %v4595_v50  ;;  %v4607_v28 = vmul.f32 %v7127_v53, %v4570_v30  ;;  %v7723_v56 = vadd.f32 %v7690_v22, %v4531_v52  ;;  %v4459_v58 = vadd.f32 %v4458_v29, %v7620_v46 }
 0x97d   : > { %v4604_v12 = vsel %vm4601_vm8, %v4603_v54, %v4599_v41  ;;  %7128 = vrcp.f32 %v4571_v60  ;;  %vm4612_vm9 = vweird.f32 %v7127_v53  ;;  %v4630_v23 = vand.u32 2147483647, %v4571_v60  ;;  %v4492_v39 = vpop.f32.mrf.mxu0 }
 0x97e   : > { %v4697_v55 = vmul.f32 %v4604_v12, %v7703_v42  ;;  %v4608_v59 = vsub.f32 1.0, %v4607_v28  ;;  %v6499_v26 = vmul.f32 -1.442695, %v7723_v56  ;;  %v4488_v5 = vadd.f32 %v4487_v45, %v4459_v58  ;;  %vm4613_vm11 = vmor %vm4611_vm10, %vm4612_vm9 }
 0x97f   : > { %v4632_v0 = vand.u32 2147483648, %v4571_v60  ;;  %v4761_v25 = vld [vmem:[#allocation2] sm:$0xff]  ;;  %vm4626_vm14 = vweird.f32 %v4571_v60  ;;  %vm4631_vm0 = vcmp.eq.f32.partialorder %v4630_v23, 8.507059e+37 }
 0x980   : > { %4705 = vst [vmem:[#allocation2 + $0x9] sm:$0xff] %v4697_v55  ;;  %v4609_v62 = vmul.f32 %v7127_v53, %v4608_v59  ;;  %v4786_v20 = vpack.c.bf16 %v4697_v55, %v4696_v9  ;;  %7130 = vpow2.f32 %v6499_v26  ;;  %v4517_v2 = vadd.f32 %v4516_v8, %v4488_v5 }
 0x981   : > { %v4633_v34 = vor.u32 1.1754944e-38, %v4632_v0 }
 0x982   : > { %v4610_v44 = vadd.f32 %v7127_v53, %v4609_v62  ;;  %4980 = vmatmul.bf16.vlgmr.msrb.gmra.mxu2 %v4786_v20  ;;  %v4532_v13 = vmul.f32 %v7688_v49, %v4517_v2 }
 0x983   : > { %v7129_v42 = vpop.eup %7128  ;;  %v4461_v18 = vpop.f32.mrf.mxu2 }
 0x984   : > { %v4614_v1 = vsel %vm4613_vm11, %v7127_v53, %v4610_v44  ;;  %v4622_v46 = vmul.f32 %v7129_v42, %v4571_v60  ;;  %v4462_v10 = vadd.f32 %v4461_v18, %v7622_v48  ;;  %v4519_v40 = vpop.f32.mrf.mxu1  ;;  %v7731_v4 = vadd.f32 %v7690_v22, %v4532_v13 }
 0x985   : > { %v4619_v11 = vsel %vm4616_vm12, %v4618_v6, %v4614_v1  ;;  %vm4627_vm13 = vweird.f32 %v7129_v42 }
 0x986   : > { %v4698_v37 = vmul.f32 %v4619_v11, %v7710_v14  ;;  %v4623_v17 = vsub.f32 1.0, %v4622_v46  ;;  %v4491_v21 = vadd.f32 %v4490_v7, %v4462_v10  ;;  %v7131_v36 = vpop.eup %7130  ;;  %v6500_v15 = vmul.f32 -1.442695, %v7731_v4  ;;  %vm4628_vm15 = vmor %vm4626_vm14, %vm4627_vm13 }
 0x987   : > { %v4762_v47 = vld [vmem:[#allocation2 + $0x8] sm:$0xff]  ;;  %v4572_v16 = vadd.f32 1.0, %v7131_v36 }
 0x988   : > { %4706 = vst [vmem:[#allocation2 + $0x11] sm:$0xff] %v4698_v37  ;;  %v4624_v30 = vmul.f32 %v7129_v42, %v4623_v17  ;;  %v4520_v48 = vadd.f32 %v4519_v40, %v4491_v21  ;;  %v4785_v57 = vpack.c.bf16 %v4762_v47, %v4761_v25  ;;  %v4777_v50 = vld [vmem:[#allocation2 + $0x2] sm:$0xff] }
 0x989   : > { %7132 = vrcp.f32 %v4572_v16  ;;  %v4647_v12 = vand.u32 2147483648, %v4572_v16  ;;  %v4645_v24 = vand.u32 2147483647, %v4572_v16  ;;  %vm4641_vm2 = vweird.f32 %v4572_v16 }
 0x98a   : > { %v4625_v33 = vadd.f32 %v7129_v42, %v4624_v30  ;;  %v4533_v14 = vmul.f32 %v7688_v49, %v4520_v48  ;;  %4951 = vmatmul.bf16.vlgmr.msra.gmra.mxu3 %v4785_v57  ;;  %7134 = vpow2.f32 %v6500_v15 }
 0x98b   : > { %v4463_v3 = vpop.f32.mrf.mxu2  ;;  %v4648_v5 = vor.u32 1.1754944e-38, %v4647_v12  ;;  %vm4646_vm4 = vcmp.eq.f32.partialorder %v4645_v24, 8.507059e+37 }
 0x98c   : > { %v4629_v9 = vsel %vm4628_vm15, %v7129_v42, %v4625_v33  ;;  %v7736_v35 = vadd.f32 %v7690_v22, %v4533_v14  ;;  %v4464_v31 = vadd.f32 %v4463_v3, %v7629_v63  ;;  %v4521_v32 = vpop.f32.mrf.mxu1 }
 0x98d   : > { %v4634_v38 = vsel %vm4631_vm0, %v4633_v34, %v4629_v9 }
 0x98e   : > { %v4699_v61 = vmul.f32 %v4634_v38, %v7715_v19  ;;  %v6501_v43 = vmul.f32 -1.442695, %v7736_v35  ;;  %v4493_v45 = vadd.f32 %v4492_v39, %v4464_v31 }
 0x98f   : > { %v4778_v51 = vld [vmem:[#allocation2 + $0xa] sm:$0xff]  ;;  %v7133_v29 = vpop.eup %7132 }
 0x990   : > { %4707 = vst [vmem:[#allocation2 + $0x19] sm:$0xff] %v4699_v61  ;;  %7136 = vpow2.f32 %v6501_v43  ;;  %v4522_v53 = vadd.f32 %v4521_v32, %v4493_v45  ;;  %v4787_v54 = vpack.c.bf16 %v4778_v51, %v4777_v50  ;;  %v4789_v60 = vpack.c.bf16 %v4699_v61, %v4698_v37  ;;  %v7135_v8 = vpop.eup %7134  ;;  %v4763_v62 = vld [vmem:[#allocation2 + $0x10] sm:$0xff] }
 0x991   : > { %v4637_v41 = vmul.f32 %v7133_v29, %v4572_v16  ;;  %v4573_v28 = vadd.f32 1.0, %v7135_v8  ;;  %vm4642_vm1 = vweird.f32 %v7133_v29 }
 0x992   : > { %v4534_v63 = vmul.f32 %v7688_v49, %v4522_v53  ;;  %5009 = vmatmul.bf16.vlgmr.msrb.gmra.mxu0 %v4787_v54  ;;  %4985 = vmatmul.bf16.gmra.mxu2 %v4789_v60  ;;  %vm4643_vm3 = vmor %vm4641_vm2, %vm4642_vm1 }
 0x993   : > { %v4638_v19 = vsub.f32 1.0, %v4637_v41  ;;  %7138 = vrcp.f32 %v4573_v28  ;;  %v4660_v46 = vand.u32 2147483647, %v4573_v28  ;;  %v4662_v10 = vand.u32 2147483648, %v4573_v28 }
 0x994   : > { %v7743_v52 = vadd.f32 %v7690_v22, %v4534_v63  ;;  %vm4656_vm6 = vweird.f32 %v4573_v28 }
 0x995   : > { %v4639_v59 = vmul.f32 %v7133_v29, %v4638_v19  ;;  %vm4661_vm8 = vcmp.eq.f32.partialorder %v4660_v46, 8.507059e+37  ;;  %v4663_v21 = vor.u32 1.1754944e-38, %v4662_v10 }
 0x996   : > { %v7137_v55 = vpop.eup %7136  ;;  %v6502_v27 = vmul.f32 -1.442695, %v7743_v52 }
 0x997   : > { %v4574_v58 = vadd.f32 1.0, %v7137_v55  ;;  %v4764_v26 = vld [vmem:[#allocation2 + $0x18] sm:$0xff]  ;;  %v4640_v20 = vadd.f32 %v7133_v29, %v4639_v59 }
 0x998   : > { %7140 = vpow2.f32 %v6502_v27  ;;  %v4788_v49 = vpack.c.bf16 %v4764_v26, %v4763_v62  ;;  %v4779_v36 = vld [vmem:[#allocation2 + $0x12] sm:$0xff]  ;;  %v7750_v27 = vld [vmem:[#allocation8 + $0xd] ss:$0 sm:$0xff] }
 0x999   : > { %7142 = vrcp.f32 %v4574_v58  ;;  %v4644_v22 = vsel %vm4643_vm3, %v7133_v29, %v4640_v20  ;;  %v7139_v44 = vpop.eup %7138  ;;  %v4677_v23 = vand.u32 2147483648, %v4574_v58  ;;  %v4675_v25 = vand.u32 2147483647, %v4574_v58 }
 0x99a   : > { %4956 = vmatmul.bf16.gmra.mxu3 %v4788_v49  ;;  %v4649_v42 = vsel %vm4646_vm4, %v4648_v5, %v4644_v22  ;;  %v4652_v7 = vmul.f32 %v7139_v44, %v4573_v28  ;;  %vm4657_vm5 = vweird.f32 %v7139_v44  ;;  %vm4671_vm10 = vweird.f32 %v4574_v58 }
 0x99b   : > { %v4700_v6 = vmul.f32 %v4649_v42, %v7723_v56  ;;  %vm4658_vm7 = vmor %vm4656_vm6, %vm4657_vm5  ;;  %v4678_v33 = vor.u32 1.1754944e-38, %v4677_v23  ;;  %vm4676_vm12 = vcmp.eq.f32.partialorder %v4675_v25, 8.507059e+37 }
 0x99c   : > { %v4653_v18 = vsub.f32 1.0, %v4652_v7 }
 0x99d   : > { %4708 = vst [vmem:[#allocation2 + $0x21] sm:$0xff] %v4700_v6 }
 0x99e   : > { %v7141_v2 = vpop.eup %7140  ;;  %v4654_v13 = vmul.f32 %v7139_v44, %v4653_v18 }
 0x99f   : > { %v7143_v1 = vpop.eup %7142  ;;  %v4575_v11 = vadd.f32 1.0, %v7141_v2 }
 0x9a0   : > { %v4667_v40 = vmul.f32 %v7143_v1, %v4574_v58  ;;  %v4655_v37 = vadd.f32 %v7139_v44, %v4654_v13  ;;  %vm4672_vm9 = vweird.f32 %v7143_v1 }
 0x9a1   : > { %7144 = vrcp.f32 %v4575_v11  ;;  %vm4673_vm11 = vmor %vm4671_vm10, %vm4672_vm9  ;;  %v4692_v39 = vand.u32 2147483648, %v4575_v11  ;;  %v4690_v61 = vand.u32 2147483647, %v4575_v11  ;;  %vm4686_vm14 = vweird.f32 %v4575_v11 }
 0x9a2   : > { %v4668_v17 = vsub.f32 1.0, %v4667_v40  ;;  %v4659_v56 = vsel %vm4658_vm7, %v7139_v44, %v4655_v37 }
 0x9a3   : > { %v4664_v47 = vsel %vm4661_vm8, %v4663_v21, %v4659_v56  ;;  %v4693_v45 = vor.u32 1.1754944e-38, %v4692_v39  ;;  %vm4691_vm0 = vcmp.eq.f32.partialorder %v4690_v61, 8.507059e+37 }
 0x9a4   : > { %v4669_v0 = vmul.f32 %v7143_v1, %v4668_v17  ;;  %v4780_v30 = vld [vmem:[#allocation2 + $0x1a] sm:$0xff]  ;;  %v4701_v48 = vmul.f32 %v4664_v47, %v7731_v4 }
 0x9a5   : > { %v4790_v16 = vpack.c.bf16 %v4780_v30, %v4779_v36  ;;  %v4765_v32 = vld [vmem:[#allocation2 + $0x20] sm:$0xff] }
 0x9a6   : > { %v4670_v57 = vadd.f32 %v7143_v1, %v4669_v0  ;;  %4709 = vst [vmem:[#allocation2 + $0x29] sm:$0xff] %v4701_v48  ;;  %v4792_v3 = vpack.c.bf16 %v4701_v48, %v4700_v6 }
 0x9a7   : > { %v7145_v15 = vpop.eup %7144  ;;  %5014 = vmatmul.bf16.gmra.mxu0 %v4790_v16 }
 0x9a8   : > { %v4674_v14 = vsel %vm4673_vm11, %v7143_v1, %v4670_v57  ;;  %v4682_v34 = vmul.f32 %v7145_v15, %v4575_v11  ;;  %4990 = vmatmul.bf16.gmra.mxu2 %v4792_v3  ;;  %vm4687_vm13 = vweird.f32 %v7145_v15 }
 0x9a9   : > { %v4679_v9 = vsel %vm4676_vm12, %v4678_v33, %v4674_v14  ;;  %vm4688_vm15 = vmor %vm4686_vm14, %vm4687_vm13 }
 0x9aa   : > { %v4702_v31 = vmul.f32 %v4679_v9, %v7736_v35  ;;  %v4683_v38 = vsub.f32 1.0, %v4682_v34 }
 0x9ac   : > { %4710 = vst [vmem:[#allocation2 + $0x31] sm:$0xff] %v4702_v31  ;;  %v4684_v4 = vmul.f32 %v7145_v15, %v4683_v38 }
 0x9ad   : > { %v4766_v50 = vld [vmem:[#allocation2 + $0x28] sm:$0xff] }
 0x9ae   : > { %v4685_v43 = vadd.f32 %v7145_v15, %v4684_v4  ;;  %v4791_v53 = vpack.c.bf16 %v4766_v50, %v4765_v32  ;;  %v4781_v35 = vld [vmem:[#allocation2 + $0x22] sm:$0xff] }
 0x9b0   : > { %v4689_v51 = vsel %vm4688_vm15, %v7145_v15, %v4685_v43  ;;  %4961 = vmatmul.bf16.gmra.mxu3 %v4791_v53 }
 0x9b1   : > { %v4694_v54 = vsel %vm4691_vm0, %v4693_v45, %v4689_v51 }
 0x9b2   : > { %v4703_v60 = vmul.f32 %v4694_v54, %v7743_v52 }
 0x9b3   : > { %v4782_v29 = vld [vmem:[#allocation2 + $0x2a] sm:$0xff] }
 0x9b4   : > { %4711 = vst [vmem:[#allocation2 + $0x39] sm:$0xff] %v4703_v60  ;;  %v4793_v8 = vpack.c.bf16 %v4782_v29, %v4781_v35  ;;  %v4795_v41 = vpack.c.bf16 %v4703_v60, %v4702_v31  ;;  %v4767_v28 = vld [vmem:[#allocation2 + $0x30] sm:$0xff] }
 0x9b7   : > { %5019 = vmatmul.bf16.gmra.mxu0 %v4793_v8 }
 0x9b8   : > { %4995 = vmatmul.bf16.gmra.mxu2 %v4795_v41 }
 0x9bb   : > { %v4768_v63 = vld [vmem:[#allocation2 + $0x38] sm:$0xff] }
 0x9bc   : > { %v4794_v19 = vpack.c.bf16 %v4768_v63, %v4767_v28  ;;  %v4783_v12 = vld [vmem:[#allocation2 + $0x32] sm:$0xff]  ;;  %v4784_v55 = vld [vmem:[#allocation2 + $0x3a] sm:$0xff] }
 0x9bd   : > { %v4796_v59 = vpack.c.bf16 %v4784_v55, %v4783_v12 }
 0x9c0   : > { %4966 = vmatmul.bf16.gmra.mxu3 %v4794_v19 }
 0x9c7   : > { %5024 = vmatmul.bf16.gmra.mxu0 %v4796_v59 }
 0xa05   : > { %v4981_v24 = vpop.f32.mrf.mxu2 }
 0xa0d   : > { %v4952_v52 = vpop.f32.mrf.mxu3  ;;  %v4983_v49 = vpop.f32.mrf.mxu2 }
 0xa0e   : > { %v4953_v58 = vadd.f32 %v7750_v27, %v4952_v52 }
 0xa0f   : > { %v5010_v62 = vpop.f32.mrf.mxu0 }
 0xa10   : > { %v4982_v26 = vadd.f32 %v4981_v24, %v4953_v58 }
 0xa12   : > { %v5011_v20 = vadd.f32 %v5010_v62, %v4982_v26 }
 0xa14   : > { %7146 = vtanh.f32 %v5011_v20 }
 0xa15   : > { %v4954_v5 = vpop.f32.mrf.mxu3  ;;  %v4986_v1 = vpop.f32.mrf.mxu2 }
 0xa16   : > { %v4955_v22 = vadd.f32 %v7750_v27, %v4954_v5 }
 0xa17   : > { %v5012_v42 = vpop.f32.mrf.mxu0 }
 0xa18   : > { %v4984_v44 = vadd.f32 %v4983_v49, %v4955_v22 }
 0xa1a   : > { %v7147_v6 = vpop.eup %7146  ;;  %v5013_v7 = vadd.f32 %v5012_v42, %v4984_v44 }
 0xa1b   : > { %v5038_v2 = vmul.f32 6.2831855, %v7147_v6 }
 0xa1c   : > { %7148 = vtanh.f32 %v5013_v7 }
 0xa1d   : > { %5046 = vst [vmem:[%s7758_s17] sm:$0xff] %v5038_v2  ;;  %v4957_v18 = vpop.f32.mrf.mxu3  ;;  %v4988_v23 = vpop.f32.mrf.mxu2 }
 0xa1e   : > { %v4958_v46 = vadd.f32 %v7750_v27, %v4957_v18 }
 0xa20   : > { %v4987_v11 = vadd.f32 %v4986_v1, %v4958_v46 }
 0xa22   : > { %v7149_v10 = vpop.eup %7148 }
 0xa23   : > { %v5039_v13 = vmul.f32 6.2831855, %v7149_v10 }
 0xa24   : > { %v5015_v40 = vpop.f32.mrf.mxu0 }
 0xa25   : > { %5047 = vst [vmem:[%s7758_s17 + $0x8] sm:$0xff] %v5039_v13  ;;  %v4959_v37 = vpop.f32.mrf.mxu3  ;;  %v5016_v17 = vadd.f32 %v5015_v40, %v4987_v11 }
 0xa26   : > { %v4960_v21 = vadd.f32 %v7750_v27, %v4959_v37 }
 0xa27   : > { %7150 = vtanh.f32 %v5016_v17 }
 0xa28   : > { %v4989_v56 = vadd.f32 %v4988_v23, %v4960_v21 }
 0xa2b   : > { %v4991_v30 = vpop.f32.mrf.mxu2 }
 0xa2c   : > { %v5017_v0 = vpop.f32.mrf.mxu0 }
 0xa2d   : > { %v7151_v25 = vpop.eup %7150  ;;  %v5018_v47 = vadd.f32 %v5017_v0, %v4989_v56 }
 0xa2e   : > { %v5040_v36 = vmul.f32 6.2831855, %v7151_v25 }
 0xa2f   : > { %7152 = vtanh.f32 %v5018_v47 }
 0xa30   : > { %5048 = vst [vmem:[%s7758_s17 + $0x10] sm:$0xff] %v5040_v36 }
 0xa33   : > { %v4962_v48 = vpop.f32.mrf.mxu3  ;;  %v4993_v3 = vpop.f32.mrf.mxu2 }
 0xa34   : > { %v5020_v57 = vpop.f32.mrf.mxu0  ;;  %v4963_v15 = vadd.f32 %v7750_v27, %v4962_v48 }
 0xa35   : > { %v7153_v16 = vpop.eup %7152 }
 0xa36   : > { %v5041_v33 = vmul.f32 6.2831855, %v7153_v16  ;;  %v4992_v14 = vadd.f32 %v4991_v30, %v4963_v15 }
 0xa38   : > { %5049 = vst [vmem:[%s7758_s17 + $0x18] sm:$0xff] %v5041_v33  ;;  %v5021_v34 = vadd.f32 %v5020_v57, %v4992_v14 }
 0xa3a   : > { %7154 = vtanh.f32 %v5021_v34 }
 0xa3b   : > { %v4964_v9 = vpop.f32.mrf.mxu3  ;;  %v4996_v32 = vpop.f32.mrf.mxu2 }
 0xa3c   : > { %v5022_v31 = vpop.f32.mrf.mxu0  ;;  %v4965_v38 = vadd.f32 %v7750_v27, %v4964_v9 }
 0xa3e   : > { %v4994_v39 = vadd.f32 %v4993_v3, %v4965_v38 }
 0xa40   : > { %v7155_v4 = vpop.eup %7154  ;;  %v5023_v61 = vadd.f32 %v5022_v31, %v4994_v39 }
 0xa41   : > { %v5042_v43 = vmul.f32 6.2831855, %v7155_v4 }
 0xa42   : > { %7156 = vtanh.f32 %v5023_v61 }
 0xa43   : > { %5050 = vst [vmem:[%s7758_s17 + $0x20] sm:$0xff] %v5042_v43  ;;  %v4967_v45 = vpop.f32.mrf.mxu3  ;;  %v4998_v41 = vpop.f32.mrf.mxu2 }
 0xa44   : > { %v4968_v50 = vadd.f32 %v7750_v27, %v4967_v45  ;;  %v5025_v51 = vpop.f32.mrf.mxu0 }
 0xa46   : > { %v4997_v53 = vadd.f32 %v4996_v32, %v4968_v50 }
 0xa48   : > { %v7157_v54 = vpop.eup %7156  ;;  %v5026_v60 = vadd.f32 %v5025_v51, %v4997_v53 }
 0xa49   : > { %v5043_v35 = vmul.f32 6.2831855, %v7157_v54 }
 0xa4a   : > { %7158 = vtanh.f32 %v5026_v60 }
 0xa4b   : > { %5051 = vst [vmem:[%s7758_s17 + $0x28] sm:$0xff] %v5043_v35  ;;  %v4969_v29 = vpop.f32.mrf.mxu3 }
 0xa4c   : > { %v4970_v8 = vadd.f32 %v7750_v27, %v4969_v29  ;;  %v5027_v28 = vpop.f32.mrf.mxu0 }
 0xa4e   : > { %v4999_v63 = vadd.f32 %v4998_v41, %v4970_v8 }
 0xa50   : > { %v7159_v19 = vpop.eup %7158  ;;  %v5028_v12 = vadd.f32 %v5027_v28, %v4999_v63 }
 0xa51   : > { %v5044_v55 = vmul.f32 6.2831855, %v7159_v19 }
 0xa52   : > { %7160 = vtanh.f32 %v5028_v12 }
 0xa53   : > { %5052 = vst [vmem:[%s7758_s17 + $0x30] sm:$0xff] %v5044_v55 }
 0xa58   : > { %v7161_v59 = vpop.eup %7160 }
 0xa59   : > { %v5045_v24 = vmul.f32 6.2831855, %v7161_v59 }
 0xa5b   : > { %5053 = vst [vmem:[%s7758_s17 + $0x38] sm:$0xff] %v5045_v24 }
 0xa5c PF: > { %s19_s21 = sadd.s32 1, %s7300_s21  }
 0xa5d   : > { %p16_p7 = scmp.ge.s32.totalorder %s19_s21, 4  }
 0xa5f   :  { %18 = sbr.rel (!%p16_p7) target bundleno = 3 (0x3), region = 106 }
 0xa64   :  { %5075 = vsyncpa [#allocation4], 1 }
 0xa65   :  { %5077 = vsyncpa [#allocation4 + $0x1], 1 }
 0xa66   :  { %5078 = vsyncpa [#allocation6], 1 }
 0xa67   :  { %5079 = vsyncpa [#allocation9], 1 }

</bundles_post_ra>
